<compile_context>
chip_gen: v5e
topology: v5e:2x2
jax: 0.10.0
libtpu: 0.0.40
codegen_flags: <defaults>
</compile_context>

<pallas_src>
import math
import functools

import jax
import jax.numpy as jnp
from jax import lax
from jax.experimental import pallas as pl
from jax.experimental.pallas import tpu as pltpu  # noqa: F401  (TPU backend assumed)


LN_EPS = 1e-5
# dot_general dimension numbers for A @ B^T (contract last dim of both operands).
_TRANS_B = (((1,), (1,)), ((), ()))


# ----------------------------- in-kernel math helpers -----------------------------

def _erf(x):
    # Abramowitz & Stegun 7.1.26 rational approximation, |err| <= 1.5e-7.
    # TODO(synk): swap for a native lax.erf lowering if/when Mosaic exposes it.
    a1, a2, a3, a4, a5 = (0.254829592, -0.284496736, 1.421413741,
                          -1.453152027, 1.061405429)
    p = 0.3275911
    s = jnp.where(x >= 0.0, 1.0, -1.0)
    ax = jnp.abs(x)
    t = 1.0 / (1.0 + p * ax)
    poly = ((((a5 * t + a4) * t + a3) * t + a2) * t + a1) * t
    return s * (1.0 - poly * jnp.exp(-ax * ax))


def _gelu_exact(x):
    # PyTorch F.gelu(approximate='none') == 0.5 * x * (1 + erf(x / sqrt(2)))
    return 0.5 * x * (1.0 + _erf(x * (1.0 / math.sqrt(2.0))))


def _layer_norm(x, g, b, eps=LN_EPS):
    mu = jnp.mean(x, axis=-1, keepdims=True)
    xc = x - mu
    var = jnp.mean(xc * xc, axis=-1, keepdims=True)
    return xc * lax.rsqrt(var + eps) * g + b


def _softmax_last(s):
    m = jnp.max(s, axis=-1, keepdims=True)
    e = jnp.exp(s - m)
    return e / jnp.sum(e, axis=-1, keepdims=True)


def _attention(Q, K, V, wo_t, bo, *, B, Tq, Tk, num_heads):
    """Multi-head attention core on already-projected Q/K/V.

    Q: (B*Tq, H), K/V: (B*Tk, H), wo_t: (H, H) in (in, out) layout.
    Per-head outputs are folded straight through the matching row-block of wo_t
    (no lane concat); batches are stacked along the sublane (row) axis.
    """
    H = Q.shape[-1]
    hd = H // num_heads
    scale = 1.0 / math.sqrt(hd)
    out_rows = []
    for b in range(B):                                   # static unroll (B small)
        Qb = Q[b * Tq:(b + 1) * Tq, :]
        Kb = K[b * Tk:(b + 1) * Tk, :]
        Vb = V[b * Tk:(b + 1) * Tk, :]
        ctx = None
        for h in range(num_heads):                       # static unroll over heads
            lo = h * hd
            qh = Qb[:, lo:lo + hd]
            kh = Kb[:, lo:lo + hd]
            vh = Vb[:, lo:lo + hd]
            s = lax.dot_general(qh, kh, _TRANS_B,
                                preferred_element_type=jnp.float32) * scale
            p = _softmax_last(s)
            head = jnp.dot(p, vh, preferred_element_type=jnp.float32)      # (Tq, hd)
            contrib = jnp.dot(head, wo_t[lo:lo + hd, :],
                              preferred_element_type=jnp.float32)          # (Tq, H)
            ctx = contrib if ctx is None else ctx + contrib
        out_rows.append(ctx)
    return jnp.concatenate(out_rows, axis=0) + bo        # row (sublane) concat only


# ----------------------------------- kernel ---------------------------------------

def fused_decoder_kernel(
        x_ref, mem_ref,
        sa_wq, sa_bq, sa_wk, sa_bk, sa_wv, sa_bv, sa_wo, sa_bo,
        ca_wq, ca_bq, ca_wk, ca_bk, ca_wv, ca_bv, ca_wo, ca_bo,
        ln1_g, ln1_b, ln2_g, ln2_b, ln3_g, ln3_b,
        ff_w1, ff_b1, ff_w2, ff_b2,
        val_w, val_b,
        out_ref, value_ref,
        *, num_layers, num_heads, B, T, S):
    """Full RLEnhancedDecoder forward: num_layers shared-weight decoder layers
    (post-norm, exact GELU) + value head, all in one kernel invocation."""
    x = x_ref[...].astype(jnp.float32)        # (B*T, H)
    mem = mem_ref[...].astype(jnp.float32)    # (B*S, H)

    # Load shared weights once (matrices arrive pre-transposed to (in, out)).
    w_sa_q, b_sa_q = sa_wq[...], sa_bq[...]
    w_sa_k, b_sa_k = sa_wk[...], sa_bk[...]
    w_sa_v, b_sa_v = sa_wv[...], sa_bv[...]
    w_sa_o, b_sa_o = sa_wo[...], sa_bo[...]
    w_ca_q, b_ca_q = ca_wq[...], ca_bq[...]
    w_ca_k, b_ca_k = ca_wk[...], ca_bk[...]
    w_ca_v, b_ca_v = ca_wv[...], ca_bv[...]
    w_ca_o, b_ca_o = ca_wo[...], ca_bo[...]
    g1, be1 = ln1_g[...], ln1_b[...]
    g2, be2 = ln2_g[...], ln2_b[...]
    g3, be3 = ln3_g[...], ln3_b[...]
    w1, b1 = ff_w1[...], ff_b1[...]
    w2, b2 = ff_w2[...], ff_b2[...]

    # Cross-attention K/V depend only on `memory` and the shared weights ->
    # compute once, reuse across every layer.
    ca_K = jnp.dot(mem, w_ca_k, preferred_element_type=jnp.float32) + b_ca_k
    ca_V = jnp.dot(mem, w_ca_v, preferred_element_type=jnp.float32) + b_ca_v

    def layer(h_in):
        # self-attention block: h = norm1(h + SA(h))   (projections over all B*T rows)
        q = jnp.dot(h_in, w_sa_q, preferred_element_type=jnp.float32) + b_sa_q
        k = jnp.dot(h_in, w_sa_k, preferred_element_type=jnp.float32) + b_sa_k
        v = jnp.dot(h_in, w_sa_v, preferred_element_type=jnp.float32) + b_sa_v
        sa = _attention(q, k, v, w_sa_o, b_sa_o, B=B, Tq=T, Tk=T, num_heads=num_heads)
        h1 = _layer_norm(h_in + sa, g1, be1)

        # cross-attention block: h = norm2(h + MHA(h, memory, memory))
        q2 = jnp.dot(h1, w_ca_q, preferred_element_type=jnp.float32) + b_ca_q
        ca = _attention(q2, ca_K, ca_V, w_ca_o, b_ca_o,
                        B=B, Tq=T, Tk=S, num_heads=num_heads)
        h2 = _layer_norm(h1 + ca, g2, be2)

        # feed-forward block: h = norm3(h + W2 gelu(W1 h + b1) + b2)
        hid = _gelu_exact(jnp.dot(h2, w1, preferred_element_type=jnp.float32) + b1)
        ff = jnp.dot(hid, w2, preferred_element_type=jnp.float32) + b2
        return _layer_norm(h2 + ff, g3, be3)

    # Shared-weight layer stack, fully in VMEM/vregs (no HBM round trips).
    x = lax.fori_loop(0, num_layers, lambda _, c: layer(c), x, unroll=True)

    out_ref[...] = x.astype(out_ref.dtype)

    # Fused value head: mean over the sequence axis per batch, then Linear(H, 1).
    pooled = jnp.concatenate(
        [jnp.mean(x[b * T:(b + 1) * T, :], axis=0, keepdims=True) for b in range(B)],
        axis=0)                                                           # (B, H)
    value_ref[...] = (jnp.dot(pooled, val_w[...],
                              preferred_element_type=jnp.float32)
                      + val_b[...]).astype(value_ref.dtype)


# ----------------------------------- wrapper ---------------------------------------

LAYER_PARAM_NAMES = (
    "sa_wq", "sa_bq", "sa_wk", "sa_bk", "sa_wv", "sa_bv", "sa_wo", "sa_bo",
    "ca_wq", "ca_bq", "ca_wk", "ca_bk", "ca_wv", "ca_bv", "ca_wo", "ca_bo",
    "ln1_g", "ln1_b", "ln2_g", "ln2_b", "ln3_g", "ln3_b",
    "ff_w1", "ff_b1", "ff_w2", "ff_b2",
)
_MAT_NAMES = frozenset({"sa_wq", "sa_wk", "sa_wv", "sa_wo",
                        "ca_wq", "ca_wk", "ca_wv", "ca_wo",
                        "ff_w1", "ff_w2"})


def rl_enhanced_decoder_forward(tgt, memory, params, *, num_layers, num_heads):
    """tgt: (T, B, H), memory: (S, B, H) — PyTorch batch_first=False convention."""
    T, B, H = tgt.shape
    S = memory.shape[0]

    # Flatten to lane-major row slabs: rows = batch*token, lanes = hidden.
    x2d = jnp.transpose(tgt, (1, 0, 2)).reshape(B * T, H).astype(jnp.float32)
    m2d = jnp.transpose(memory, (1, 0, 2)).reshape(B * S, H).astype(jnp.float32)

    # Pre-transpose all weight matrices once, outside the kernel (PyTorch stores
    # (out, in); the kernel wants (in, out) so it never transposes on-chip).
    layer_args = [params[n].T if n in _MAT_NAMES else params[n]
                  for n in LAYER_PARAM_NAMES]
    val_w = params["value_w"].T          # (1, H) -> (H, 1)
    val_b = params["value_b"]            # (1, 1)

    kernel = functools.partial(fused_decoder_kernel, num_layers=num_layers,
                               num_heads=num_heads, B=B, T=T, S=S)

    # Single grid-less pallas_call: every operand is one whole VMEM block (no
    # pipelining / double-buffering needed at these sizes), one dispatch total.
    y2d, value = pl.pallas_call(
        kernel,
        out_shape=(jax.ShapeDtypeStruct((B * T, H), jnp.float32),
                   jax.ShapeDtypeStruct((B, 1), jnp.float32)),
    )(x2d, m2d, *layer_args, val_w, val_b)

    output = jnp.transpose(y2d.reshape(B, T, H), (1, 0, 2))   # back to (T, B, H)
    return output, value


# ------------------------------ deterministic params -------------------------------

def init_params(key, hidden_dim):
    """Parameters in PyTorch layouts: Linear weights are (out_features, in_features)."""
    H = hidden_dim
    F = 4 * H
    keys = jax.random.split(key, 22)
    scale = 1.0 / math.sqrt(H)

    def w(k, shape, s=scale):
        return jax.random.normal(k, shape, dtype=jnp.float32) * s

    p = {}
    # self-attention (in_proj split into q/k/v)
    p["sa_wq"], p["sa_bq"] = w(keys[0], (H, H)), w(keys[1], (1, H), 0.02)
    p["sa_wk"], p["sa_bk"] = w(keys[2], (H, H)), w(keys[3], (1, H), 0.02)
    p["sa_wv"], p["sa_bv"] = w(keys[4], (H, H)), w(keys[5], (1, H), 0.02)
    p["sa_wo"], p["sa_bo"] = w(keys[6], (H, H)), w(keys[7], (1, H), 0.02)
    # cross-attention
    p["ca_wq"], p["ca_bq"] = w(keys[8], (H, H)), w(keys[9], (1, H), 0.02)
    p["ca_wk"], p["ca_bk"] = w(keys[10], (H, H)), w(keys[11], (1, H), 0.02)
    p["ca_wv"], p["ca_bv"] = w(keys[12], (H, H)), w(keys[13], (1, H), 0.02)
    p["ca_wo"], p["ca_bo"] = w(keys[14], (H, H)), w(keys[15], (1, H), 0.02)
    # layer norms (PyTorch init: weight=1, bias=0)
    for n in ("ln1", "ln2", "ln3"):
        p[f"{n}_g"] = jnp.ones((1, H), jnp.float32)
        p[f"{n}_b"] = jnp.zeros((1, H), jnp.float32)
    # feed-forward
    p["ff_w1"], p["ff_b1"] = w(keys[16], (F, H)), w(keys[17], (1, F), 0.02)
    p["ff_w2"], p["ff_b2"] = w(keys[18], (H, F), 1.0 / math.sqrt(F)), w(keys[19], (1, H), 0.02)
    # value head (PyTorch Linear(H, 1): weight (1, H), bias (1,))
    p["value_w"] = w(keys[20], (1, H))
    p["value_b"] = w(keys[21], (1, 1), 0.02)
    return p


# --------------------------------------- main --------------------------------------

if __name__ == "__main__":
    hidden_dim, num_layers, num_heads = 32, 2, 4
    T, S, B = 8, 8, 2

    key = jax.random.PRNGKey(0)
    k_tgt, k_mem, k_par = jax.random.split(key, 3)
    tgt = jax.random.normal(k_tgt, (T, B, hidden_dim), dtype=jnp.float32)
    memory = jax.random.normal(k_mem, (S, B, hidden_dim), dtype=jnp.float32)
    params = init_params(k_par, hidden_dim)

    fwd = jax.jit(functools.partial(rl_enhanced_decoder_forward,
                                    num_layers=num_layers, num_heads=num_heads))
    output, value = fwd(tgt, memory, params)
    jax.block_until_ready((output, value))

    assert output.shape == (T, B, hidden_dim), output.shape
    assert value.shape == (B, 1), value.shape
    assert bool(jnp.all(jnp.isfinite(output))) and bool(jnp.all(jnp.isfinite(value)))
    print("KERNEL_OK")
</pallas_src>

<mosaic_0001>
module attributes {stable_mosaic.version = 11 : i64} {
  func.func @fused_decoder_kernel(%arg0: memref<16x32xf32, #tpu.memory_space<vmem>>, %arg1: memref<16x32xf32, #tpu.memory_space<vmem>>, %arg2: memref<32x32xf32, #tpu.memory_space<vmem>>, %arg3: memref<1x32xf32, #tpu.memory_space<vmem>>, %arg4: memref<32x32xf32, #tpu.memory_space<vmem>>, %arg5: memref<1x32xf32, #tpu.memory_space<vmem>>, %arg6: memref<32x32xf32, #tpu.memory_space<vmem>>, %arg7: memref<1x32xf32, #tpu.memory_space<vmem>>, %arg8: memref<32x32xf32, #tpu.memory_space<vmem>>, %arg9: memref<1x32xf32, #tpu.memory_space<vmem>>, %arg10: memref<32x32xf32, #tpu.memory_space<vmem>>, %arg11: memref<1x32xf32, #tpu.memory_space<vmem>>, %arg12: memref<32x32xf32, #tpu.memory_space<vmem>>, %arg13: memref<1x32xf32, #tpu.memory_space<vmem>>, %arg14: memref<32x32xf32, #tpu.memory_space<vmem>>, %arg15: memref<1x32xf32, #tpu.memory_space<vmem>>, %arg16: memref<32x32xf32, #tpu.memory_space<vmem>>, %arg17: memref<1x32xf32, #tpu.memory_space<vmem>>, %arg18: memref<1x32xf32, #tpu.memory_space<vmem>>, %arg19: memref<1x32xf32, #tpu.memory_space<vmem>>, %arg20: memref<1x32xf32, #tpu.memory_space<vmem>>, %arg21: memref<1x32xf32, #tpu.memory_space<vmem>>, %arg22: memref<1x32xf32, #tpu.memory_space<vmem>>, %arg23: memref<1x32xf32, #tpu.memory_space<vmem>>, %arg24: memref<32x128xf32, #tpu.memory_space<vmem>>, %arg25: memref<1x128xf32, #tpu.memory_space<vmem>>, %arg26: memref<128x32xf32, #tpu.memory_space<vmem>>, %arg27: memref<1x32xf32, #tpu.memory_space<vmem>>, %arg28: memref<32x1xf32, #tpu.memory_space<vmem>>, %arg29: memref<1x1xf32, #tpu.memory_space<vmem>>, %arg30: memref<16x32xf32, #tpu.memory_space<vmem>>, %arg31: memref<2x1xf32, #tpu.memory_space<vmem>>) attributes {dimension_semantics = [], scalar_prefetch = 0 : i64, scratch_operands = 0 : i64, tpu.core_type = #tpu.core_type<tc>} {
    %c0 = arith.constant 0 : index
    %c0_0 = arith.constant 0 : index
    %0 = vector.load %arg0[%c0, %c0_0] : memref<16x32xf32, #tpu.memory_space<vmem>>, vector<16x32xf32>
    %c0_1 = arith.constant 0 : index
    %c0_2 = arith.constant 0 : index
    %1 = vector.load %arg1[%c0_1, %c0_2] : memref<16x32xf32, #tpu.memory_space<vmem>>, vector<16x32xf32>
    %c0_3 = arith.constant 0 : index
    %c0_4 = arith.constant 0 : index
    %2 = vector.load %arg2[%c0_3, %c0_4] : memref<32x32xf32, #tpu.memory_space<vmem>>, vector<32x32xf32>
    %c0_5 = arith.constant 0 : index
    %c0_6 = arith.constant 0 : index
    %3 = vector.load %arg3[%c0_5, %c0_6] : memref<1x32xf32, #tpu.memory_space<vmem>>, vector<1x32xf32>
    %c0_7 = arith.constant 0 : index
    %c0_8 = arith.constant 0 : index
    %4 = vector.load %arg4[%c0_7, %c0_8] : memref<32x32xf32, #tpu.memory_space<vmem>>, vector<32x32xf32>
    %c0_9 = arith.constant 0 : index
    %c0_10 = arith.constant 0 : index
    %5 = vector.load %arg5[%c0_9, %c0_10] : memref<1x32xf32, #tpu.memory_space<vmem>>, vector<1x32xf32>
    %c0_11 = arith.constant 0 : index
    %c0_12 = arith.constant 0 : index
    %6 = vector.load %arg6[%c0_11, %c0_12] : memref<32x32xf32, #tpu.memory_space<vmem>>, vector<32x32xf32>
    %c0_13 = arith.constant 0 : index
    %c0_14 = arith.constant 0 : index
    %7 = vector.load %arg7[%c0_13, %c0_14] : memref<1x32xf32, #tpu.memory_space<vmem>>, vector<1x32xf32>
    %c0_15 = arith.constant 0 : index
    %c0_16 = arith.constant 0 : index
    %8 = vector.load %arg8[%c0_15, %c0_16] : memref<32x32xf32, #tpu.memory_space<vmem>>, vector<32x32xf32>
    %c0_17 = arith.constant 0 : index
    %c0_18 = arith.constant 0 : index
    %9 = vector.load %arg9[%c0_17, %c0_18] : memref<1x32xf32, #tpu.memory_space<vmem>>, vector<1x32xf32>
    %c0_19 = arith.constant 0 : index
    %c0_20 = arith.constant 0 : index
    %10 = vector.load %arg10[%c0_19, %c0_20] : memref<32x32xf32, #tpu.memory_space<vmem>>, vector<32x32xf32>
    %c0_21 = arith.constant 0 : index
    %c0_22 = arith.constant 0 : index
    %11 = vector.load %arg11[%c0_21, %c0_22] : memref<1x32xf32, #tpu.memory_space<vmem>>, vector<1x32xf32>
    %c0_23 = arith.constant 0 : index
    %c0_24 = arith.constant 0 : index
    %12 = vector.load %arg12[%c0_23, %c0_24] : memref<32x32xf32, #tpu.memory_space<vmem>>, vector<32x32xf32>
    %c0_25 = arith.constant 0 : index
    %c0_26 = arith.constant 0 : index
    %13 = vector.load %arg13[%c0_25, %c0_26] : memref<1x32xf32, #tpu.memory_space<vmem>>, vector<1x32xf32>
    %c0_27 = arith.constant 0 : index
    %c0_28 = arith.constant 0 : index
    %14 = vector.load %arg14[%c0_27, %c0_28] : memref<32x32xf32, #tpu.memory_space<vmem>>, vector<32x32xf32>
    %c0_29 = arith.constant 0 : index
    %c0_30 = arith.constant 0 : index
    %15 = vector.load %arg15[%c0_29, %c0_30] : memref<1x32xf32, #tpu.memory_space<vmem>>, vector<1x32xf32>
    %c0_31 = arith.constant 0 : index
    %c0_32 = arith.constant 0 : index
    %16 = vector.load %arg16[%c0_31, %c0_32] : memref<32x32xf32, #tpu.memory_space<vmem>>, vector<32x32xf32>
    %c0_33 = arith.constant 0 : index
    %c0_34 = arith.constant 0 : index
    %17 = vector.load %arg17[%c0_33, %c0_34] : memref<1x32xf32, #tpu.memory_space<vmem>>, vector<1x32xf32>
    %c0_35 = arith.constant 0 : index
    %c0_36 = arith.constant 0 : index
    %18 = vector.load %arg18[%c0_35, %c0_36] : memref<1x32xf32, #tpu.memory_space<vmem>>, vector<1x32xf32>
    %c0_37 = arith.constant 0 : index
    %c0_38 = arith.constant 0 : index
    %19 = vector.load %arg19[%c0_37, %c0_38] : memref<1x32xf32, #tpu.memory_space<vmem>>, vector<1x32xf32>
    %c0_39 = arith.constant 0 : index
    %c0_40 = arith.constant 0 : index
    %20 = vector.load %arg20[%c0_39, %c0_40] : memref<1x32xf32, #tpu.memory_space<vmem>>, vector<1x32xf32>
    %c0_41 = arith.constant 0 : index
    %c0_42 = arith.constant 0 : index
    %21 = vector.load %arg21[%c0_41, %c0_42] : memref<1x32xf32, #tpu.memory_space<vmem>>, vector<1x32xf32>
    %c0_43 = arith.constant 0 : index
    %c0_44 = arith.constant 0 : index
    %22 = vector.load %arg22[%c0_43, %c0_44] : memref<1x32xf32, #tpu.memory_space<vmem>>, vector<1x32xf32>
    %c0_45 = arith.constant 0 : index
    %c0_46 = arith.constant 0 : index
    %23 = vector.load %arg23[%c0_45, %c0_46] : memref<1x32xf32, #tpu.memory_space<vmem>>, vector<1x32xf32>
    %c0_47 = arith.constant 0 : index
    %c0_48 = arith.constant 0 : index
    %24 = vector.load %arg24[%c0_47, %c0_48] : memref<32x128xf32, #tpu.memory_space<vmem>>, vector<32x128xf32>
    %c0_49 = arith.constant 0 : index
    %c0_50 = arith.constant 0 : index
    %25 = vector.load %arg25[%c0_49, %c0_50] : memref<1x128xf32, #tpu.memory_space<vmem>>, vector<1x128xf32>
    %c0_51 = arith.constant 0 : index
    %c0_52 = arith.constant 0 : index
    %26 = vector.load %arg26[%c0_51, %c0_52] : memref<128x32xf32, #tpu.memory_space<vmem>>, vector<128x32xf32>
    %c0_53 = arith.constant 0 : index
    %c0_54 = arith.constant 0 : index
    %27 = vector.load %arg27[%c0_53, %c0_54] : memref<1x32xf32, #tpu.memory_space<vmem>>, vector<1x32xf32>
    %cst = arith.constant dense<0.000000e+00> : vector<16x32xf32>
    %28 = tpu.matmul %1, %12, %cst {dimension_numbers = #tpu.dot_dimension_numbers<[1], [0], [0], [1], [0, 0, 1, 1], [], []>} : vector<16x32xf32>, vector<32x32xf32>, vector<16x32xf32> -> vector<16x32xf32>
    %29 = vector.broadcast %13 : vector<1x32xf32> to vector<16x32xf32>
    %30 = arith.addf %28, %29 : vector<16x32xf32>
    %cst_55 = arith.constant dense<0.000000e+00> : vector<16x32xf32>
    %31 = tpu.matmul %1, %14, %cst_55 {dimension_numbers = #tpu.dot_dimension_numbers<[1], [0], [0], [1], [0, 0, 1, 1], [], []>} : vector<16x32xf32>, vector<32x32xf32>, vector<16x32xf32> -> vector<16x32xf32>
    %32 = vector.broadcast %15 : vector<1x32xf32> to vector<16x32xf32>
    %33 = arith.addf %31, %32 : vector<16x32xf32>
    %c0_i32 = arith.constant 0 : i32
    %cst_56 = arith.constant dense<0.000000e+00> : vector<16x32xf32>
    %34 = tpu.matmul %0, %2, %cst_56 {dimension_numbers = #tpu.dot_dimension_numbers<[1], [0], [0], [1], [0, 0, 1, 1], [], []>} : vector<16x32xf32>, vector<32x32xf32>, vector<16x32xf32> -> vector<16x32xf32>
    %35 = vector.broadcast %3 : vector<1x32xf32> to vector<16x32xf32>
    %36 = arith.addf %34, %35 : vector<16x32xf32>
    %cst_57 = arith.constant dense<0.000000e+00> : vector<16x32xf32>
    %37 = tpu.matmul %0, %4, %cst_57 {dimension_numbers = #tpu.dot_dimension_numbers<[1], [0], [0], [1], [0, 0, 1, 1], [], []>} : vector<16x32xf32>, vector<32x32xf32>, vector<16x32xf32> -> vector<16x32xf32>
    %38 = vector.broadcast %5 : vector<1x32xf32> to vector<16x32xf32>
    %39 = arith.addf %37, %38 : vector<16x32xf32>
    %cst_58 = arith.constant dense<0.000000e+00> : vector<16x32xf32>
    %40 = tpu.matmul %0, %6, %cst_58 {dimension_numbers = #tpu.dot_dimension_numbers<[1], [0], [0], [1], [0, 0, 1, 1], [], []>} : vector<16x32xf32>, vector<32x32xf32>, vector<16x32xf32> -> vector<16x32xf32>
    %41 = vector.broadcast %7 : vector<1x32xf32> to vector<16x32xf32>
    %42 = arith.addf %40, %41 : vector<16x32xf32>
    %43 = vector.extract_strided_slice %36 {offsets = [0, 0], sizes = [8, 32], strides = [1, 1]} : vector<16x32xf32> to vector<8x32xf32>
    %44 = vector.extract_strided_slice %39 {offsets = [0, 0], sizes = [8, 32], strides = [1, 1]} : vector<16x32xf32> to vector<8x32xf32>
    %45 = vector.extract_strided_slice %42 {offsets = [0, 0], sizes = [8, 32], strides = [1, 1]} : vector<16x32xf32> to vector<8x32xf32>
    %46 = vector.extract_strided_slice %43 {offsets = [0, 0], sizes = [8, 8], strides = [1, 1]} : vector<8x32xf32> to vector<8x8xf32>
    %47 = vector.extract_strided_slice %44 {offsets = [0, 0], sizes = [8, 8], strides = [1, 1]} : vector<8x32xf32> to vector<8x8xf32>
    %48 = vector.extract_strided_slice %45 {offsets = [0, 0], sizes = [8, 8], strides = [1, 1]} : vector<8x32xf32> to vector<8x8xf32>
    %cst_59 = arith.constant dense<0.000000e+00> : vector<8x8xf32>
    %49 = tpu.matmul %46, %47, %cst_59 {dimension_numbers = #tpu.dot_dimension_numbers<[1], [1], [0], [0], [0, 0, 1, 0], [], []>} : vector<8x8xf32>, vector<8x8xf32>, vector<8x8xf32> -> vector<8x8xf32>
    %cst_60 = arith.constant 0.353553385 : f32
    %50 = vector.broadcast %cst_60 : f32 to vector<8x8xf32>
    %51 = arith.mulf %49, %50 : vector<8x8xf32>
    %cst_61 = arith.constant dense<0xFF800000> : vector<8xf32>
    %52 = vector.multi_reduction <maximumf>, %51, %cst_61 [1] : vector<8x8xf32> to vector<8xf32>
    %53 = vector.shape_cast %52 : vector<8xf32> to vector<8x1xf32>
    %54 = vector.broadcast %53 : vector<8x1xf32> to vector<8x8xf32>
    %55 = arith.subf %51, %54 : vector<8x8xf32>
    %56 = math.exp %55 : vector<8x8xf32>
    %cst_62 = arith.constant dense<0.000000e+00> : vector<8xf32>
    %57 = vector.multi_reduction <add>, %56, %cst_62 [1] : vector<8x8xf32> to vector<8xf32>
    %58 = vector.shape_cast %57 : vector<8xf32> to vector<8x1xf32>
    %59 = vector.broadcast %58 : vector<8x1xf32> to vector<8x8xf32>
    %60 = arith.divf %56, %59 : vector<8x8xf32>
    %cst_63 = arith.constant dense<0.000000e+00> : vector<8x8xf32>
    %61 = tpu.matmul %60, %48, %cst_63 {dimension_numbers = #tpu.dot_dimension_numbers<[1], [0], [0], [1], [0, 0, 1, 1], [], []>} : vector<8x8xf32>, vector<8x8xf32>, vector<8x8xf32> -> vector<8x8xf32>
    %62 = vector.extract_strided_slice %8 {offsets = [0, 0], sizes = [8, 32], strides = [1, 1]} : vector<32x32xf32> to vector<8x32xf32>
    %cst_64 = arith.constant dense<0.000000e+00> : vector<8x32xf32>
    %63 = tpu.matmul %61, %62, %cst_64 {dimension_numbers = #tpu.dot_dimension_numbers<[1], [0], [0], [1], [0, 0, 1, 1], [], []>} : vector<8x8xf32>, vector<8x32xf32>, vector<8x32xf32> -> vector<8x32xf32>
    %64 = vector.extract_strided_slice %43 {offsets = [0, 8], sizes = [8, 8], strides = [1, 1]} : vector<8x32xf32> to vector<8x8xf32>
    %65 = vector.extract_strided_slice %44 {offsets = [0, 8], sizes = [8, 8], strides = [1, 1]} : vector<8x32xf32> to vector<8x8xf32>
    %66 = vector.extract_strided_slice %45 {offsets = [0, 8], sizes = [8, 8], strides = [1, 1]} : vector<8x32xf32> to vector<8x8xf32>
    %cst_65 = arith.constant dense<0.000000e+00> : vector<8x8xf32>
    %67 = tpu.matmul %64, %65, %cst_65 {dimension_numbers = #tpu.dot_dimension_numbers<[1], [1], [0], [0], [0, 0, 1, 0], [], []>} : vector<8x8xf32>, vector<8x8xf32>, vector<8x8xf32> -> vector<8x8xf32>
    %cst_66 = arith.constant 0.353553385 : f32
    %68 = vector.broadcast %cst_66 : f32 to vector<8x8xf32>
    %69 = arith.mulf %67, %68 : vector<8x8xf32>
    %cst_67 = arith.constant dense<0xFF800000> : vector<8xf32>
    %70 = vector.multi_reduction <maximumf>, %69, %cst_67 [1] : vector<8x8xf32> to vector<8xf32>
    %71 = vector.shape_cast %70 : vector<8xf32> to vector<8x1xf32>
    %72 = vector.broadcast %71 : vector<8x1xf32> to vector<8x8xf32>
    %73 = arith.subf %69, %72 : vector<8x8xf32>
    %74 = math.exp %73 : vector<8x8xf32>
    %cst_68 = arith.constant dense<0.000000e+00> : vector<8xf32>
    %75 = vector.multi_reduction <add>, %74, %cst_68 [1] : vector<8x8xf32> to vector<8xf32>
    %76 = vector.shape_cast %75 : vector<8xf32> to vector<8x1xf32>
    %77 = vector.broadcast %76 : vector<8x1xf32> to vector<8x8xf32>
    %78 = arith.divf %74, %77 : vector<8x8xf32>
    %cst_69 = arith.constant dense<0.000000e+00> : vector<8x8xf32>
    %79 = tpu.matmul %78, %66, %cst_69 {dimension_numbers = #tpu.dot_dimension_numbers<[1], [0], [0], [1], [0, 0, 1, 1], [], []>} : vector<8x8xf32>, vector<8x8xf32>, vector<8x8xf32> -> vector<8x8xf32>
    %80 = vector.extract_strided_slice %8 {offsets = [8, 0], sizes = [8, 32], strides = [1, 1]} : vector<32x32xf32> to vector<8x32xf32>
    %cst_70 = arith.constant dense<0.000000e+00> : vector<8x32xf32>
    %81 = tpu.matmul %79, %80, %cst_70 {dimension_numbers = #tpu.dot_dimension_numbers<[1], [0], [0], [1], [0, 0, 1, 1], [], []>} : vector<8x8xf32>, vector<8x32xf32>, vector<8x32xf32> -> vector<8x32xf32>
    %82 = arith.addf %63, %81 : vector<8x32xf32>
    %83 = vector.extract_strided_slice %43 {offsets = [0, 16], sizes = [8, 8], strides = [1, 1]} : vector<8x32xf32> to vector<8x8xf32>
    %84 = vector.extract_strided_slice %44 {offsets = [0, 16], sizes = [8, 8], strides = [1, 1]} : vector<8x32xf32> to vector<8x8xf32>
    %85 = vector.extract_strided_slice %45 {offsets = [0, 16], sizes = [8, 8], strides = [1, 1]} : vector<8x32xf32> to vector<8x8xf32>
    %cst_71 = arith.constant dense<0.000000e+00> : vector<8x8xf32>
    %86 = tpu.matmul %83, %84, %cst_71 {dimension_numbers = #tpu.dot_dimension_numbers<[1], [1], [0], [0], [0, 0, 1, 0], [], []>} : vector<8x8xf32>, vector<8x8xf32>, vector<8x8xf32> -> vector<8x8xf32>
    %cst_72 = arith.constant 0.353553385 : f32
    %87 = vector.broadcast %cst_72 : f32 to vector<8x8xf32>
    %88 = arith.mulf %86, %87 : vector<8x8xf32>
    %cst_73 = arith.constant dense<0xFF800000> : vector<8xf32>
    %89 = vector.multi_reduction <maximumf>, %88, %cst_73 [1] : vector<8x8xf32> to vector<8xf32>
    %90 = vector.shape_cast %89 : vector<8xf32> to vector<8x1xf32>
    %91 = vector.broadcast %90 : vector<8x1xf32> to vector<8x8xf32>
    %92 = arith.subf %88, %91 : vector<8x8xf32>
    %93 = math.exp %92 : vector<8x8xf32>
    %cst_74 = arith.constant dense<0.000000e+00> : vector<8xf32>
    %94 = vector.multi_reduction <add>, %93, %cst_74 [1] : vector<8x8xf32> to vector<8xf32>
    %95 = vector.shape_cast %94 : vector<8xf32> to vector<8x1xf32>
    %96 = vector.broadcast %95 : vector<8x1xf32> to vector<8x8xf32>
    %97 = arith.divf %93, %96 : vector<8x8xf32>
    %cst_75 = arith.constant dense<0.000000e+00> : vector<8x8xf32>
    %98 = tpu.matmul %97, %85, %cst_75 {dimension_numbers = #tpu.dot_dimension_numbers<[1], [0], [0], [1], [0, 0, 1, 1], [], []>} : vector<8x8xf32>, vector<8x8xf32>, vector<8x8xf32> -> vector<8x8xf32>
    %99 = vector.extract_strided_slice %8 {offsets = [16, 0], sizes = [8, 32], strides = [1, 1]} : vector<32x32xf32> to vector<8x32xf32>
    %cst_76 = arith.constant dense<0.000000e+00> : vector<8x32xf32>
    %100 = tpu.matmul %98, %99, %cst_76 {dimension_numbers = #tpu.dot_dimension_numbers<[1], [0], [0], [1], [0, 0, 1, 1], [], []>} : vector<8x8xf32>, vector<8x32xf32>, vector<8x32xf32> -> vector<8x32xf32>
    %101 = arith.addf %82, %100 : vector<8x32xf32>
    %102 = vector.extract_strided_slice %43 {offsets = [0, 24], sizes = [8, 8], strides = [1, 1]} : vector<8x32xf32> to vector<8x8xf32>
    %103 = vector.extract_strided_slice %44 {offsets = [0, 24], sizes = [8, 8], strides = [1, 1]} : vector<8x32xf32> to vector<8x8xf32>
    %104 = vector.extract_strided_slice %45 {offsets = [0, 24], sizes = [8, 8], strides = [1, 1]} : vector<8x32xf32> to vector<8x8xf32>
    %cst_77 = arith.constant dense<0.000000e+00> : vector<8x8xf32>
    %105 = tpu.matmul %102, %103, %cst_77 {dimension_numbers = #tpu.dot_dimension_numbers<[1], [1], [0], [0], [0, 0, 1, 0], [], []>} : vector<8x8xf32>, vector<8x8xf32>, vector<8x8xf32> -> vector<8x8xf32>
    %cst_78 = arith.constant 0.353553385 : f32
    %106 = vector.broadcast %cst_78 : f32 to vector<8x8xf32>
    %107 = arith.mulf %105, %106 : vector<8x8xf32>
    %cst_79 = arith.constant dense<0xFF800000> : vector<8xf32>
    %108 = vector.multi_reduction <maximumf>, %107, %cst_79 [1] : vector<8x8xf32> to vector<8xf32>
    %109 = vector.shape_cast %108 : vector<8xf32> to vector<8x1xf32>
    %110 = vector.broadcast %109 : vector<8x1xf32> to vector<8x8xf32>
    %111 = arith.subf %107, %110 : vector<8x8xf32>
    %112 = math.exp %111 : vector<8x8xf32>
    %cst_80 = arith.constant dense<0.000000e+00> : vector<8xf32>
    %113 = vector.multi_reduction <add>, %112, %cst_80 [1] : vector<8x8xf32> to vector<8xf32>
    %114 = vector.shape_cast %113 : vector<8xf32> to vector<8x1xf32>
    %115 = vector.broadcast %114 : vector<8x1xf32> to vector<8x8xf32>
    %116 = arith.divf %112, %115 : vector<8x8xf32>
    %cst_81 = arith.constant dense<0.000000e+00> : vector<8x8xf32>
    %117 = tpu.matmul %116, %104, %cst_81 {dimension_numbers = #tpu.dot_dimension_numbers<[1], [0], [0], [1], [0, 0, 1, 1], [], []>} : vector<8x8xf32>, vector<8x8xf32>, vector<8x8xf32> -> vector<8x8xf32>
    %118 = vector.extract_strided_slice %8 {offsets = [24, 0], sizes = [8, 32], strides = [1, 1]} : vector<32x32xf32> to vector<8x32xf32>
    %cst_82 = arith.constant dense<0.000000e+00> : vector<8x32xf32>
    %119 = tpu.matmul %117, %118, %cst_82 {dimension_numbers = #tpu.dot_dimension_numbers<[1], [0], [0], [1], [0, 0, 1, 1], [], []>} : vector<8x8xf32>, vector<8x32xf32>, vector<8x32xf32> -> vector<8x32xf32>
    %120 = arith.addf %101, %119 : vector<8x32xf32>
    %121 = vector.extract_strided_slice %36 {offsets = [8, 0], sizes = [8, 32], strides = [1, 1]} : vector<16x32xf32> to vector<8x32xf32>
    %122 = vector.extract_strided_slice %39 {offsets = [8, 0], sizes = [8, 32], strides = [1, 1]} : vector<16x32xf32> to vector<8x32xf32>
    %123 = vector.extract_strided_slice %42 {offsets = [8, 0], sizes = [8, 32], strides = [1, 1]} : vector<16x32xf32> to vector<8x32xf32>
    %124 = vector.extract_strided_slice %121 {offsets = [0, 0], sizes = [8, 8], strides = [1, 1]} : vector<8x32xf32> to vector<8x8xf32>
    %125 = vector.extract_strided_slice %122 {offsets = [0, 0], sizes = [8, 8], strides = [1, 1]} : vector<8x32xf32> to vector<8x8xf32>
    %126 = vector.extract_strided_slice %123 {offsets = [0, 0], sizes = [8, 8], strides = [1, 1]} : vector<8x32xf32> to vector<8x8xf32>
    %cst_83 = arith.constant dense<0.000000e+00> : vector<8x8xf32>
    %127 = tpu.matmul %124, %125, %cst_83 {dimension_numbers = #tpu.dot_dimension_numbers<[1], [1], [0], [0], [0, 0, 1, 0], [], []>} : vector<8x8xf32>, vector<8x8xf32>, vector<8x8xf32> -> vector<8x8xf32>
    %cst_84 = arith.constant 0.353553385 : f32
    %128 = vector.broadcast %cst_84 : f32 to vector<8x8xf32>
    %129 = arith.mulf %127, %128 : vector<8x8xf32>
    %cst_85 = arith.constant dense<0xFF800000> : vector<8xf32>
    %130 = vector.multi_reduction <maximumf>, %129, %cst_85 [1] : vector<8x8xf32> to vector<8xf32>
    %131 = vector.shape_cast %130 : vector<8xf32> to vector<8x1xf32>
    %132 = vector.broadcast %131 : vector<8x1xf32> to vector<8x8xf32>
    %133 = arith.subf %129, %132 : vector<8x8xf32>
    %134 = math.exp %133 : vector<8x8xf32>
    %cst_86 = arith.constant dense<0.000000e+00> : vector<8xf32>
    %135 = vector.multi_reduction <add>, %134, %cst_86 [1] : vector<8x8xf32> to vector<8xf32>
    %136 = vector.shape_cast %135 : vector<8xf32> to vector<8x1xf32>
    %137 = vector.broadcast %136 : vector<8x1xf32> to vector<8x8xf32>
    %138 = arith.divf %134, %137 : vector<8x8xf32>
    %cst_87 = arith.constant dense<0.000000e+00> : vector<8x8xf32>
    %139 = tpu.matmul %138, %126, %cst_87 {dimension_numbers = #tpu.dot_dimension_numbers<[1], [0], [0], [1], [0, 0, 1, 1], [], []>} : vector<8x8xf32>, vector<8x8xf32>, vector<8x8xf32> -> vector<8x8xf32>
    %140 = vector.extract_strided_slice %8 {offsets = [0, 0], sizes = [8, 32], strides = [1, 1]} : vector<32x32xf32> to vector<8x32xf32>
    %cst_88 = arith.constant dense<0.000000e+00> : vector<8x32xf32>
    %141 = tpu.matmul %139, %140, %cst_88 {dimension_numbers = #tpu.dot_dimension_numbers<[1], [0], [0], [1], [0, 0, 1, 1], [], []>} : vector<8x8xf32>, vector<8x32xf32>, vector<8x32xf32> -> vector<8x32xf32>
    %142 = vector.extract_strided_slice %121 {offsets = [0, 8], sizes = [8, 8], strides = [1, 1]} : vector<8x32xf32> to vector<8x8xf32>
    %143 = vector.extract_strided_slice %122 {offsets = [0, 8], sizes = [8, 8], strides = [1, 1]} : vector<8x32xf32> to vector<8x8xf32>
    %144 = vector.extract_strided_slice %123 {offsets = [0, 8], sizes = [8, 8], strides = [1, 1]} : vector<8x32xf32> to vector<8x8xf32>
    %cst_89 = arith.constant dense<0.000000e+00> : vector<8x8xf32>
    %145 = tpu.matmul %142, %143, %cst_89 {dimension_numbers = #tpu.dot_dimension_numbers<[1], [1], [0], [0], [0, 0, 1, 0], [], []>} : vector<8x8xf32>, vector<8x8xf32>, vector<8x8xf32> -> vector<8x8xf32>
    %cst_90 = arith.constant 0.353553385 : f32
    %146 = vector.broadcast %cst_90 : f32 to vector<8x8xf32>
    %147 = arith.mulf %145, %146 : vector<8x8xf32>
    %cst_91 = arith.constant dense<0xFF800000> : vector<8xf32>
    %148 = vector.multi_reduction <maximumf>, %147, %cst_91 [1] : vector<8x8xf32> to vector<8xf32>
    %149 = vector.shape_cast %148 : vector<8xf32> to vector<8x1xf32>
    %150 = vector.broadcast %149 : vector<8x1xf32> to vector<8x8xf32>
    %151 = arith.subf %147, %150 : vector<8x8xf32>
    %152 = math.exp %151 : vector<8x8xf32>
    %cst_92 = arith.constant dense<0.000000e+00> : vector<8xf32>
    %153 = vector.multi_reduction <add>, %152, %cst_92 [1] : vector<8x8xf32> to vector<8xf32>
    %154 = vector.shape_cast %153 : vector<8xf32> to vector<8x1xf32>
    %155 = vector.broadcast %154 : vector<8x1xf32> to vector<8x8xf32>
    %156 = arith.divf %152, %155 : vector<8x8xf32>
    %cst_93 = arith.constant dense<0.000000e+00> : vector<8x8xf32>
    %157 = tpu.matmul %156, %144, %cst_93 {dimension_numbers = #tpu.dot_dimension_numbers<[1], [0], [0], [1], [0, 0, 1, 1], [], []>} : vector<8x8xf32>, vector<8x8xf32>, vector<8x8xf32> -> vector<8x8xf32>
    %158 = vector.extract_strided_slice %8 {offsets = [8, 0], sizes = [8, 32], strides = [1, 1]} : vector<32x32xf32> to vector<8x32xf32>
    %cst_94 = arith.constant dense<0.000000e+00> : vector<8x32xf32>
    %159 = tpu.matmul %157, %158, %cst_94 {dimension_numbers = #tpu.dot_dimension_numbers<[1], [0], [0], [1], [0, 0, 1, 1], [], []>} : vector<8x8xf32>, vector<8x32xf32>, vector<8x32xf32> -> vector<8x32xf32>
    %160 = arith.addf %141, %159 : vector<8x32xf32>
    %161 = vector.extract_strided_slice %121 {offsets = [0, 16], sizes = [8, 8], strides = [1, 1]} : vector<8x32xf32> to vector<8x8xf32>
    %162 = vector.extract_strided_slice %122 {offsets = [0, 16], sizes = [8, 8], strides = [1, 1]} : vector<8x32xf32> to vector<8x8xf32>
    %163 = vector.extract_strided_slice %123 {offsets = [0, 16], sizes = [8, 8], strides = [1, 1]} : vector<8x32xf32> to vector<8x8xf32>
    %cst_95 = arith.constant dense<0.000000e+00> : vector<8x8xf32>
    %164 = tpu.matmul %161, %162, %cst_95 {dimension_numbers = #tpu.dot_dimension_numbers<[1], [1], [0], [0], [0, 0, 1, 0], [], []>} : vector<8x8xf32>, vector<8x8xf32>, vector<8x8xf32> -> vector<8x8xf32>
    %cst_96 = arith.constant 0.353553385 : f32
    %165 = vector.broadcast %cst_96 : f32 to vector<8x8xf32>
    %166 = arith.mulf %164, %165 : vector<8x8xf32>
    %cst_97 = arith.constant dense<0xFF800000> : vector<8xf32>
    %167 = vector.multi_reduction <maximumf>, %166, %cst_97 [1] : vector<8x8xf32> to vector<8xf32>
    %168 = vector.shape_cast %167 : vector<8xf32> to vector<8x1xf32>
    %169 = vector.broadcast %168 : vector<8x1xf32> to vector<8x8xf32>
    %170 = arith.subf %166, %169 : vector<8x8xf32>
    %171 = math.exp %170 : vector<8x8xf32>
    %cst_98 = arith.constant dense<0.000000e+00> : vector<8xf32>
    %172 = vector.multi_reduction <add>, %171, %cst_98 [1] : vector<8x8xf32> to vector<8xf32>
    %173 = vector.shape_cast %172 : vector<8xf32> to vector<8x1xf32>
    %174 = vector.broadcast %173 : vector<8x1xf32> to vector<8x8xf32>
    %175 = arith.divf %171, %174 : vector<8x8xf32>
    %cst_99 = arith.constant dense<0.000000e+00> : vector<8x8xf32>
    %176 = tpu.matmul %175, %163, %cst_99 {dimension_numbers = #tpu.dot_dimension_numbers<[1], [0], [0], [1], [0, 0, 1, 1], [], []>} : vector<8x8xf32>, vector<8x8xf32>, vector<8x8xf32> -> vector<8x8xf32>
    %177 = vector.extract_strided_slice %8 {offsets = [16, 0], sizes = [8, 32], strides = [1, 1]} : vector<32x32xf32> to vector<8x32xf32>
    %cst_100 = arith.constant dense<0.000000e+00> : vector<8x32xf32>
    %178 = tpu.matmul %176, %177, %cst_100 {dimension_numbers = #tpu.dot_dimension_numbers<[1], [0], [0], [1], [0, 0, 1, 1], [], []>} : vector<8x8xf32>, vector<8x32xf32>, vector<8x32xf32> -> vector<8x32xf32>
    %179 = arith.addf %160, %178 : vector<8x32xf32>
    %180 = vector.extract_strided_slice %121 {offsets = [0, 24], sizes = [8, 8], strides = [1, 1]} : vector<8x32xf32> to vector<8x8xf32>
    %181 = vector.extract_strided_slice %122 {offsets = [0, 24], sizes = [8, 8], strides = [1, 1]} : vector<8x32xf32> to vector<8x8xf32>
    %182 = vector.extract_strided_slice %123 {offsets = [0, 24], sizes = [8, 8], strides = [1, 1]} : vector<8x32xf32> to vector<8x8xf32>
    %cst_101 = arith.constant dense<0.000000e+00> : vector<8x8xf32>
    %183 = tpu.matmul %180, %181, %cst_101 {dimension_numbers = #tpu.dot_dimension_numbers<[1], [1], [0], [0], [0, 0, 1, 0], [], []>} : vector<8x8xf32>, vector<8x8xf32>, vector<8x8xf32> -> vector<8x8xf32>
    %cst_102 = arith.constant 0.353553385 : f32
    %184 = vector.broadcast %cst_102 : f32 to vector<8x8xf32>
    %185 = arith.mulf %183, %184 : vector<8x8xf32>
    %cst_103 = arith.constant dense<0xFF800000> : vector<8xf32>
    %186 = vector.multi_reduction <maximumf>, %185, %cst_103 [1] : vector<8x8xf32> to vector<8xf32>
    %187 = vector.shape_cast %186 : vector<8xf32> to vector<8x1xf32>
    %188 = vector.broadcast %187 : vector<8x1xf32> to vector<8x8xf32>
    %189 = arith.subf %185, %188 : vector<8x8xf32>
    %190 = math.exp %189 : vector<8x8xf32>
    %cst_104 = arith.constant dense<0.000000e+00> : vector<8xf32>
    %191 = vector.multi_reduction <add>, %190, %cst_104 [1] : vector<8x8xf32> to vector<8xf32>
    %192 = vector.shape_cast %191 : vector<8xf32> to vector<8x1xf32>
    %193 = vector.broadcast %192 : vector<8x1xf32> to vector<8x8xf32>
    %194 = arith.divf %190, %193 : vector<8x8xf32>
    %cst_105 = arith.constant dense<0.000000e+00> : vector<8x8xf32>
    %195 = tpu.matmul %194, %182, %cst_105 {dimension_numbers = #tpu.dot_dimension_numbers<[1], [0], [0], [1], [0, 0, 1, 1], [], []>} : vector<8x8xf32>, vector<8x8xf32>, vector<8x8xf32> -> vector<8x8xf32>
    %196 = vector.extract_strided_slice %8 {offsets = [24, 0], sizes = [8, 32], strides = [1, 1]} : vector<32x32xf32> to vector<8x32xf32>
    %cst_106 = arith.constant dense<0.000000e+00> : vector<8x32xf32>
    %197 = tpu.matmul %195, %196, %cst_106 {dimension_numbers = #tpu.dot_dimension_numbers<[1], [0], [0], [1], [0, 0, 1, 1], [], []>} : vector<8x8xf32>, vector<8x32xf32>, vector<8x32xf32> -> vector<8x32xf32>
    %198 = arith.addf %179, %197 : vector<8x32xf32>
    %199 = tpu.concatenate %120, %198 in 0 : vector<8x32xf32>, vector<8x32xf32> -> vector<16x32xf32>
    %200 = vector.broadcast %9 : vector<1x32xf32> to vector<16x32xf32>
    %201 = arith.addf %199, %200 : vector<16x32xf32>
    %202 = arith.addf %0, %201 : vector<16x32xf32>
    %cst_107 = arith.constant dense<0.000000e+00> : vector<16xf32>
    %203 = vector.multi_reduction <add>, %202, %cst_107 [1] : vector<16x32xf32> to vector<16xf32>
    %204 = vector.shape_cast %203 : vector<16xf32> to vector<16x1xf32>
    %cst_108 = arith.constant 3.200000e+01 : f32
    %205 = vector.broadcast %cst_108 : f32 to vector<16x1xf32>
    %206 = arith.divf %204, %205 : vector<16x1xf32>
    %207 = vector.broadcast %206 : vector<16x1xf32> to vector<16x32xf32>
    %208 = arith.subf %202, %207 : vector<16x32xf32>
    %209 = arith.mulf %208, %208 : vector<16x32xf32>
    %cst_109 = arith.constant dense<0.000000e+00> : vector<16xf32>
    %210 = vector.multi_reduction <add>, %209, %cst_109 [1] : vector<16x32xf32> to vector<16xf32>
    %211 = vector.shape_cast %210 : vector<16xf32> to vector<16x1xf32>
    %cst_110 = arith.constant 3.200000e+01 : f32
    %212 = vector.broadcast %cst_110 : f32 to vector<16x1xf32>
    %213 = arith.divf %211, %212 : vector<16x1xf32>
    %cst_111 = arith.constant 9.99999974E-6 : f32
    %214 = vector.broadcast %cst_111 : f32 to vector<16x1xf32>
    %215 = arith.addf %213, %214 : vector<16x1xf32>
    %216 = math.rsqrt %215 : vector<16x1xf32>
    %217 = vector.broadcast %216 : vector<16x1xf32> to vector<16x32xf32>
    %218 = arith.mulf %208, %217 : vector<16x32xf32>
    %219 = vector.broadcast %18 : vector<1x32xf32> to vector<16x32xf32>
    %220 = arith.mulf %218, %219 : vector<16x32xf32>
    %221 = vector.broadcast %19 : vector<1x32xf32> to vector<16x32xf32>
    %222 = arith.addf %220, %221 : vector<16x32xf32>
    %cst_112 = arith.constant dense<0.000000e+00> : vector<16x32xf32>
    %223 = tpu.matmul %222, %10, %cst_112 {dimension_numbers = #tpu.dot_dimension_numbers<[1], [0], [0], [1], [0, 0, 1, 1], [], []>} : vector<16x32xf32>, vector<32x32xf32>, vector<16x32xf32> -> vector<16x32xf32>
    %224 = vector.broadcast %11 : vector<1x32xf32> to vector<16x32xf32>
    %225 = arith.addf %223, %224 : vector<16x32xf32>
    %226 = vector.extract_strided_slice %225 {offsets = [0, 0], sizes = [8, 32], strides = [1, 1]} : vector<16x32xf32> to vector<8x32xf32>
    %227 = vector.extract_strided_slice %30 {offsets = [0, 0], sizes = [8, 32], strides = [1, 1]} : vector<16x32xf32> to vector<8x32xf32>
    %228 = vector.extract_strided_slice %33 {offsets = [0, 0], sizes = [8, 32], strides = [1, 1]} : vector<16x32xf32> to vector<8x32xf32>
    %229 = vector.extract_strided_slice %226 {offsets = [0, 0], sizes = [8, 8], strides = [1, 1]} : vector<8x32xf32> to vector<8x8xf32>
    %230 = vector.extract_strided_slice %227 {offsets = [0, 0], sizes = [8, 8], strides = [1, 1]} : vector<8x32xf32> to vector<8x8xf32>
    %231 = vector.extract_strided_slice %228 {offsets = [0, 0], sizes = [8, 8], strides = [1, 1]} : vector<8x32xf32> to vector<8x8xf32>
    %cst_113 = arith.constant dense<0.000000e+00> : vector<8x8xf32>
    %232 = tpu.matmul %229, %230, %cst_113 {dimension_numbers = #tpu.dot_dimension_numbers<[1], [1], [0], [0], [0, 0, 1, 0], [], []>} : vector<8x8xf32>, vector<8x8xf32>, vector<8x8xf32> -> vector<8x8xf32>
    %cst_114 = arith.constant 0.353553385 : f32
    %233 = vector.broadcast %cst_114 : f32 to vector<8x8xf32>
    %234 = arith.mulf %232, %233 : vector<8x8xf32>
    %cst_115 = arith.constant dense<0xFF800000> : vector<8xf32>
    %235 = vector.multi_reduction <maximumf>, %234, %cst_115 [1] : vector<8x8xf32> to vector<8xf32>
    %236 = vector.shape_cast %235 : vector<8xf32> to vector<8x1xf32>
    %237 = vector.broadcast %236 : vector<8x1xf32> to vector<8x8xf32>
    %238 = arith.subf %234, %237 : vector<8x8xf32>
    %239 = math.exp %238 : vector<8x8xf32>
    %cst_116 = arith.constant dense<0.000000e+00> : vector<8xf32>
    %240 = vector.multi_reduction <add>, %239, %cst_116 [1] : vector<8x8xf32> to vector<8xf32>
    %241 = vector.shape_cast %240 : vector<8xf32> to vector<8x1xf32>
    %242 = vector.broadcast %241 : vector<8x1xf32> to vector<8x8xf32>
    %243 = arith.divf %239, %242 : vector<8x8xf32>
    %cst_117 = arith.constant dense<0.000000e+00> : vector<8x8xf32>
    %244 = tpu.matmul %243, %231, %cst_117 {dimension_numbers = #tpu.dot_dimension_numbers<[1], [0], [0], [1], [0, 0, 1, 1], [], []>} : vector<8x8xf32>, vector<8x8xf32>, vector<8x8xf32> -> vector<8x8xf32>
    %245 = vector.extract_strided_slice %16 {offsets = [0, 0], sizes = [8, 32], strides = [1, 1]} : vector<32x32xf32> to vector<8x32xf32>
    %cst_118 = arith.constant dense<0.000000e+00> : vector<8x32xf32>
    %246 = tpu.matmul %244, %245, %cst_118 {dimension_numbers = #tpu.dot_dimension_numbers<[1], [0], [0], [1], [0, 0, 1, 1], [], []>} : vector<8x8xf32>, vector<8x32xf32>, vector<8x32xf32> -> vector<8x32xf32>
    %247 = vector.extract_strided_slice %226 {offsets = [0, 8], sizes = [8, 8], strides = [1, 1]} : vector<8x32xf32> to vector<8x8xf32>
    %248 = vector.extract_strided_slice %227 {offsets = [0, 8], sizes = [8, 8], strides = [1, 1]} : vector<8x32xf32> to vector<8x8xf32>
    %249 = vector.extract_strided_slice %228 {offsets = [0, 8], sizes = [8, 8], strides = [1, 1]} : vector<8x32xf32> to vector<8x8xf32>
    %cst_119 = arith.constant dense<0.000000e+00> : vector<8x8xf32>
    %250 = tpu.matmul %247, %248, %cst_119 {dimension_numbers = #tpu.dot_dimension_numbers<[1], [1], [0], [0], [0, 0, 1, 0], [], []>} : vector<8x8xf32>, vector<8x8xf32>, vector<8x8xf32> -> vector<8x8xf32>
    %cst_120 = arith.constant 0.353553385 : f32
    %251 = vector.broadcast %cst_120 : f32 to vector<8x8xf32>
    %252 = arith.mulf %250, %251 : vector<8x8xf32>
    %cst_121 = arith.constant dense<0xFF800000> : vector<8xf32>
    %253 = vector.multi_reduction <maximumf>, %252, %cst_121 [1] : vector<8x8xf32> to vector<8xf32>
    %254 = vector.shape_cast %253 : vector<8xf32> to vector<8x1xf32>
    %255 = vector.broadcast %254 : vector<8x1xf32> to vector<8x8xf32>
    %256 = arith.subf %252, %255 : vector<8x8xf32>
    %257 = math.exp %256 : vector<8x8xf32>
    %cst_122 = arith.constant dense<0.000000e+00> : vector<8xf32>
    %258 = vector.multi_reduction <add>, %257, %cst_122 [1] : vector<8x8xf32> to vector<8xf32>
    %259 = vector.shape_cast %258 : vector<8xf32> to vector<8x1xf32>
    %260 = vector.broadcast %259 : vector<8x1xf32> to vector<8x8xf32>
    %261 = arith.divf %257, %260 : vector<8x8xf32>
    %cst_123 = arith.constant dense<0.000000e+00> : vector<8x8xf32>
    %262 = tpu.matmul %261, %249, %cst_123 {dimension_numbers = #tpu.dot_dimension_numbers<[1], [0], [0], [1], [0, 0, 1, 1], [], []>} : vector<8x8xf32>, vector<8x8xf32>, vector<8x8xf32> -> vector<8x8xf32>
    %263 = vector.extract_strided_slice %16 {offsets = [8, 0], sizes = [8, 32], strides = [1, 1]} : vector<32x32xf32> to vector<8x32xf32>
    %cst_124 = arith.constant dense<0.000000e+00> : vector<8x32xf32>
    %264 = tpu.matmul %262, %263, %cst_124 {dimension_numbers = #tpu.dot_dimension_numbers<[1], [0], [0], [1], [0, 0, 1, 1], [], []>} : vector<8x8xf32>, vector<8x32xf32>, vector<8x32xf32> -> vector<8x32xf32>
    %265 = arith.addf %246, %264 : vector<8x32xf32>
    %266 = vector.extract_strided_slice %226 {offsets = [0, 16], sizes = [8, 8], strides = [1, 1]} : vector<8x32xf32> to vector<8x8xf32>
    %267 = vector.extract_strided_slice %227 {offsets = [0, 16], sizes = [8, 8], strides = [1, 1]} : vector<8x32xf32> to vector<8x8xf32>
    %268 = vector.extract_strided_slice %228 {offsets = [0, 16], sizes = [8, 8], strides = [1, 1]} : vector<8x32xf32> to vector<8x8xf32>
    %cst_125 = arith.constant dense<0.000000e+00> : vector<8x8xf32>
    %269 = tpu.matmul %266, %267, %cst_125 {dimension_numbers = #tpu.dot_dimension_numbers<[1], [1], [0], [0], [0, 0, 1, 0], [], []>} : vector<8x8xf32>, vector<8x8xf32>, vector<8x8xf32> -> vector<8x8xf32>
    %cst_126 = arith.constant 0.353553385 : f32
    %270 = vector.broadcast %cst_126 : f32 to vector<8x8xf32>
    %271 = arith.mulf %269, %270 : vector<8x8xf32>
    %cst_127 = arith.constant dense<0xFF800000> : vector<8xf32>
    %272 = vector.multi_reduction <maximumf>, %271, %cst_127 [1] : vector<8x8xf32> to vector<8xf32>
    %273 = vector.shape_cast %272 : vector<8xf32> to vector<8x1xf32>
    %274 = vector.broadcast %273 : vector<8x1xf32> to vector<8x8xf32>
    %275 = arith.subf %271, %274 : vector<8x8xf32>
    %276 = math.exp %275 : vector<8x8xf32>
    %cst_128 = arith.constant dense<0.000000e+00> : vector<8xf32>
    %277 = vector.multi_reduction <add>, %276, %cst_128 [1] : vector<8x8xf32> to vector<8xf32>
    %278 = vector.shape_cast %277 : vector<8xf32> to vector<8x1xf32>
    %279 = vector.broadcast %278 : vector<8x1xf32> to vector<8x8xf32>
    %280 = arith.divf %276, %279 : vector<8x8xf32>
    %cst_129 = arith.constant dense<0.000000e+00> : vector<8x8xf32>
    %281 = tpu.matmul %280, %268, %cst_129 {dimension_numbers = #tpu.dot_dimension_numbers<[1], [0], [0], [1], [0, 0, 1, 1], [], []>} : vector<8x8xf32>, vector<8x8xf32>, vector<8x8xf32> -> vector<8x8xf32>
    %282 = vector.extract_strided_slice %16 {offsets = [16, 0], sizes = [8, 32], strides = [1, 1]} : vector<32x32xf32> to vector<8x32xf32>
    %cst_130 = arith.constant dense<0.000000e+00> : vector<8x32xf32>
    %283 = tpu.matmul %281, %282, %cst_130 {dimension_numbers = #tpu.dot_dimension_numbers<[1], [0], [0], [1], [0, 0, 1, 1], [], []>} : vector<8x8xf32>, vector<8x32xf32>, vector<8x32xf32> -> vector<8x32xf32>
    %284 = arith.addf %265, %283 : vector<8x32xf32>
    %285 = vector.extract_strided_slice %226 {offsets = [0, 24], sizes = [8, 8], strides = [1, 1]} : vector<8x32xf32> to vector<8x8xf32>
    %286 = vector.extract_strided_slice %227 {offsets = [0, 24], sizes = [8, 8], strides = [1, 1]} : vector<8x32xf32> to vector<8x8xf32>
    %287 = vector.extract_strided_slice %228 {offsets = [0, 24], sizes = [8, 8], strides = [1, 1]} : vector<8x32xf32> to vector<8x8xf32>
    %cst_131 = arith.constant dense<0.000000e+00> : vector<8x8xf32>
    %288 = tpu.matmul %285, %286, %cst_131 {dimension_numbers = #tpu.dot_dimension_numbers<[1], [1], [0], [0], [0, 0, 1, 0], [], []>} : vector<8x8xf32>, vector<8x8xf32>, vector<8x8xf32> -> vector<8x8xf32>
    %cst_132 = arith.constant 0.353553385 : f32
    %289 = vector.broadcast %cst_132 : f32 to vector<8x8xf32>
    %290 = arith.mulf %288, %289 : vector<8x8xf32>
    %cst_133 = arith.constant dense<0xFF800000> : vector<8xf32>
    %291 = vector.multi_reduction <maximumf>, %290, %cst_133 [1] : vector<8x8xf32> to vector<8xf32>
    %292 = vector.shape_cast %291 : vector<8xf32> to vector<8x1xf32>
    %293 = vector.broadcast %292 : vector<8x1xf32> to vector<8x8xf32>
    %294 = arith.subf %290, %293 : vector<8x8xf32>
    %295 = math.exp %294 : vector<8x8xf32>
    %cst_134 = arith.constant dense<0.000000e+00> : vector<8xf32>
    %296 = vector.multi_reduction <add>, %295, %cst_134 [1] : vector<8x8xf32> to vector<8xf32>
    %297 = vector.shape_cast %296 : vector<8xf32> to vector<8x1xf32>
    %298 = vector.broadcast %297 : vector<8x1xf32> to vector<8x8xf32>
    %299 = arith.divf %295, %298 : vector<8x8xf32>
    %cst_135 = arith.constant dense<0.000000e+00> : vector<8x8xf32>
    %300 = tpu.matmul %299, %287, %cst_135 {dimension_numbers = #tpu.dot_dimension_numbers<[1], [0], [0], [1], [0, 0, 1, 1], [], []>} : vector<8x8xf32>, vector<8x8xf32>, vector<8x8xf32> -> vector<8x8xf32>
    %301 = vector.extract_strided_slice %16 {offsets = [24, 0], sizes = [8, 32], strides = [1, 1]} : vector<32x32xf32> to vector<8x32xf32>
    %cst_136 = arith.constant dense<0.000000e+00> : vector<8x32xf32>
    %302 = tpu.matmul %300, %301, %cst_136 {dimension_numbers = #tpu.dot_dimension_numbers<[1], [0], [0], [1], [0, 0, 1, 1], [], []>} : vector<8x8xf32>, vector<8x32xf32>, vector<8x32xf32> -> vector<8x32xf32>
    %303 = arith.addf %284, %302 : vector<8x32xf32>
    %304 = vector.extract_strided_slice %225 {offsets = [8, 0], sizes = [8, 32], strides = [1, 1]} : vector<16x32xf32> to vector<8x32xf32>
    %305 = vector.extract_strided_slice %30 {offsets = [8, 0], sizes = [8, 32], strides = [1, 1]} : vector<16x32xf32> to vector<8x32xf32>
    %306 = vector.extract_strided_slice %33 {offsets = [8, 0], sizes = [8, 32], strides = [1, 1]} : vector<16x32xf32> to vector<8x32xf32>
    %307 = vector.extract_strided_slice %304 {offsets = [0, 0], sizes = [8, 8], strides = [1, 1]} : vector<8x32xf32> to vector<8x8xf32>
    %308 = vector.extract_strided_slice %305 {offsets = [0, 0], sizes = [8, 8], strides = [1, 1]} : vector<8x32xf32> to vector<8x8xf32>
    %309 = vector.extract_strided_slice %306 {offsets = [0, 0], sizes = [8, 8], strides = [1, 1]} : vector<8x32xf32> to vector<8x8xf32>
    %cst_137 = arith.constant dense<0.000000e+00> : vector<8x8xf32>
    %310 = tpu.matmul %307, %308, %cst_137 {dimension_numbers = #tpu.dot_dimension_numbers<[1], [1], [0], [0], [0, 0, 1, 0], [], []>} : vector<8x8xf32>, vector<8x8xf32>, vector<8x8xf32> -> vector<8x8xf32>
    %cst_138 = arith.constant 0.353553385 : f32
    %311 = vector.broadcast %cst_138 : f32 to vector<8x8xf32>
    %312 = arith.mulf %310, %311 : vector<8x8xf32>
    %cst_139 = arith.constant dense<0xFF800000> : vector<8xf32>
    %313 = vector.multi_reduction <maximumf>, %312, %cst_139 [1] : vector<8x8xf32> to vector<8xf32>
    %314 = vector.shape_cast %313 : vector<8xf32> to vector<8x1xf32>
    %315 = vector.broadcast %314 : vector<8x1xf32> to vector<8x8xf32>
    %316 = arith.subf %312, %315 : vector<8x8xf32>
    %317 = math.exp %316 : vector<8x8xf32>
    %cst_140 = arith.constant dense<0.000000e+00> : vector<8xf32>
    %318 = vector.multi_reduction <add>, %317, %cst_140 [1] : vector<8x8xf32> to vector<8xf32>
    %319 = vector.shape_cast %318 : vector<8xf32> to vector<8x1xf32>
    %320 = vector.broadcast %319 : vector<8x1xf32> to vector<8x8xf32>
    %321 = arith.divf %317, %320 : vector<8x8xf32>
    %cst_141 = arith.constant dense<0.000000e+00> : vector<8x8xf32>
    %322 = tpu.matmul %321, %309, %cst_141 {dimension_numbers = #tpu.dot_dimension_numbers<[1], [0], [0], [1], [0, 0, 1, 1], [], []>} : vector<8x8xf32>, vector<8x8xf32>, vector<8x8xf32> -> vector<8x8xf32>
    %323 = vector.extract_strided_slice %16 {offsets = [0, 0], sizes = [8, 32], strides = [1, 1]} : vector<32x32xf32> to vector<8x32xf32>
    %cst_142 = arith.constant dense<0.000000e+00> : vector<8x32xf32>
    %324 = tpu.matmul %322, %323, %cst_142 {dimension_numbers = #tpu.dot_dimension_numbers<[1], [0], [0], [1], [0, 0, 1, 1], [], []>} : vector<8x8xf32>, vector<8x32xf32>, vector<8x32xf32> -> vector<8x32xf32>
    %325 = vector.extract_strided_slice %304 {offsets = [0, 8], sizes = [8, 8], strides = [1, 1]} : vector<8x32xf32> to vector<8x8xf32>
    %326 = vector.extract_strided_slice %305 {offsets = [0, 8], sizes = [8, 8], strides = [1, 1]} : vector<8x32xf32> to vector<8x8xf32>
    %327 = vector.extract_strided_slice %306 {offsets = [0, 8], sizes = [8, 8], strides = [1, 1]} : vector<8x32xf32> to vector<8x8xf32>
    %cst_143 = arith.constant dense<0.000000e+00> : vector<8x8xf32>
    %328 = tpu.matmul %325, %326, %cst_143 {dimension_numbers = #tpu.dot_dimension_numbers<[1], [1], [0], [0], [0, 0, 1, 0], [], []>} : vector<8x8xf32>, vector<8x8xf32>, vector<8x8xf32> -> vector<8x8xf32>
    %cst_144 = arith.constant 0.353553385 : f32
    %329 = vector.broadcast %cst_144 : f32 to vector<8x8xf32>
    %330 = arith.mulf %328, %329 : vector<8x8xf32>
    %cst_145 = arith.constant dense<0xFF800000> : vector<8xf32>
    %331 = vector.multi_reduction <maximumf>, %330, %cst_145 [1] : vector<8x8xf32> to vector<8xf32>
    %332 = vector.shape_cast %331 : vector<8xf32> to vector<8x1xf32>
    %333 = vector.broadcast %332 : vector<8x1xf32> to vector<8x8xf32>
    %334 = arith.subf %330, %333 : vector<8x8xf32>
    %335 = math.exp %334 : vector<8x8xf32>
    %cst_146 = arith.constant dense<0.000000e+00> : vector<8xf32>
    %336 = vector.multi_reduction <add>, %335, %cst_146 [1] : vector<8x8xf32> to vector<8xf32>
    %337 = vector.shape_cast %336 : vector<8xf32> to vector<8x1xf32>
    %338 = vector.broadcast %337 : vector<8x1xf32> to vector<8x8xf32>
    %339 = arith.divf %335, %338 : vector<8x8xf32>
    %cst_147 = arith.constant dense<0.000000e+00> : vector<8x8xf32>
    %340 = tpu.matmul %339, %327, %cst_147 {dimension_numbers = #tpu.dot_dimension_numbers<[1], [0], [0], [1], [0, 0, 1, 1], [], []>} : vector<8x8xf32>, vector<8x8xf32>, vector<8x8xf32> -> vector<8x8xf32>
    %341 = vector.extract_strided_slice %16 {offsets = [8, 0], sizes = [8, 32], strides = [1, 1]} : vector<32x32xf32> to vector<8x32xf32>
    %cst_148 = arith.constant dense<0.000000e+00> : vector<8x32xf32>
    %342 = tpu.matmul %340, %341, %cst_148 {dimension_numbers = #tpu.dot_dimension_numbers<[1], [0], [0], [1], [0, 0, 1, 1], [], []>} : vector<8x8xf32>, vector<8x32xf32>, vector<8x32xf32> -> vector<8x32xf32>
    %343 = arith.addf %324, %342 : vector<8x32xf32>
    %344 = vector.extract_strided_slice %304 {offsets = [0, 16], sizes = [8, 8], strides = [1, 1]} : vector<8x32xf32> to vector<8x8xf32>
    %345 = vector.extract_strided_slice %305 {offsets = [0, 16], sizes = [8, 8], strides = [1, 1]} : vector<8x32xf32> to vector<8x8xf32>
    %346 = vector.extract_strided_slice %306 {offsets = [0, 16], sizes = [8, 8], strides = [1, 1]} : vector<8x32xf32> to vector<8x8xf32>
    %cst_149 = arith.constant dense<0.000000e+00> : vector<8x8xf32>
    %347 = tpu.matmul %344, %345, %cst_149 {dimension_numbers = #tpu.dot_dimension_numbers<[1], [1], [0], [0], [0, 0, 1, 0], [], []>} : vector<8x8xf32>, vector<8x8xf32>, vector<8x8xf32> -> vector<8x8xf32>
    %cst_150 = arith.constant 0.353553385 : f32
    %348 = vector.broadcast %cst_150 : f32 to vector<8x8xf32>
    %349 = arith.mulf %347, %348 : vector<8x8xf32>
    %cst_151 = arith.constant dense<0xFF800000> : vector<8xf32>
    %350 = vector.multi_reduction <maximumf>, %349, %cst_151 [1] : vector<8x8xf32> to vector<8xf32>
    %351 = vector.shape_cast %350 : vector<8xf32> to vector<8x1xf32>
    %352 = vector.broadcast %351 : vector<8x1xf32> to vector<8x8xf32>
    %353 = arith.subf %349, %352 : vector<8x8xf32>
    %354 = math.exp %353 : vector<8x8xf32>
    %cst_152 = arith.constant dense<0.000000e+00> : vector<8xf32>
    %355 = vector.multi_reduction <add>, %354, %cst_152 [1] : vector<8x8xf32> to vector<8xf32>
    %356 = vector.shape_cast %355 : vector<8xf32> to vector<8x1xf32>
    %357 = vector.broadcast %356 : vector<8x1xf32> to vector<8x8xf32>
    %358 = arith.divf %354, %357 : vector<8x8xf32>
    %cst_153 = arith.constant dense<0.000000e+00> : vector<8x8xf32>
    %359 = tpu.matmul %358, %346, %cst_153 {dimension_numbers = #tpu.dot_dimension_numbers<[1], [0], [0], [1], [0, 0, 1, 1], [], []>} : vector<8x8xf32>, vector<8x8xf32>, vector<8x8xf32> -> vector<8x8xf32>
    %360 = vector.extract_strided_slice %16 {offsets = [16, 0], sizes = [8, 32], strides = [1, 1]} : vector<32x32xf32> to vector<8x32xf32>
    %cst_154 = arith.constant dense<0.000000e+00> : vector<8x32xf32>
    %361 = tpu.matmul %359, %360, %cst_154 {dimension_numbers = #tpu.dot_dimension_numbers<[1], [0], [0], [1], [0, 0, 1, 1], [], []>} : vector<8x8xf32>, vector<8x32xf32>, vector<8x32xf32> -> vector<8x32xf32>
    %362 = arith.addf %343, %361 : vector<8x32xf32>
    %363 = vector.extract_strided_slice %304 {offsets = [0, 24], sizes = [8, 8], strides = [1, 1]} : vector<8x32xf32> to vector<8x8xf32>
    %364 = vector.extract_strided_slice %305 {offsets = [0, 24], sizes = [8, 8], strides = [1, 1]} : vector<8x32xf32> to vector<8x8xf32>
    %365 = vector.extract_strided_slice %306 {offsets = [0, 24], sizes = [8, 8], strides = [1, 1]} : vector<8x32xf32> to vector<8x8xf32>
    %cst_155 = arith.constant dense<0.000000e+00> : vector<8x8xf32>
    %366 = tpu.matmul %363, %364, %cst_155 {dimension_numbers = #tpu.dot_dimension_numbers<[1], [1], [0], [0], [0, 0, 1, 0], [], []>} : vector<8x8xf32>, vector<8x8xf32>, vector<8x8xf32> -> vector<8x8xf32>
    %cst_156 = arith.constant 0.353553385 : f32
    %367 = vector.broadcast %cst_156 : f32 to vector<8x8xf32>
    %368 = arith.mulf %366, %367 : vector<8x8xf32>
    %cst_157 = arith.constant dense<0xFF800000> : vector<8xf32>
    %369 = vector.multi_reduction <maximumf>, %368, %cst_157 [1] : vector<8x8xf32> to vector<8xf32>
    %370 = vector.shape_cast %369 : vector<8xf32> to vector<8x1xf32>
    %371 = vector.broadcast %370 : vector<8x1xf32> to vector<8x8xf32>
    %372 = arith.subf %368, %371 : vector<8x8xf32>
    %373 = math.exp %372 : vector<8x8xf32>
    %cst_158 = arith.constant dense<0.000000e+00> : vector<8xf32>
    %374 = vector.multi_reduction <add>, %373, %cst_158 [1] : vector<8x8xf32> to vector<8xf32>
    %375 = vector.shape_cast %374 : vector<8xf32> to vector<8x1xf32>
    %376 = vector.broadcast %375 : vector<8x1xf32> to vector<8x8xf32>
    %377 = arith.divf %373, %376 : vector<8x8xf32>
    %cst_159 = arith.constant dense<0.000000e+00> : vector<8x8xf32>
    %378 = tpu.matmul %377, %365, %cst_159 {dimension_numbers = #tpu.dot_dimension_numbers<[1], [0], [0], [1], [0, 0, 1, 1], [], []>} : vector<8x8xf32>, vector<8x8xf32>, vector<8x8xf32> -> vector<8x8xf32>
    %379 = vector.extract_strided_slice %16 {offsets = [24, 0], sizes = [8, 32], strides = [1, 1]} : vector<32x32xf32> to vector<8x32xf32>
    %cst_160 = arith.constant dense<0.000000e+00> : vector<8x32xf32>
    %380 = tpu.matmul %378, %379, %cst_160 {dimension_numbers = #tpu.dot_dimension_numbers<[1], [0], [0], [1], [0, 0, 1, 1], [], []>} : vector<8x8xf32>, vector<8x32xf32>, vector<8x32xf32> -> vector<8x32xf32>
    %381 = arith.addf %362, %380 : vector<8x32xf32>
    %382 = tpu.concatenate %303, %381 in 0 : vector<8x32xf32>, vector<8x32xf32> -> vector<16x32xf32>
    %383 = vector.broadcast %17 : vector<1x32xf32> to vector<16x32xf32>
    %384 = arith.addf %382, %383 : vector<16x32xf32>
    %385 = arith.addf %222, %384 : vector<16x32xf32>
    %cst_161 = arith.constant dense<0.000000e+00> : vector<16xf32>
    %386 = vector.multi_reduction <add>, %385, %cst_161 [1] : vector<16x32xf32> to vector<16xf32>
    %387 = vector.shape_cast %386 : vector<16xf32> to vector<16x1xf32>
    %cst_162 = arith.constant 3.200000e+01 : f32
    %388 = vector.broadcast %cst_162 : f32 to vector<16x1xf32>
    %389 = arith.divf %387, %388 : vector<16x1xf32>
    %390 = vector.broadcast %389 : vector<16x1xf32> to vector<16x32xf32>
    %391 = arith.subf %385, %390 : vector<16x32xf32>
    %392 = arith.mulf %391, %391 : vector<16x32xf32>
    %cst_163 = arith.constant dense<0.000000e+00> : vector<16xf32>
    %393 = vector.multi_reduction <add>, %392, %cst_163 [1] : vector<16x32xf32> to vector<16xf32>
    %394 = vector.shape_cast %393 : vector<16xf32> to vector<16x1xf32>
    %cst_164 = arith.constant 3.200000e+01 : f32
    %395 = vector.broadcast %cst_164 : f32 to vector<16x1xf32>
    %396 = arith.divf %394, %395 : vector<16x1xf32>
    %cst_165 = arith.constant 9.99999974E-6 : f32
    %397 = vector.broadcast %cst_165 : f32 to vector<16x1xf32>
    %398 = arith.addf %396, %397 : vector<16x1xf32>
    %399 = math.rsqrt %398 : vector<16x1xf32>
    %400 = vector.broadcast %399 : vector<16x1xf32> to vector<16x32xf32>
    %401 = arith.mulf %391, %400 : vector<16x32xf32>
    %402 = vector.broadcast %20 : vector<1x32xf32> to vector<16x32xf32>
    %403 = arith.mulf %401, %402 : vector<16x32xf32>
    %404 = vector.broadcast %21 : vector<1x32xf32> to vector<16x32xf32>
    %405 = arith.addf %403, %404 : vector<16x32xf32>
    %cst_166 = arith.constant dense<0.000000e+00> : vector<16x128xf32>
    %406 = tpu.matmul %405, %24, %cst_166 {dimension_numbers = #tpu.dot_dimension_numbers<[1], [0], [0], [1], [0, 0, 1, 1], [], []>} : vector<16x32xf32>, vector<32x128xf32>, vector<16x128xf32> -> vector<16x128xf32>
    %407 = vector.broadcast %25 : vector<1x128xf32> to vector<16x128xf32>
    %408 = arith.addf %406, %407 : vector<16x128xf32>
    %cst_167 = arith.constant 5.000000e-01 : f32
    %409 = vector.broadcast %cst_167 : f32 to vector<16x128xf32>
    %410 = arith.mulf %409, %408 : vector<16x128xf32>
    %cst_168 = arith.constant 0.707106769 : f32
    %411 = vector.broadcast %cst_168 : f32 to vector<16x128xf32>
    %412 = arith.mulf %408, %411 : vector<16x128xf32>
    %cst_169 = arith.constant 0.000000e+00 : f32
    %413 = vector.broadcast %cst_169 : f32 to vector<16x128xf32>
    %414 = arith.cmpf oge, %412, %413 : vector<16x128xf32>
    %cst_170 = arith.constant 1.000000e+00 : f32
    %cst_171 = arith.constant -1.000000e+00 : f32
    %415 = vector.broadcast %cst_170 : f32 to vector<16x128xf32>
    %416 = vector.broadcast %cst_171 : f32 to vector<16x128xf32>
    %417 = arith.select %414, %415, %416 : vector<16x128xi1>, vector<16x128xf32>
    %418 = math.absf %412 : vector<16x128xf32>
    %cst_172 = arith.constant 0.327591091 : f32
    %419 = vector.broadcast %cst_172 : f32 to vector<16x128xf32>
    %420 = arith.mulf %419, %418 : vector<16x128xf32>
    %cst_173 = arith.constant 1.000000e+00 : f32
    %421 = vector.broadcast %cst_173 : f32 to vector<16x128xf32>
    %422 = arith.addf %421, %420 : vector<16x128xf32>
    %cst_174 = arith.constant 1.000000e+00 : f32
    %423 = vector.broadcast %cst_174 : f32 to vector<16x128xf32>
    %424 = arith.divf %423, %422 : vector<16x128xf32>
    %cst_175 = arith.constant 1.06140542 : f32
    %425 = vector.broadcast %cst_175 : f32 to vector<16x128xf32>
    %426 = arith.mulf %425, %424 : vector<16x128xf32>
    %cst_176 = arith.constant -1.45315206 : f32
    %427 = vector.broadcast %cst_176 : f32 to vector<16x128xf32>
    %428 = arith.addf %426, %427 : vector<16x128xf32>
    %429 = arith.mulf %428, %424 : vector<16x128xf32>
    %cst_177 = arith.constant 1.42141378 : f32
    %430 = vector.broadcast %cst_177 : f32 to vector<16x128xf32>
    %431 = arith.addf %429, %430 : vector<16x128xf32>
    %432 = arith.mulf %431, %424 : vector<16x128xf32>
    %cst_178 = arith.constant -0.284496725 : f32
    %433 = vector.broadcast %cst_178 : f32 to vector<16x128xf32>
    %434 = arith.addf %432, %433 : vector<16x128xf32>
    %435 = arith.mulf %434, %424 : vector<16x128xf32>
    %cst_179 = arith.constant 0.254829586 : f32
    %436 = vector.broadcast %cst_179 : f32 to vector<16x128xf32>
    %437 = arith.addf %435, %436 : vector<16x128xf32>
    %438 = arith.mulf %437, %424 : vector<16x128xf32>
    %cst_180 = arith.constant 0.000000e+00 : f32
    %439 = vector.broadcast %cst_180 : f32 to vector<16x128xf32>
    %440 = arith.subf %439, %418 : vector<16x128xf32>
    %441 = arith.mulf %440, %418 : vector<16x128xf32>
    %442 = math.exp %441 : vector<16x128xf32>
    %443 = arith.mulf %438, %442 : vector<16x128xf32>
    %cst_181 = arith.constant 1.000000e+00 : f32
    %444 = vector.broadcast %cst_181 : f32 to vector<16x128xf32>
    %445 = arith.subf %444, %443 : vector<16x128xf32>
    %446 = arith.mulf %417, %445 : vector<16x128xf32>
    %cst_182 = arith.constant 1.000000e+00 : f32
    %447 = vector.broadcast %cst_182 : f32 to vector<16x128xf32>
    %448 = arith.addf %447, %446 : vector<16x128xf32>
    %449 = arith.mulf %410, %448 : vector<16x128xf32>
    %cst_183 = arith.constant dense<0.000000e+00> : vector<16x32xf32>
    %450 = tpu.matmul %449, %26, %cst_183 {dimension_numbers = #tpu.dot_dimension_numbers<[1], [0], [0], [1], [0, 0, 1, 1], [], []>} : vector<16x128xf32>, vector<128x32xf32>, vector<16x32xf32> -> vector<16x32xf32>
    %451 = vector.broadcast %27 : vector<1x32xf32> to vector<16x32xf32>
    %452 = arith.addf %450, %451 : vector<16x32xf32>
    %453 = arith.addf %405, %452 : vector<16x32xf32>
    %cst_184 = arith.constant dense<0.000000e+00> : vector<16xf32>
    %454 = vector.multi_reduction <add>, %453, %cst_184 [1] : vector<16x32xf32> to vector<16xf32>
    %455 = vector.shape_cast %454 : vector<16xf32> to vector<16x1xf32>
    %cst_185 = arith.constant 3.200000e+01 : f32
    %456 = vector.broadcast %cst_185 : f32 to vector<16x1xf32>
    %457 = arith.divf %455, %456 : vector<16x1xf32>
    %458 = vector.broadcast %457 : vector<16x1xf32> to vector<16x32xf32>
    %459 = arith.subf %453, %458 : vector<16x32xf32>
    %460 = arith.mulf %459, %459 : vector<16x32xf32>
    %cst_186 = arith.constant dense<0.000000e+00> : vector<16xf32>
    %461 = vector.multi_reduction <add>, %460, %cst_186 [1] : vector<16x32xf32> to vector<16xf32>
    %462 = vector.shape_cast %461 : vector<16xf32> to vector<16x1xf32>
    %cst_187 = arith.constant 3.200000e+01 : f32
    %463 = vector.broadcast %cst_187 : f32 to vector<16x1xf32>
    %464 = arith.divf %462, %463 : vector<16x1xf32>
    %cst_188 = arith.constant 9.99999974E-6 : f32
    %465 = vector.broadcast %cst_188 : f32 to vector<16x1xf32>
    %466 = arith.addf %464, %465 : vector<16x1xf32>
    %467 = math.rsqrt %466 : vector<16x1xf32>
    %468 = vector.broadcast %467 : vector<16x1xf32> to vector<16x32xf32>
    %469 = arith.mulf %459, %468 : vector<16x32xf32>
    %470 = vector.broadcast %22 : vector<1x32xf32> to vector<16x32xf32>
    %471 = arith.mulf %469, %470 : vector<16x32xf32>
    %472 = vector.broadcast %23 : vector<1x32xf32> to vector<16x32xf32>
    %473 = arith.addf %471, %472 : vector<16x32xf32>
    %c1_i32 = arith.constant 1 : i32
    %cst_189 = arith.constant dense<0.000000e+00> : vector<16x32xf32>
    %474 = tpu.matmul %473, %2, %cst_189 {dimension_numbers = #tpu.dot_dimension_numbers<[1], [0], [0], [1], [0, 0, 1, 1], [], []>} : vector<16x32xf32>, vector<32x32xf32>, vector<16x32xf32> -> vector<16x32xf32>
    %475 = vector.broadcast %3 : vector<1x32xf32> to vector<16x32xf32>
    %476 = arith.addf %474, %475 : vector<16x32xf32>
    %cst_190 = arith.constant dense<0.000000e+00> : vector<16x32xf32>
    %477 = tpu.matmul %473, %4, %cst_190 {dimension_numbers = #tpu.dot_dimension_numbers<[1], [0], [0], [1], [0, 0, 1, 1], [], []>} : vector<16x32xf32>, vector<32x32xf32>, vector<16x32xf32> -> vector<16x32xf32>
    %478 = vector.broadcast %5 : vector<1x32xf32> to vector<16x32xf32>
    %479 = arith.addf %477, %478 : vector<16x32xf32>
    %cst_191 = arith.constant dense<0.000000e+00> : vector<16x32xf32>
    %480 = tpu.matmul %473, %6, %cst_191 {dimension_numbers = #tpu.dot_dimension_numbers<[1], [0], [0], [1], [0, 0, 1, 1], [], []>} : vector<16x32xf32>, vector<32x32xf32>, vector<16x32xf32> -> vector<16x32xf32>
    %481 = vector.broadcast %7 : vector<1x32xf32> to vector<16x32xf32>
    %482 = arith.addf %480, %481 : vector<16x32xf32>
    %483 = vector.extract_strided_slice %476 {offsets = [0, 0], sizes = [8, 32], strides = [1, 1]} : vector<16x32xf32> to vector<8x32xf32>
    %484 = vector.extract_strided_slice %479 {offsets = [0, 0], sizes = [8, 32], strides = [1, 1]} : vector<16x32xf32> to vector<8x32xf32>
    %485 = vector.extract_strided_slice %482 {offsets = [0, 0], sizes = [8, 32], strides = [1, 1]} : vector<16x32xf32> to vector<8x32xf32>
    %486 = vector.extract_strided_slice %483 {offsets = [0, 0], sizes = [8, 8], strides = [1, 1]} : vector<8x32xf32> to vector<8x8xf32>
    %487 = vector.extract_strided_slice %484 {offsets = [0, 0], sizes = [8, 8], strides = [1, 1]} : vector<8x32xf32> to vector<8x8xf32>
    %488 = vector.extract_strided_slice %485 {offsets = [0, 0], sizes = [8, 8], strides = [1, 1]} : vector<8x32xf32> to vector<8x8xf32>
    %cst_192 = arith.constant dense<0.000000e+00> : vector<8x8xf32>
    %489 = tpu.matmul %486, %487, %cst_192 {dimension_numbers = #tpu.dot_dimension_numbers<[1], [1], [0], [0], [0, 0, 1, 0], [], []>} : vector<8x8xf32>, vector<8x8xf32>, vector<8x8xf32> -> vector<8x8xf32>
    %cst_193 = arith.constant 0.353553385 : f32
    %490 = vector.broadcast %cst_193 : f32 to vector<8x8xf32>
    %491 = arith.mulf %489, %490 : vector<8x8xf32>
    %cst_194 = arith.constant dense<0xFF800000> : vector<8xf32>
    %492 = vector.multi_reduction <maximumf>, %491, %cst_194 [1] : vector<8x8xf32> to vector<8xf32>
    %493 = vector.shape_cast %492 : vector<8xf32> to vector<8x1xf32>
    %494 = vector.broadcast %493 : vector<8x1xf32> to vector<8x8xf32>
    %495 = arith.subf %491, %494 : vector<8x8xf32>
    %496 = math.exp %495 : vector<8x8xf32>
    %cst_195 = arith.constant dense<0.000000e+00> : vector<8xf32>
    %497 = vector.multi_reduction <add>, %496, %cst_195 [1] : vector<8x8xf32> to vector<8xf32>
    %498 = vector.shape_cast %497 : vector<8xf32> to vector<8x1xf32>
    %499 = vector.broadcast %498 : vector<8x1xf32> to vector<8x8xf32>
    %500 = arith.divf %496, %499 : vector<8x8xf32>
    %cst_196 = arith.constant dense<0.000000e+00> : vector<8x8xf32>
    %501 = tpu.matmul %500, %488, %cst_196 {dimension_numbers = #tpu.dot_dimension_numbers<[1], [0], [0], [1], [0, 0, 1, 1], [], []>} : vector<8x8xf32>, vector<8x8xf32>, vector<8x8xf32> -> vector<8x8xf32>
    %502 = vector.extract_strided_slice %8 {offsets = [0, 0], sizes = [8, 32], strides = [1, 1]} : vector<32x32xf32> to vector<8x32xf32>
    %cst_197 = arith.constant dense<0.000000e+00> : vector<8x32xf32>
    %503 = tpu.matmul %501, %502, %cst_197 {dimension_numbers = #tpu.dot_dimension_numbers<[1], [0], [0], [1], [0, 0, 1, 1], [], []>} : vector<8x8xf32>, vector<8x32xf32>, vector<8x32xf32> -> vector<8x32xf32>
    %504 = vector.extract_strided_slice %483 {offsets = [0, 8], sizes = [8, 8], strides = [1, 1]} : vector<8x32xf32> to vector<8x8xf32>
    %505 = vector.extract_strided_slice %484 {offsets = [0, 8], sizes = [8, 8], strides = [1, 1]} : vector<8x32xf32> to vector<8x8xf32>
    %506 = vector.extract_strided_slice %485 {offsets = [0, 8], sizes = [8, 8], strides = [1, 1]} : vector<8x32xf32> to vector<8x8xf32>
    %cst_198 = arith.constant dense<0.000000e+00> : vector<8x8xf32>
    %507 = tpu.matmul %504, %505, %cst_198 {dimension_numbers = #tpu.dot_dimension_numbers<[1], [1], [0], [0], [0, 0, 1, 0], [], []>} : vector<8x8xf32>, vector<8x8xf32>, vector<8x8xf32> -> vector<8x8xf32>
    %cst_199 = arith.constant 0.353553385 : f32
    %508 = vector.broadcast %cst_199 : f32 to vector<8x8xf32>
    %509 = arith.mulf %507, %508 : vector<8x8xf32>
    %cst_200 = arith.constant dense<0xFF800000> : vector<8xf32>
    %510 = vector.multi_reduction <maximumf>, %509, %cst_200 [1] : vector<8x8xf32> to vector<8xf32>
    %511 = vector.shape_cast %510 : vector<8xf32> to vector<8x1xf32>
    %512 = vector.broadcast %511 : vector<8x1xf32> to vector<8x8xf32>
    %513 = arith.subf %509, %512 : vector<8x8xf32>
    %514 = math.exp %513 : vector<8x8xf32>
    %cst_201 = arith.constant dense<0.000000e+00> : vector<8xf32>
    %515 = vector.multi_reduction <add>, %514, %cst_201 [1] : vector<8x8xf32> to vector<8xf32>
    %516 = vector.shape_cast %515 : vector<8xf32> to vector<8x1xf32>
    %517 = vector.broadcast %516 : vector<8x1xf32> to vector<8x8xf32>
    %518 = arith.divf %514, %517 : vector<8x8xf32>
    %cst_202 = arith.constant dense<0.000000e+00> : vector<8x8xf32>
    %519 = tpu.matmul %518, %506, %cst_202 {dimension_numbers = #tpu.dot_dimension_numbers<[1], [0], [0], [1], [0, 0, 1, 1], [], []>} : vector<8x8xf32>, vector<8x8xf32>, vector<8x8xf32> -> vector<8x8xf32>
    %520 = vector.extract_strided_slice %8 {offsets = [8, 0], sizes = [8, 32], strides = [1, 1]} : vector<32x32xf32> to vector<8x32xf32>
    %cst_203 = arith.constant dense<0.000000e+00> : vector<8x32xf32>
    %521 = tpu.matmul %519, %520, %cst_203 {dimension_numbers = #tpu.dot_dimension_numbers<[1], [0], [0], [1], [0, 0, 1, 1], [], []>} : vector<8x8xf32>, vector<8x32xf32>, vector<8x32xf32> -> vector<8x32xf32>
    %522 = arith.addf %503, %521 : vector<8x32xf32>
    %523 = vector.extract_strided_slice %483 {offsets = [0, 16], sizes = [8, 8], strides = [1, 1]} : vector<8x32xf32> to vector<8x8xf32>
    %524 = vector.extract_strided_slice %484 {offsets = [0, 16], sizes = [8, 8], strides = [1, 1]} : vector<8x32xf32> to vector<8x8xf32>
    %525 = vector.extract_strided_slice %485 {offsets = [0, 16], sizes = [8, 8], strides = [1, 1]} : vector<8x32xf32> to vector<8x8xf32>
    %cst_204 = arith.constant dense<0.000000e+00> : vector<8x8xf32>
    %526 = tpu.matmul %523, %524, %cst_204 {dimension_numbers = #tpu.dot_dimension_numbers<[1], [1], [0], [0], [0, 0, 1, 0], [], []>} : vector<8x8xf32>, vector<8x8xf32>, vector<8x8xf32> -> vector<8x8xf32>
    %cst_205 = arith.constant 0.353553385 : f32
    %527 = vector.broadcast %cst_205 : f32 to vector<8x8xf32>
    %528 = arith.mulf %526, %527 : vector<8x8xf32>
    %cst_206 = arith.constant dense<0xFF800000> : vector<8xf32>
    %529 = vector.multi_reduction <maximumf>, %528, %cst_206 [1] : vector<8x8xf32> to vector<8xf32>
    %530 = vector.shape_cast %529 : vector<8xf32> to vector<8x1xf32>
    %531 = vector.broadcast %530 : vector<8x1xf32> to vector<8x8xf32>
    %532 = arith.subf %528, %531 : vector<8x8xf32>
    %533 = math.exp %532 : vector<8x8xf32>
    %cst_207 = arith.constant dense<0.000000e+00> : vector<8xf32>
    %534 = vector.multi_reduction <add>, %533, %cst_207 [1] : vector<8x8xf32> to vector<8xf32>
    %535 = vector.shape_cast %534 : vector<8xf32> to vector<8x1xf32>
    %536 = vector.broadcast %535 : vector<8x1xf32> to vector<8x8xf32>
    %537 = arith.divf %533, %536 : vector<8x8xf32>
    %cst_208 = arith.constant dense<0.000000e+00> : vector<8x8xf32>
    %538 = tpu.matmul %537, %525, %cst_208 {dimension_numbers = #tpu.dot_dimension_numbers<[1], [0], [0], [1], [0, 0, 1, 1], [], []>} : vector<8x8xf32>, vector<8x8xf32>, vector<8x8xf32> -> vector<8x8xf32>
    %539 = vector.extract_strided_slice %8 {offsets = [16, 0], sizes = [8, 32], strides = [1, 1]} : vector<32x32xf32> to vector<8x32xf32>
    %cst_209 = arith.constant dense<0.000000e+00> : vector<8x32xf32>
    %540 = tpu.matmul %538, %539, %cst_209 {dimension_numbers = #tpu.dot_dimension_numbers<[1], [0], [0], [1], [0, 0, 1, 1], [], []>} : vector<8x8xf32>, vector<8x32xf32>, vector<8x32xf32> -> vector<8x32xf32>
    %541 = arith.addf %522, %540 : vector<8x32xf32>
    %542 = vector.extract_strided_slice %483 {offsets = [0, 24], sizes = [8, 8], strides = [1, 1]} : vector<8x32xf32> to vector<8x8xf32>
    %543 = vector.extract_strided_slice %484 {offsets = [0, 24], sizes = [8, 8], strides = [1, 1]} : vector<8x32xf32> to vector<8x8xf32>
    %544 = vector.extract_strided_slice %485 {offsets = [0, 24], sizes = [8, 8], strides = [1, 1]} : vector<8x32xf32> to vector<8x8xf32>
    %cst_210 = arith.constant dense<0.000000e+00> : vector<8x8xf32>
    %545 = tpu.matmul %542, %543, %cst_210 {dimension_numbers = #tpu.dot_dimension_numbers<[1], [1], [0], [0], [0, 0, 1, 0], [], []>} : vector<8x8xf32>, vector<8x8xf32>, vector<8x8xf32> -> vector<8x8xf32>
    %cst_211 = arith.constant 0.353553385 : f32
    %546 = vector.broadcast %cst_211 : f32 to vector<8x8xf32>
    %547 = arith.mulf %545, %546 : vector<8x8xf32>
    %cst_212 = arith.constant dense<0xFF800000> : vector<8xf32>
    %548 = vector.multi_reduction <maximumf>, %547, %cst_212 [1] : vector<8x8xf32> to vector<8xf32>
    %549 = vector.shape_cast %548 : vector<8xf32> to vector<8x1xf32>
    %550 = vector.broadcast %549 : vector<8x1xf32> to vector<8x8xf32>
    %551 = arith.subf %547, %550 : vector<8x8xf32>
    %552 = math.exp %551 : vector<8x8xf32>
    %cst_213 = arith.constant dense<0.000000e+00> : vector<8xf32>
    %553 = vector.multi_reduction <add>, %552, %cst_213 [1] : vector<8x8xf32> to vector<8xf32>
    %554 = vector.shape_cast %553 : vector<8xf32> to vector<8x1xf32>
    %555 = vector.broadcast %554 : vector<8x1xf32> to vector<8x8xf32>
    %556 = arith.divf %552, %555 : vector<8x8xf32>
    %cst_214 = arith.constant dense<0.000000e+00> : vector<8x8xf32>
    %557 = tpu.matmul %556, %544, %cst_214 {dimension_numbers = #tpu.dot_dimension_numbers<[1], [0], [0], [1], [0, 0, 1, 1], [], []>} : vector<8x8xf32>, vector<8x8xf32>, vector<8x8xf32> -> vector<8x8xf32>
    %558 = vector.extract_strided_slice %8 {offsets = [24, 0], sizes = [8, 32], strides = [1, 1]} : vector<32x32xf32> to vector<8x32xf32>
    %cst_215 = arith.constant dense<0.000000e+00> : vector<8x32xf32>
    %559 = tpu.matmul %557, %558, %cst_215 {dimension_numbers = #tpu.dot_dimension_numbers<[1], [0], [0], [1], [0, 0, 1, 1], [], []>} : vector<8x8xf32>, vector<8x32xf32>, vector<8x32xf32> -> vector<8x32xf32>
    %560 = arith.addf %541, %559 : vector<8x32xf32>
    %561 = vector.extract_strided_slice %476 {offsets = [8, 0], sizes = [8, 32], strides = [1, 1]} : vector<16x32xf32> to vector<8x32xf32>
    %562 = vector.extract_strided_slice %479 {offsets = [8, 0], sizes = [8, 32], strides = [1, 1]} : vector<16x32xf32> to vector<8x32xf32>
    %563 = vector.extract_strided_slice %482 {offsets = [8, 0], sizes = [8, 32], strides = [1, 1]} : vector<16x32xf32> to vector<8x32xf32>
    %564 = vector.extract_strided_slice %561 {offsets = [0, 0], sizes = [8, 8], strides = [1, 1]} : vector<8x32xf32> to vector<8x8xf32>
    %565 = vector.extract_strided_slice %562 {offsets = [0, 0], sizes = [8, 8], strides = [1, 1]} : vector<8x32xf32> to vector<8x8xf32>
    %566 = vector.extract_strided_slice %563 {offsets = [0, 0], sizes = [8, 8], strides = [1, 1]} : vector<8x32xf32> to vector<8x8xf32>
    %cst_216 = arith.constant dense<0.000000e+00> : vector<8x8xf32>
    %567 = tpu.matmul %564, %565, %cst_216 {dimension_numbers = #tpu.dot_dimension_numbers<[1], [1], [0], [0], [0, 0, 1, 0], [], []>} : vector<8x8xf32>, vector<8x8xf32>, vector<8x8xf32> -> vector<8x8xf32>
    %cst_217 = arith.constant 0.353553385 : f32
    %568 = vector.broadcast %cst_217 : f32 to vector<8x8xf32>
    %569 = arith.mulf %567, %568 : vector<8x8xf32>
    %cst_218 = arith.constant dense<0xFF800000> : vector<8xf32>
    %570 = vector.multi_reduction <maximumf>, %569, %cst_218 [1] : vector<8x8xf32> to vector<8xf32>
    %571 = vector.shape_cast %570 : vector<8xf32> to vector<8x1xf32>
    %572 = vector.broadcast %571 : vector<8x1xf32> to vector<8x8xf32>
    %573 = arith.subf %569, %572 : vector<8x8xf32>
    %574 = math.exp %573 : vector<8x8xf32>
    %cst_219 = arith.constant dense<0.000000e+00> : vector<8xf32>
    %575 = vector.multi_reduction <add>, %574, %cst_219 [1] : vector<8x8xf32> to vector<8xf32>
    %576 = vector.shape_cast %575 : vector<8xf32> to vector<8x1xf32>
    %577 = vector.broadcast %576 : vector<8x1xf32> to vector<8x8xf32>
    %578 = arith.divf %574, %577 : vector<8x8xf32>
    %cst_220 = arith.constant dense<0.000000e+00> : vector<8x8xf32>
    %579 = tpu.matmul %578, %566, %cst_220 {dimension_numbers = #tpu.dot_dimension_numbers<[1], [0], [0], [1], [0, 0, 1, 1], [], []>} : vector<8x8xf32>, vector<8x8xf32>, vector<8x8xf32> -> vector<8x8xf32>
    %580 = vector.extract_strided_slice %8 {offsets = [0, 0], sizes = [8, 32], strides = [1, 1]} : vector<32x32xf32> to vector<8x32xf32>
    %cst_221 = arith.constant dense<0.000000e+00> : vector<8x32xf32>
    %581 = tpu.matmul %579, %580, %cst_221 {dimension_numbers = #tpu.dot_dimension_numbers<[1], [0], [0], [1], [0, 0, 1, 1], [], []>} : vector<8x8xf32>, vector<8x32xf32>, vector<8x32xf32> -> vector<8x32xf32>
    %582 = vector.extract_strided_slice %561 {offsets = [0, 8], sizes = [8, 8], strides = [1, 1]} : vector<8x32xf32> to vector<8x8xf32>
    %583 = vector.extract_strided_slice %562 {offsets = [0, 8], sizes = [8, 8], strides = [1, 1]} : vector<8x32xf32> to vector<8x8xf32>
    %584 = vector.extract_strided_slice %563 {offsets = [0, 8], sizes = [8, 8], strides = [1, 1]} : vector<8x32xf32> to vector<8x8xf32>
    %cst_222 = arith.constant dense<0.000000e+00> : vector<8x8xf32>
    %585 = tpu.matmul %582, %583, %cst_222 {dimension_numbers = #tpu.dot_dimension_numbers<[1], [1], [0], [0], [0, 0, 1, 0], [], []>} : vector<8x8xf32>, vector<8x8xf32>, vector<8x8xf32> -> vector<8x8xf32>
    %cst_223 = arith.constant 0.353553385 : f32
    %586 = vector.broadcast %cst_223 : f32 to vector<8x8xf32>
    %587 = arith.mulf %585, %586 : vector<8x8xf32>
    %cst_224 = arith.constant dense<0xFF800000> : vector<8xf32>
    %588 = vector.multi_reduction <maximumf>, %587, %cst_224 [1] : vector<8x8xf32> to vector<8xf32>
    %589 = vector.shape_cast %588 : vector<8xf32> to vector<8x1xf32>
    %590 = vector.broadcast %589 : vector<8x1xf32> to vector<8x8xf32>
    %591 = arith.subf %587, %590 : vector<8x8xf32>
    %592 = math.exp %591 : vector<8x8xf32>
    %cst_225 = arith.constant dense<0.000000e+00> : vector<8xf32>
    %593 = vector.multi_reduction <add>, %592, %cst_225 [1] : vector<8x8xf32> to vector<8xf32>
    %594 = vector.shape_cast %593 : vector<8xf32> to vector<8x1xf32>
    %595 = vector.broadcast %594 : vector<8x1xf32> to vector<8x8xf32>
    %596 = arith.divf %592, %595 : vector<8x8xf32>
    %cst_226 = arith.constant dense<0.000000e+00> : vector<8x8xf32>
    %597 = tpu.matmul %596, %584, %cst_226 {dimension_numbers = #tpu.dot_dimension_numbers<[1], [0], [0], [1], [0, 0, 1, 1], [], []>} : vector<8x8xf32>, vector<8x8xf32>, vector<8x8xf32> -> vector<8x8xf32>
    %598 = vector.extract_strided_slice %8 {offsets = [8, 0], sizes = [8, 32], strides = [1, 1]} : vector<32x32xf32> to vector<8x32xf32>
    %cst_227 = arith.constant dense<0.000000e+00> : vector<8x32xf32>
    %599 = tpu.matmul %597, %598, %cst_227 {dimension_numbers = #tpu.dot_dimension_numbers<[1], [0], [0], [1], [0, 0, 1, 1], [], []>} : vector<8x8xf32>, vector<8x32xf32>, vector<8x32xf32> -> vector<8x32xf32>
    %600 = arith.addf %581, %599 : vector<8x32xf32>
    %601 = vector.extract_strided_slice %561 {offsets = [0, 16], sizes = [8, 8], strides = [1, 1]} : vector<8x32xf32> to vector<8x8xf32>
    %602 = vector.extract_strided_slice %562 {offsets = [0, 16], sizes = [8, 8], strides = [1, 1]} : vector<8x32xf32> to vector<8x8xf32>
    %603 = vector.extract_strided_slice %563 {offsets = [0, 16], sizes = [8, 8], strides = [1, 1]} : vector<8x32xf32> to vector<8x8xf32>
    %cst_228 = arith.constant dense<0.000000e+00> : vector<8x8xf32>
    %604 = tpu.matmul %601, %602, %cst_228 {dimension_numbers = #tpu.dot_dimension_numbers<[1], [1], [0], [0], [0, 0, 1, 0], [], []>} : vector<8x8xf32>, vector<8x8xf32>, vector<8x8xf32> -> vector<8x8xf32>
    %cst_229 = arith.constant 0.353553385 : f32
    %605 = vector.broadcast %cst_229 : f32 to vector<8x8xf32>
    %606 = arith.mulf %604, %605 : vector<8x8xf32>
    %cst_230 = arith.constant dense<0xFF800000> : vector<8xf32>
    %607 = vector.multi_reduction <maximumf>, %606, %cst_230 [1] : vector<8x8xf32> to vector<8xf32>
    %608 = vector.shape_cast %607 : vector<8xf32> to vector<8x1xf32>
    %609 = vector.broadcast %608 : vector<8x1xf32> to vector<8x8xf32>
    %610 = arith.subf %606, %609 : vector<8x8xf32>
    %611 = math.exp %610 : vector<8x8xf32>
    %cst_231 = arith.constant dense<0.000000e+00> : vector<8xf32>
    %612 = vector.multi_reduction <add>, %611, %cst_231 [1] : vector<8x8xf32> to vector<8xf32>
    %613 = vector.shape_cast %612 : vector<8xf32> to vector<8x1xf32>
    %614 = vector.broadcast %613 : vector<8x1xf32> to vector<8x8xf32>
    %615 = arith.divf %611, %614 : vector<8x8xf32>
    %cst_232 = arith.constant dense<0.000000e+00> : vector<8x8xf32>
    %616 = tpu.matmul %615, %603, %cst_232 {dimension_numbers = #tpu.dot_dimension_numbers<[1], [0], [0], [1], [0, 0, 1, 1], [], []>} : vector<8x8xf32>, vector<8x8xf32>, vector<8x8xf32> -> vector<8x8xf32>
    %617 = vector.extract_strided_slice %8 {offsets = [16, 0], sizes = [8, 32], strides = [1, 1]} : vector<32x32xf32> to vector<8x32xf32>
    %cst_233 = arith.constant dense<0.000000e+00> : vector<8x32xf32>
    %618 = tpu.matmul %616, %617, %cst_233 {dimension_numbers = #tpu.dot_dimension_numbers<[1], [0], [0], [1], [0, 0, 1, 1], [], []>} : vector<8x8xf32>, vector<8x32xf32>, vector<8x32xf32> -> vector<8x32xf32>
    %619 = arith.addf %600, %618 : vector<8x32xf32>
    %620 = vector.extract_strided_slice %561 {offsets = [0, 24], sizes = [8, 8], strides = [1, 1]} : vector<8x32xf32> to vector<8x8xf32>
    %621 = vector.extract_strided_slice %562 {offsets = [0, 24], sizes = [8, 8], strides = [1, 1]} : vector<8x32xf32> to vector<8x8xf32>
    %622 = vector.extract_strided_slice %563 {offsets = [0, 24], sizes = [8, 8], strides = [1, 1]} : vector<8x32xf32> to vector<8x8xf32>
    %cst_234 = arith.constant dense<0.000000e+00> : vector<8x8xf32>
    %623 = tpu.matmul %620, %621, %cst_234 {dimension_numbers = #tpu.dot_dimension_numbers<[1], [1], [0], [0], [0, 0, 1, 0], [], []>} : vector<8x8xf32>, vector<8x8xf32>, vector<8x8xf32> -> vector<8x8xf32>
    %cst_235 = arith.constant 0.353553385 : f32
    %624 = vector.broadcast %cst_235 : f32 to vector<8x8xf32>
    %625 = arith.mulf %623, %624 : vector<8x8xf32>
    %cst_236 = arith.constant dense<0xFF800000> : vector<8xf32>
    %626 = vector.multi_reduction <maximumf>, %625, %cst_236 [1] : vector<8x8xf32> to vector<8xf32>
    %627 = vector.shape_cast %626 : vector<8xf32> to vector<8x1xf32>
    %628 = vector.broadcast %627 : vector<8x1xf32> to vector<8x8xf32>
    %629 = arith.subf %625, %628 : vector<8x8xf32>
    %630 = math.exp %629 : vector<8x8xf32>
    %cst_237 = arith.constant dense<0.000000e+00> : vector<8xf32>
    %631 = vector.multi_reduction <add>, %630, %cst_237 [1] : vector<8x8xf32> to vector<8xf32>
    %632 = vector.shape_cast %631 : vector<8xf32> to vector<8x1xf32>
    %633 = vector.broadcast %632 : vector<8x1xf32> to vector<8x8xf32>
    %634 = arith.divf %630, %633 : vector<8x8xf32>
    %cst_238 = arith.constant dense<0.000000e+00> : vector<8x8xf32>
    %635 = tpu.matmul %634, %622, %cst_238 {dimension_numbers = #tpu.dot_dimension_numbers<[1], [0], [0], [1], [0, 0, 1, 1], [], []>} : vector<8x8xf32>, vector<8x8xf32>, vector<8x8xf32> -> vector<8x8xf32>
    %636 = vector.extract_strided_slice %8 {offsets = [24, 0], sizes = [8, 32], strides = [1, 1]} : vector<32x32xf32> to vector<8x32xf32>
    %cst_239 = arith.constant dense<0.000000e+00> : vector<8x32xf32>
    %637 = tpu.matmul %635, %636, %cst_239 {dimension_numbers = #tpu.dot_dimension_numbers<[1], [0], [0], [1], [0, 0, 1, 1], [], []>} : vector<8x8xf32>, vector<8x32xf32>, vector<8x32xf32> -> vector<8x32xf32>
    %638 = arith.addf %619, %637 : vector<8x32xf32>
    %639 = tpu.concatenate %560, %638 in 0 : vector<8x32xf32>, vector<8x32xf32> -> vector<16x32xf32>
    %640 = vector.broadcast %9 : vector<1x32xf32> to vector<16x32xf32>
    %641 = arith.addf %639, %640 : vector<16x32xf32>
    %642 = arith.addf %473, %641 : vector<16x32xf32>
    %cst_240 = arith.constant dense<0.000000e+00> : vector<16xf32>
    %643 = vector.multi_reduction <add>, %642, %cst_240 [1] : vector<16x32xf32> to vector<16xf32>
    %644 = vector.shape_cast %643 : vector<16xf32> to vector<16x1xf32>
    %cst_241 = arith.constant 3.200000e+01 : f32
    %645 = vector.broadcast %cst_241 : f32 to vector<16x1xf32>
    %646 = arith.divf %644, %645 : vector<16x1xf32>
    %647 = vector.broadcast %646 : vector<16x1xf32> to vector<16x32xf32>
    %648 = arith.subf %642, %647 : vector<16x32xf32>
    %649 = arith.mulf %648, %648 : vector<16x32xf32>
    %cst_242 = arith.constant dense<0.000000e+00> : vector<16xf32>
    %650 = vector.multi_reduction <add>, %649, %cst_242 [1] : vector<16x32xf32> to vector<16xf32>
    %651 = vector.shape_cast %650 : vector<16xf32> to vector<16x1xf32>
    %cst_243 = arith.constant 3.200000e+01 : f32
    %652 = vector.broadcast %cst_243 : f32 to vector<16x1xf32>
    %653 = arith.divf %651, %652 : vector<16x1xf32>
    %cst_244 = arith.constant 9.99999974E-6 : f32
    %654 = vector.broadcast %cst_244 : f32 to vector<16x1xf32>
    %655 = arith.addf %653, %654 : vector<16x1xf32>
    %656 = math.rsqrt %655 : vector<16x1xf32>
    %657 = vector.broadcast %656 : vector<16x1xf32> to vector<16x32xf32>
    %658 = arith.mulf %648, %657 : vector<16x32xf32>
    %659 = vector.broadcast %18 : vector<1x32xf32> to vector<16x32xf32>
    %660 = arith.mulf %658, %659 : vector<16x32xf32>
    %661 = vector.broadcast %19 : vector<1x32xf32> to vector<16x32xf32>
    %662 = arith.addf %660, %661 : vector<16x32xf32>
    %cst_245 = arith.constant dense<0.000000e+00> : vector<16x32xf32>
    %663 = tpu.matmul %662, %10, %cst_245 {dimension_numbers = #tpu.dot_dimension_numbers<[1], [0], [0], [1], [0, 0, 1, 1], [], []>} : vector<16x32xf32>, vector<32x32xf32>, vector<16x32xf32> -> vector<16x32xf32>
    %664 = vector.broadcast %11 : vector<1x32xf32> to vector<16x32xf32>
    %665 = arith.addf %663, %664 : vector<16x32xf32>
    %666 = vector.extract_strided_slice %665 {offsets = [0, 0], sizes = [8, 32], strides = [1, 1]} : vector<16x32xf32> to vector<8x32xf32>
    %667 = vector.extract_strided_slice %30 {offsets = [0, 0], sizes = [8, 32], strides = [1, 1]} : vector<16x32xf32> to vector<8x32xf32>
    %668 = vector.extract_strided_slice %33 {offsets = [0, 0], sizes = [8, 32], strides = [1, 1]} : vector<16x32xf32> to vector<8x32xf32>
    %669 = vector.extract_strided_slice %666 {offsets = [0, 0], sizes = [8, 8], strides = [1, 1]} : vector<8x32xf32> to vector<8x8xf32>
    %670 = vector.extract_strided_slice %667 {offsets = [0, 0], sizes = [8, 8], strides = [1, 1]} : vector<8x32xf32> to vector<8x8xf32>
    %671 = vector.extract_strided_slice %668 {offsets = [0, 0], sizes = [8, 8], strides = [1, 1]} : vector<8x32xf32> to vector<8x8xf32>
    %cst_246 = arith.constant dense<0.000000e+00> : vector<8x8xf32>
    %672 = tpu.matmul %669, %670, %cst_246 {dimension_numbers = #tpu.dot_dimension_numbers<[1], [1], [0], [0], [0, 0, 1, 0], [], []>} : vector<8x8xf32>, vector<8x8xf32>, vector<8x8xf32> -> vector<8x8xf32>
    %cst_247 = arith.constant 0.353553385 : f32
    %673 = vector.broadcast %cst_247 : f32 to vector<8x8xf32>
    %674 = arith.mulf %672, %673 : vector<8x8xf32>
    %cst_248 = arith.constant dense<0xFF800000> : vector<8xf32>
    %675 = vector.multi_reduction <maximumf>, %674, %cst_248 [1] : vector<8x8xf32> to vector<8xf32>
    %676 = vector.shape_cast %675 : vector<8xf32> to vector<8x1xf32>
    %677 = vector.broadcast %676 : vector<8x1xf32> to vector<8x8xf32>
    %678 = arith.subf %674, %677 : vector<8x8xf32>
    %679 = math.exp %678 : vector<8x8xf32>
    %cst_249 = arith.constant dense<0.000000e+00> : vector<8xf32>
    %680 = vector.multi_reduction <add>, %679, %cst_249 [1] : vector<8x8xf32> to vector<8xf32>
    %681 = vector.shape_cast %680 : vector<8xf32> to vector<8x1xf32>
    %682 = vector.broadcast %681 : vector<8x1xf32> to vector<8x8xf32>
    %683 = arith.divf %679, %682 : vector<8x8xf32>
    %cst_250 = arith.constant dense<0.000000e+00> : vector<8x8xf32>
    %684 = tpu.matmul %683, %671, %cst_250 {dimension_numbers = #tpu.dot_dimension_numbers<[1], [0], [0], [1], [0, 0, 1, 1], [], []>} : vector<8x8xf32>, vector<8x8xf32>, vector<8x8xf32> -> vector<8x8xf32>
    %685 = vector.extract_strided_slice %16 {offsets = [0, 0], sizes = [8, 32], strides = [1, 1]} : vector<32x32xf32> to vector<8x32xf32>
    %cst_251 = arith.constant dense<0.000000e+00> : vector<8x32xf32>
    %686 = tpu.matmul %684, %685, %cst_251 {dimension_numbers = #tpu.dot_dimension_numbers<[1], [0], [0], [1], [0, 0, 1, 1], [], []>} : vector<8x8xf32>, vector<8x32xf32>, vector<8x32xf32> -> vector<8x32xf32>
    %687 = vector.extract_strided_slice %666 {offsets = [0, 8], sizes = [8, 8], strides = [1, 1]} : vector<8x32xf32> to vector<8x8xf32>
    %688 = vector.extract_strided_slice %667 {offsets = [0, 8], sizes = [8, 8], strides = [1, 1]} : vector<8x32xf32> to vector<8x8xf32>
    %689 = vector.extract_strided_slice %668 {offsets = [0, 8], sizes = [8, 8], strides = [1, 1]} : vector<8x32xf32> to vector<8x8xf32>
    %cst_252 = arith.constant dense<0.000000e+00> : vector<8x8xf32>
    %690 = tpu.matmul %687, %688, %cst_252 {dimension_numbers = #tpu.dot_dimension_numbers<[1], [1], [0], [0], [0, 0, 1, 0], [], []>} : vector<8x8xf32>, vector<8x8xf32>, vector<8x8xf32> -> vector<8x8xf32>
    %cst_253 = arith.constant 0.353553385 : f32
    %691 = vector.broadcast %cst_253 : f32 to vector<8x8xf32>
    %692 = arith.mulf %690, %691 : vector<8x8xf32>
    %cst_254 = arith.constant dense<0xFF800000> : vector<8xf32>
    %693 = vector.multi_reduction <maximumf>, %692, %cst_254 [1] : vector<8x8xf32> to vector<8xf32>
    %694 = vector.shape_cast %693 : vector<8xf32> to vector<8x1xf32>
    %695 = vector.broadcast %694 : vector<8x1xf32> to vector<8x8xf32>
    %696 = arith.subf %692, %695 : vector<8x8xf32>
    %697 = math.exp %696 : vector<8x8xf32>
    %cst_255 = arith.constant dense<0.000000e+00> : vector<8xf32>
    %698 = vector.multi_reduction <add>, %697, %cst_255 [1] : vector<8x8xf32> to vector<8xf32>
    %699 = vector.shape_cast %698 : vector<8xf32> to vector<8x1xf32>
    %700 = vector.broadcast %699 : vector<8x1xf32> to vector<8x8xf32>
    %701 = arith.divf %697, %700 : vector<8x8xf32>
    %cst_256 = arith.constant dense<0.000000e+00> : vector<8x8xf32>
    %702 = tpu.matmul %701, %689, %cst_256 {dimension_numbers = #tpu.dot_dimension_numbers<[1], [0], [0], [1], [0, 0, 1, 1], [], []>} : vector<8x8xf32>, vector<8x8xf32>, vector<8x8xf32> -> vector<8x8xf32>
    %703 = vector.extract_strided_slice %16 {offsets = [8, 0], sizes = [8, 32], strides = [1, 1]} : vector<32x32xf32> to vector<8x32xf32>
    %cst_257 = arith.constant dense<0.000000e+00> : vector<8x32xf32>
    %704 = tpu.matmul %702, %703, %cst_257 {dimension_numbers = #tpu.dot_dimension_numbers<[1], [0], [0], [1], [0, 0, 1, 1], [], []>} : vector<8x8xf32>, vector<8x32xf32>, vector<8x32xf32> -> vector<8x32xf32>
    %705 = arith.addf %686, %704 : vector<8x32xf32>
    %706 = vector.extract_strided_slice %666 {offsets = [0, 16], sizes = [8, 8], strides = [1, 1]} : vector<8x32xf32> to vector<8x8xf32>
    %707 = vector.extract_strided_slice %667 {offsets = [0, 16], sizes = [8, 8], strides = [1, 1]} : vector<8x32xf32> to vector<8x8xf32>
    %708 = vector.extract_strided_slice %668 {offsets = [0, 16], sizes = [8, 8], strides = [1, 1]} : vector<8x32xf32> to vector<8x8xf32>
    %cst_258 = arith.constant dense<0.000000e+00> : vector<8x8xf32>
    %709 = tpu.matmul %706, %707, %cst_258 {dimension_numbers = #tpu.dot_dimension_numbers<[1], [1], [0], [0], [0, 0, 1, 0], [], []>} : vector<8x8xf32>, vector<8x8xf32>, vector<8x8xf32> -> vector<8x8xf32>
    %cst_259 = arith.constant 0.353553385 : f32
    %710 = vector.broadcast %cst_259 : f32 to vector<8x8xf32>
    %711 = arith.mulf %709, %710 : vector<8x8xf32>
    %cst_260 = arith.constant dense<0xFF800000> : vector<8xf32>
    %712 = vector.multi_reduction <maximumf>, %711, %cst_260 [1] : vector<8x8xf32> to vector<8xf32>
    %713 = vector.shape_cast %712 : vector<8xf32> to vector<8x1xf32>
    %714 = vector.broadcast %713 : vector<8x1xf32> to vector<8x8xf32>
    %715 = arith.subf %711, %714 : vector<8x8xf32>
    %716 = math.exp %715 : vector<8x8xf32>
    %cst_261 = arith.constant dense<0.000000e+00> : vector<8xf32>
    %717 = vector.multi_reduction <add>, %716, %cst_261 [1] : vector<8x8xf32> to vector<8xf32>
    %718 = vector.shape_cast %717 : vector<8xf32> to vector<8x1xf32>
    %719 = vector.broadcast %718 : vector<8x1xf32> to vector<8x8xf32>
    %720 = arith.divf %716, %719 : vector<8x8xf32>
    %cst_262 = arith.constant dense<0.000000e+00> : vector<8x8xf32>
    %721 = tpu.matmul %720, %708, %cst_262 {dimension_numbers = #tpu.dot_dimension_numbers<[1], [0], [0], [1], [0, 0, 1, 1], [], []>} : vector<8x8xf32>, vector<8x8xf32>, vector<8x8xf32> -> vector<8x8xf32>
    %722 = vector.extract_strided_slice %16 {offsets = [16, 0], sizes = [8, 32], strides = [1, 1]} : vector<32x32xf32> to vector<8x32xf32>
    %cst_263 = arith.constant dense<0.000000e+00> : vector<8x32xf32>
    %723 = tpu.matmul %721, %722, %cst_263 {dimension_numbers = #tpu.dot_dimension_numbers<[1], [0], [0], [1], [0, 0, 1, 1], [], []>} : vector<8x8xf32>, vector<8x32xf32>, vector<8x32xf32> -> vector<8x32xf32>
    %724 = arith.addf %705, %723 : vector<8x32xf32>
    %725 = vector.extract_strided_slice %666 {offsets = [0, 24], sizes = [8, 8], strides = [1, 1]} : vector<8x32xf32> to vector<8x8xf32>
    %726 = vector.extract_strided_slice %667 {offsets = [0, 24], sizes = [8, 8], strides = [1, 1]} : vector<8x32xf32> to vector<8x8xf32>
    %727 = vector.extract_strided_slice %668 {offsets = [0, 24], sizes = [8, 8], strides = [1, 1]} : vector<8x32xf32> to vector<8x8xf32>
    %cst_264 = arith.constant dense<0.000000e+00> : vector<8x8xf32>
    %728 = tpu.matmul %725, %726, %cst_264 {dimension_numbers = #tpu.dot_dimension_numbers<[1], [1], [0], [0], [0, 0, 1, 0], [], []>} : vector<8x8xf32>, vector<8x8xf32>, vector<8x8xf32> -> vector<8x8xf32>
    %cst_265 = arith.constant 0.353553385 : f32
    %729 = vector.broadcast %cst_265 : f32 to vector<8x8xf32>
    %730 = arith.mulf %728, %729 : vector<8x8xf32>
    %cst_266 = arith.constant dense<0xFF800000> : vector<8xf32>
    %731 = vector.multi_reduction <maximumf>, %730, %cst_266 [1] : vector<8x8xf32> to vector<8xf32>
    %732 = vector.shape_cast %731 : vector<8xf32> to vector<8x1xf32>
    %733 = vector.broadcast %732 : vector<8x1xf32> to vector<8x8xf32>
    %734 = arith.subf %730, %733 : vector<8x8xf32>
    %735 = math.exp %734 : vector<8x8xf32>
    %cst_267 = arith.constant dense<0.000000e+00> : vector<8xf32>
    %736 = vector.multi_reduction <add>, %735, %cst_267 [1] : vector<8x8xf32> to vector<8xf32>
    %737 = vector.shape_cast %736 : vector<8xf32> to vector<8x1xf32>
    %738 = vector.broadcast %737 : vector<8x1xf32> to vector<8x8xf32>
    %739 = arith.divf %735, %738 : vector<8x8xf32>
    %cst_268 = arith.constant dense<0.000000e+00> : vector<8x8xf32>
    %740 = tpu.matmul %739, %727, %cst_268 {dimension_numbers = #tpu.dot_dimension_numbers<[1], [0], [0], [1], [0, 0, 1, 1], [], []>} : vector<8x8xf32>, vector<8x8xf32>, vector<8x8xf32> -> vector<8x8xf32>
    %741 = vector.extract_strided_slice %16 {offsets = [24, 0], sizes = [8, 32], strides = [1, 1]} : vector<32x32xf32> to vector<8x32xf32>
    %cst_269 = arith.constant dense<0.000000e+00> : vector<8x32xf32>
    %742 = tpu.matmul %740, %741, %cst_269 {dimension_numbers = #tpu.dot_dimension_numbers<[1], [0], [0], [1], [0, 0, 1, 1], [], []>} : vector<8x8xf32>, vector<8x32xf32>, vector<8x32xf32> -> vector<8x32xf32>
    %743 = arith.addf %724, %742 : vector<8x32xf32>
    %744 = vector.extract_strided_slice %665 {offsets = [8, 0], sizes = [8, 32], strides = [1, 1]} : vector<16x32xf32> to vector<8x32xf32>
    %745 = vector.extract_strided_slice %30 {offsets = [8, 0], sizes = [8, 32], strides = [1, 1]} : vector<16x32xf32> to vector<8x32xf32>
    %746 = vector.extract_strided_slice %33 {offsets = [8, 0], sizes = [8, 32], strides = [1, 1]} : vector<16x32xf32> to vector<8x32xf32>
    %747 = vector.extract_strided_slice %744 {offsets = [0, 0], sizes = [8, 8], strides = [1, 1]} : vector<8x32xf32> to vector<8x8xf32>
    %748 = vector.extract_strided_slice %745 {offsets = [0, 0], sizes = [8, 8], strides = [1, 1]} : vector<8x32xf32> to vector<8x8xf32>
    %749 = vector.extract_strided_slice %746 {offsets = [0, 0], sizes = [8, 8], strides = [1, 1]} : vector<8x32xf32> to vector<8x8xf32>
    %cst_270 = arith.constant dense<0.000000e+00> : vector<8x8xf32>
    %750 = tpu.matmul %747, %748, %cst_270 {dimension_numbers = #tpu.dot_dimension_numbers<[1], [1], [0], [0], [0, 0, 1, 0], [], []>} : vector<8x8xf32>, vector<8x8xf32>, vector<8x8xf32> -> vector<8x8xf32>
    %cst_271 = arith.constant 0.353553385 : f32
    %751 = vector.broadcast %cst_271 : f32 to vector<8x8xf32>
    %752 = arith.mulf %750, %751 : vector<8x8xf32>
    %cst_272 = arith.constant dense<0xFF800000> : vector<8xf32>
    %753 = vector.multi_reduction <maximumf>, %752, %cst_272 [1] : vector<8x8xf32> to vector<8xf32>
    %754 = vector.shape_cast %753 : vector<8xf32> to vector<8x1xf32>
    %755 = vector.broadcast %754 : vector<8x1xf32> to vector<8x8xf32>
    %756 = arith.subf %752, %755 : vector<8x8xf32>
    %757 = math.exp %756 : vector<8x8xf32>
    %cst_273 = arith.constant dense<0.000000e+00> : vector<8xf32>
    %758 = vector.multi_reduction <add>, %757, %cst_273 [1] : vector<8x8xf32> to vector<8xf32>
    %759 = vector.shape_cast %758 : vector<8xf32> to vector<8x1xf32>
    %760 = vector.broadcast %759 : vector<8x1xf32> to vector<8x8xf32>
    %761 = arith.divf %757, %760 : vector<8x8xf32>
    %cst_274 = arith.constant dense<0.000000e+00> : vector<8x8xf32>
    %762 = tpu.matmul %761, %749, %cst_274 {dimension_numbers = #tpu.dot_dimension_numbers<[1], [0], [0], [1], [0, 0, 1, 1], [], []>} : vector<8x8xf32>, vector<8x8xf32>, vector<8x8xf32> -> vector<8x8xf32>
    %763 = vector.extract_strided_slice %16 {offsets = [0, 0], sizes = [8, 32], strides = [1, 1]} : vector<32x32xf32> to vector<8x32xf32>
    %cst_275 = arith.constant dense<0.000000e+00> : vector<8x32xf32>
    %764 = tpu.matmul %762, %763, %cst_275 {dimension_numbers = #tpu.dot_dimension_numbers<[1], [0], [0], [1], [0, 0, 1, 1], [], []>} : vector<8x8xf32>, vector<8x32xf32>, vector<8x32xf32> -> vector<8x32xf32>
    %765 = vector.extract_strided_slice %744 {offsets = [0, 8], sizes = [8, 8], strides = [1, 1]} : vector<8x32xf32> to vector<8x8xf32>
    %766 = vector.extract_strided_slice %745 {offsets = [0, 8], sizes = [8, 8], strides = [1, 1]} : vector<8x32xf32> to vector<8x8xf32>
    %767 = vector.extract_strided_slice %746 {offsets = [0, 8], sizes = [8, 8], strides = [1, 1]} : vector<8x32xf32> to vector<8x8xf32>
    %cst_276 = arith.constant dense<0.000000e+00> : vector<8x8xf32>
    %768 = tpu.matmul %765, %766, %cst_276 {dimension_numbers = #tpu.dot_dimension_numbers<[1], [1], [0], [0], [0, 0, 1, 0], [], []>} : vector<8x8xf32>, vector<8x8xf32>, vector<8x8xf32> -> vector<8x8xf32>
    %cst_277 = arith.constant 0.353553385 : f32
    %769 = vector.broadcast %cst_277 : f32 to vector<8x8xf32>
    %770 = arith.mulf %768, %769 : vector<8x8xf32>
    %cst_278 = arith.constant dense<0xFF800000> : vector<8xf32>
    %771 = vector.multi_reduction <maximumf>, %770, %cst_278 [1] : vector<8x8xf32> to vector<8xf32>
    %772 = vector.shape_cast %771 : vector<8xf32> to vector<8x1xf32>
    %773 = vector.broadcast %772 : vector<8x1xf32> to vector<8x8xf32>
    %774 = arith.subf %770, %773 : vector<8x8xf32>
    %775 = math.exp %774 : vector<8x8xf32>
    %cst_279 = arith.constant dense<0.000000e+00> : vector<8xf32>
    %776 = vector.multi_reduction <add>, %775, %cst_279 [1] : vector<8x8xf32> to vector<8xf32>
    %777 = vector.shape_cast %776 : vector<8xf32> to vector<8x1xf32>
    %778 = vector.broadcast %777 : vector<8x1xf32> to vector<8x8xf32>
    %779 = arith.divf %775, %778 : vector<8x8xf32>
    %cst_280 = arith.constant dense<0.000000e+00> : vector<8x8xf32>
    %780 = tpu.matmul %779, %767, %cst_280 {dimension_numbers = #tpu.dot_dimension_numbers<[1], [0], [0], [1], [0, 0, 1, 1], [], []>} : vector<8x8xf32>, vector<8x8xf32>, vector<8x8xf32> -> vector<8x8xf32>
    %781 = vector.extract_strided_slice %16 {offsets = [8, 0], sizes = [8, 32], strides = [1, 1]} : vector<32x32xf32> to vector<8x32xf32>
    %cst_281 = arith.constant dense<0.000000e+00> : vector<8x32xf32>
    %782 = tpu.matmul %780, %781, %cst_281 {dimension_numbers = #tpu.dot_dimension_numbers<[1], [0], [0], [1], [0, 0, 1, 1], [], []>} : vector<8x8xf32>, vector<8x32xf32>, vector<8x32xf32> -> vector<8x32xf32>
    %783 = arith.addf %764, %782 : vector<8x32xf32>
    %784 = vector.extract_strided_slice %744 {offsets = [0, 16], sizes = [8, 8], strides = [1, 1]} : vector<8x32xf32> to vector<8x8xf32>
    %785 = vector.extract_strided_slice %745 {offsets = [0, 16], sizes = [8, 8], strides = [1, 1]} : vector<8x32xf32> to vector<8x8xf32>
    %786 = vector.extract_strided_slice %746 {offsets = [0, 16], sizes = [8, 8], strides = [1, 1]} : vector<8x32xf32> to vector<8x8xf32>
    %cst_282 = arith.constant dense<0.000000e+00> : vector<8x8xf32>
    %787 = tpu.matmul %784, %785, %cst_282 {dimension_numbers = #tpu.dot_dimension_numbers<[1], [1], [0], [0], [0, 0, 1, 0], [], []>} : vector<8x8xf32>, vector<8x8xf32>, vector<8x8xf32> -> vector<8x8xf32>
    %cst_283 = arith.constant 0.353553385 : f32
    %788 = vector.broadcast %cst_283 : f32 to vector<8x8xf32>
    %789 = arith.mulf %787, %788 : vector<8x8xf32>
    %cst_284 = arith.constant dense<0xFF800000> : vector<8xf32>
    %790 = vector.multi_reduction <maximumf>, %789, %cst_284 [1] : vector<8x8xf32> to vector<8xf32>
    %791 = vector.shape_cast %790 : vector<8xf32> to vector<8x1xf32>
    %792 = vector.broadcast %791 : vector<8x1xf32> to vector<8x8xf32>
    %793 = arith.subf %789, %792 : vector<8x8xf32>
    %794 = math.exp %793 : vector<8x8xf32>
    %cst_285 = arith.constant dense<0.000000e+00> : vector<8xf32>
    %795 = vector.multi_reduction <add>, %794, %cst_285 [1] : vector<8x8xf32> to vector<8xf32>
    %796 = vector.shape_cast %795 : vector<8xf32> to vector<8x1xf32>
    %797 = vector.broadcast %796 : vector<8x1xf32> to vector<8x8xf32>
    %798 = arith.divf %794, %797 : vector<8x8xf32>
    %cst_286 = arith.constant dense<0.000000e+00> : vector<8x8xf32>
    %799 = tpu.matmul %798, %786, %cst_286 {dimension_numbers = #tpu.dot_dimension_numbers<[1], [0], [0], [1], [0, 0, 1, 1], [], []>} : vector<8x8xf32>, vector<8x8xf32>, vector<8x8xf32> -> vector<8x8xf32>
    %800 = vector.extract_strided_slice %16 {offsets = [16, 0], sizes = [8, 32], strides = [1, 1]} : vector<32x32xf32> to vector<8x32xf32>
    %cst_287 = arith.constant dense<0.000000e+00> : vector<8x32xf32>
    %801 = tpu.matmul %799, %800, %cst_287 {dimension_numbers = #tpu.dot_dimension_numbers<[1], [0], [0], [1], [0, 0, 1, 1], [], []>} : vector<8x8xf32>, vector<8x32xf32>, vector<8x32xf32> -> vector<8x32xf32>
    %802 = arith.addf %783, %801 : vector<8x32xf32>
    %803 = vector.extract_strided_slice %744 {offsets = [0, 24], sizes = [8, 8], strides = [1, 1]} : vector<8x32xf32> to vector<8x8xf32>
    %804 = vector.extract_strided_slice %745 {offsets = [0, 24], sizes = [8, 8], strides = [1, 1]} : vector<8x32xf32> to vector<8x8xf32>
    %805 = vector.extract_strided_slice %746 {offsets = [0, 24], sizes = [8, 8], strides = [1, 1]} : vector<8x32xf32> to vector<8x8xf32>
    %cst_288 = arith.constant dense<0.000000e+00> : vector<8x8xf32>
    %806 = tpu.matmul %803, %804, %cst_288 {dimension_numbers = #tpu.dot_dimension_numbers<[1], [1], [0], [0], [0, 0, 1, 0], [], []>} : vector<8x8xf32>, vector<8x8xf32>, vector<8x8xf32> -> vector<8x8xf32>
    %cst_289 = arith.constant 0.353553385 : f32
    %807 = vector.broadcast %cst_289 : f32 to vector<8x8xf32>
    %808 = arith.mulf %806, %807 : vector<8x8xf32>
    %cst_290 = arith.constant dense<0xFF800000> : vector<8xf32>
    %809 = vector.multi_reduction <maximumf>, %808, %cst_290 [1] : vector<8x8xf32> to vector<8xf32>
    %810 = vector.shape_cast %809 : vector<8xf32> to vector<8x1xf32>
    %811 = vector.broadcast %810 : vector<8x1xf32> to vector<8x8xf32>
    %812 = arith.subf %808, %811 : vector<8x8xf32>
    %813 = math.exp %812 : vector<8x8xf32>
    %cst_291 = arith.constant dense<0.000000e+00> : vector<8xf32>
    %814 = vector.multi_reduction <add>, %813, %cst_291 [1] : vector<8x8xf32> to vector<8xf32>
    %815 = vector.shape_cast %814 : vector<8xf32> to vector<8x1xf32>
    %816 = vector.broadcast %815 : vector<8x1xf32> to vector<8x8xf32>
    %817 = arith.divf %813, %816 : vector<8x8xf32>
    %cst_292 = arith.constant dense<0.000000e+00> : vector<8x8xf32>
    %818 = tpu.matmul %817, %805, %cst_292 {dimension_numbers = #tpu.dot_dimension_numbers<[1], [0], [0], [1], [0, 0, 1, 1], [], []>} : vector<8x8xf32>, vector<8x8xf32>, vector<8x8xf32> -> vector<8x8xf32>
    %819 = vector.extract_strided_slice %16 {offsets = [24, 0], sizes = [8, 32], strides = [1, 1]} : vector<32x32xf32> to vector<8x32xf32>
    %cst_293 = arith.constant dense<0.000000e+00> : vector<8x32xf32>
    %820 = tpu.matmul %818, %819, %cst_293 {dimension_numbers = #tpu.dot_dimension_numbers<[1], [0], [0], [1], [0, 0, 1, 1], [], []>} : vector<8x8xf32>, vector<8x32xf32>, vector<8x32xf32> -> vector<8x32xf32>
    %821 = arith.addf %802, %820 : vector<8x32xf32>
    %822 = tpu.concatenate %743, %821 in 0 : vector<8x32xf32>, vector<8x32xf32> -> vector<16x32xf32>
    %823 = vector.broadcast %17 : vector<1x32xf32> to vector<16x32xf32>
    %824 = arith.addf %822, %823 : vector<16x32xf32>
    %825 = arith.addf %662, %824 : vector<16x32xf32>
    %cst_294 = arith.constant dense<0.000000e+00> : vector<16xf32>
    %826 = vector.multi_reduction <add>, %825, %cst_294 [1] : vector<16x32xf32> to vector<16xf32>
    %827 = vector.shape_cast %826 : vector<16xf32> to vector<16x1xf32>
    %cst_295 = arith.constant 3.200000e+01 : f32
    %828 = vector.broadcast %cst_295 : f32 to vector<16x1xf32>
    %829 = arith.divf %827, %828 : vector<16x1xf32>
    %830 = vector.broadcast %829 : vector<16x1xf32> to vector<16x32xf32>
    %831 = arith.subf %825, %830 : vector<16x32xf32>
    %832 = arith.mulf %831, %831 : vector<16x32xf32>
    %cst_296 = arith.constant dense<0.000000e+00> : vector<16xf32>
    %833 = vector.multi_reduction <add>, %832, %cst_296 [1] : vector<16x32xf32> to vector<16xf32>
    %834 = vector.shape_cast %833 : vector<16xf32> to vector<16x1xf32>
    %cst_297 = arith.constant 3.200000e+01 : f32
    %835 = vector.broadcast %cst_297 : f32 to vector<16x1xf32>
    %836 = arith.divf %834, %835 : vector<16x1xf32>
    %cst_298 = arith.constant 9.99999974E-6 : f32
    %837 = vector.broadcast %cst_298 : f32 to vector<16x1xf32>
    %838 = arith.addf %836, %837 : vector<16x1xf32>
    %839 = math.rsqrt %838 : vector<16x1xf32>
    %840 = vector.broadcast %839 : vector<16x1xf32> to vector<16x32xf32>
    %841 = arith.mulf %831, %840 : vector<16x32xf32>
    %842 = vector.broadcast %20 : vector<1x32xf32> to vector<16x32xf32>
    %843 = arith.mulf %841, %842 : vector<16x32xf32>
    %844 = vector.broadcast %21 : vector<1x32xf32> to vector<16x32xf32>
    %845 = arith.addf %843, %844 : vector<16x32xf32>
    %cst_299 = arith.constant dense<0.000000e+00> : vector<16x128xf32>
    %846 = tpu.matmul %845, %24, %cst_299 {dimension_numbers = #tpu.dot_dimension_numbers<[1], [0], [0], [1], [0, 0, 1, 1], [], []>} : vector<16x32xf32>, vector<32x128xf32>, vector<16x128xf32> -> vector<16x128xf32>
    %847 = vector.broadcast %25 : vector<1x128xf32> to vector<16x128xf32>
    %848 = arith.addf %846, %847 : vector<16x128xf32>
    %cst_300 = arith.constant 5.000000e-01 : f32
    %849 = vector.broadcast %cst_300 : f32 to vector<16x128xf32>
    %850 = arith.mulf %849, %848 : vector<16x128xf32>
    %cst_301 = arith.constant 0.707106769 : f32
    %851 = vector.broadcast %cst_301 : f32 to vector<16x128xf32>
    %852 = arith.mulf %848, %851 : vector<16x128xf32>
    %cst_302 = arith.constant 0.000000e+00 : f32
    %853 = vector.broadcast %cst_302 : f32 to vector<16x128xf32>
    %854 = arith.cmpf oge, %852, %853 : vector<16x128xf32>
    %cst_303 = arith.constant 1.000000e+00 : f32
    %cst_304 = arith.constant -1.000000e+00 : f32
    %855 = vector.broadcast %cst_303 : f32 to vector<16x128xf32>
    %856 = vector.broadcast %cst_304 : f32 to vector<16x128xf32>
    %857 = arith.select %854, %855, %856 : vector<16x128xi1>, vector<16x128xf32>
    %858 = math.absf %852 : vector<16x128xf32>
    %cst_305 = arith.constant 0.327591091 : f32
    %859 = vector.broadcast %cst_305 : f32 to vector<16x128xf32>
    %860 = arith.mulf %859, %858 : vector<16x128xf32>
    %cst_306 = arith.constant 1.000000e+00 : f32
    %861 = vector.broadcast %cst_306 : f32 to vector<16x128xf32>
    %862 = arith.addf %861, %860 : vector<16x128xf32>
    %cst_307 = arith.constant 1.000000e+00 : f32
    %863 = vector.broadcast %cst_307 : f32 to vector<16x128xf32>
    %864 = arith.divf %863, %862 : vector<16x128xf32>
    %cst_308 = arith.constant 1.06140542 : f32
    %865 = vector.broadcast %cst_308 : f32 to vector<16x128xf32>
    %866 = arith.mulf %865, %864 : vector<16x128xf32>
    %cst_309 = arith.constant -1.45315206 : f32
    %867 = vector.broadcast %cst_309 : f32 to vector<16x128xf32>
    %868 = arith.addf %866, %867 : vector<16x128xf32>
    %869 = arith.mulf %868, %864 : vector<16x128xf32>
    %cst_310 = arith.constant 1.42141378 : f32
    %870 = vector.broadcast %cst_310 : f32 to vector<16x128xf32>
    %871 = arith.addf %869, %870 : vector<16x128xf32>
    %872 = arith.mulf %871, %864 : vector<16x128xf32>
    %cst_311 = arith.constant -0.284496725 : f32
    %873 = vector.broadcast %cst_311 : f32 to vector<16x128xf32>
    %874 = arith.addf %872, %873 : vector<16x128xf32>
    %875 = arith.mulf %874, %864 : vector<16x128xf32>
    %cst_312 = arith.constant 0.254829586 : f32
    %876 = vector.broadcast %cst_312 : f32 to vector<16x128xf32>
    %877 = arith.addf %875, %876 : vector<16x128xf32>
    %878 = arith.mulf %877, %864 : vector<16x128xf32>
    %cst_313 = arith.constant 0.000000e+00 : f32
    %879 = vector.broadcast %cst_313 : f32 to vector<16x128xf32>
    %880 = arith.subf %879, %858 : vector<16x128xf32>
    %881 = arith.mulf %880, %858 : vector<16x128xf32>
    %882 = math.exp %881 : vector<16x128xf32>
    %883 = arith.mulf %878, %882 : vector<16x128xf32>
    %cst_314 = arith.constant 1.000000e+00 : f32
    %884 = vector.broadcast %cst_314 : f32 to vector<16x128xf32>
    %885 = arith.subf %884, %883 : vector<16x128xf32>
    %886 = arith.mulf %857, %885 : vector<16x128xf32>
    %cst_315 = arith.constant 1.000000e+00 : f32
    %887 = vector.broadcast %cst_315 : f32 to vector<16x128xf32>
    %888 = arith.addf %887, %886 : vector<16x128xf32>
    %889 = arith.mulf %850, %888 : vector<16x128xf32>
    %cst_316 = arith.constant dense<0.000000e+00> : vector<16x32xf32>
    %890 = tpu.matmul %889, %26, %cst_316 {dimension_numbers = #tpu.dot_dimension_numbers<[1], [0], [0], [1], [0, 0, 1, 1], [], []>} : vector<16x128xf32>, vector<128x32xf32>, vector<16x32xf32> -> vector<16x32xf32>
    %891 = vector.broadcast %27 : vector<1x32xf32> to vector<16x32xf32>
    %892 = arith.addf %890, %891 : vector<16x32xf32>
    %893 = arith.addf %845, %892 : vector<16x32xf32>
    %cst_317 = arith.constant dense<0.000000e+00> : vector<16xf32>
    %894 = vector.multi_reduction <add>, %893, %cst_317 [1] : vector<16x32xf32> to vector<16xf32>
    %895 = vector.shape_cast %894 : vector<16xf32> to vector<16x1xf32>
    %cst_318 = arith.constant 3.200000e+01 : f32
    %896 = vector.broadcast %cst_318 : f32 to vector<16x1xf32>
    %897 = arith.divf %895, %896 : vector<16x1xf32>
    %898 = vector.broadcast %897 : vector<16x1xf32> to vector<16x32xf32>
    %899 = arith.subf %893, %898 : vector<16x32xf32>
    %900 = arith.mulf %899, %899 : vector<16x32xf32>
    %cst_319 = arith.constant dense<0.000000e+00> : vector<16xf32>
    %901 = vector.multi_reduction <add>, %900, %cst_319 [1] : vector<16x32xf32> to vector<16xf32>
    %902 = vector.shape_cast %901 : vector<16xf32> to vector<16x1xf32>
    %cst_320 = arith.constant 3.200000e+01 : f32
    %903 = vector.broadcast %cst_320 : f32 to vector<16x1xf32>
    %904 = arith.divf %902, %903 : vector<16x1xf32>
    %cst_321 = arith.constant 9.99999974E-6 : f32
    %905 = vector.broadcast %cst_321 : f32 to vector<16x1xf32>
    %906 = arith.addf %904, %905 : vector<16x1xf32>
    %907 = math.rsqrt %906 : vector<16x1xf32>
    %908 = vector.broadcast %907 : vector<16x1xf32> to vector<16x32xf32>
    %909 = arith.mulf %899, %908 : vector<16x32xf32>
    %910 = vector.broadcast %22 : vector<1x32xf32> to vector<16x32xf32>
    %911 = arith.mulf %909, %910 : vector<16x32xf32>
    %912 = vector.broadcast %23 : vector<1x32xf32> to vector<16x32xf32>
    %913 = arith.addf %911, %912 : vector<16x32xf32>
    %c0_322 = arith.constant 0 : index
    %c0_323 = arith.constant 0 : index
    %914 = vector.load %arg30[%c0_322, %c0_323] : memref<16x32xf32, #tpu.memory_space<vmem>>, vector<16x32xf32>
    tpu.vector_store %arg30[%c0_322, %c0_323], %913 {strides = array<i32>} : memref<16x32xf32, #tpu.memory_space<vmem>>, vector<16x32xf32>,
    %915 = vector.extract_strided_slice %913 {offsets = [0, 0], sizes = [8, 32], strides = [1, 1]} : vector<16x32xf32> to vector<8x32xf32>
    %cst_324 = arith.constant dense<0.000000e+00> : vector<32xf32>
    %916 = vector.multi_reduction <add>, %915, %cst_324 [0] : vector<8x32xf32> to vector<32xf32>
    %917 = vector.shape_cast %916 : vector<32xf32> to vector<1x32xf32>
    %cst_325 = arith.constant 8.000000e+00 : f32
    %918 = vector.broadcast %cst_325 : f32 to vector<1x32xf32>
    %919 = arith.divf %917, %918 : vector<1x32xf32>
    %920 = vector.extract_strided_slice %913 {offsets = [8, 0], sizes = [8, 32], strides = [1, 1]} : vector<16x32xf32> to vector<8x32xf32>
    %cst_326 = arith.constant dense<0.000000e+00> : vector<32xf32>
    %921 = vector.multi_reduction <add>, %920, %cst_326 [0] : vector<8x32xf32> to vector<32xf32>
    %922 = vector.shape_cast %921 : vector<32xf32> to vector<1x32xf32>
    %cst_327 = arith.constant 8.000000e+00 : f32
    %923 = vector.broadcast %cst_327 : f32 to vector<1x32xf32>
    %924 = arith.divf %922, %923 : vector<1x32xf32>
    %925 = tpu.concatenate %919, %924 in 0 : vector<1x32xf32>, vector<1x32xf32> -> vector<2x32xf32>
    %c0_328 = arith.constant 0 : index
    %c0_329 = arith.constant 0 : index
    %926 = vector.load %arg28[%c0_328, %c0_329] : memref<32x1xf32, #tpu.memory_space<vmem>>, vector<32x1xf32>
    %cst_330 = arith.constant dense<0.000000e+00> : vector<2x1xf32>
    %927 = tpu.matmul %925, %926, %cst_330 {dimension_numbers = #tpu.dot_dimension_numbers<[1], [0], [0], [1], [0, 0, 1, 1], [], []>} : vector<2x32xf32>, vector<32x1xf32>, vector<2x1xf32> -> vector<2x1xf32>
    %c0_331 = arith.constant 0 : index
    %c0_332 = arith.constant 0 : index
    %928 = vector.load %arg29[%c0_331, %c0_332] : memref<1x1xf32, #tpu.memory_space<vmem>>, vector<1x1xf32>
    %929 = vector.broadcast %928 : vector<1x1xf32> to vector<2x1xf32>
    %930 = arith.addf %927, %929 : vector<2x1xf32>
    %c0_333 = arith.constant 0 : index
    %c0_334 = arith.constant 0 : index
    %931 = vector.load %arg31[%c0_333, %c0_334] : memref<2x1xf32, #tpu.memory_space<vmem>>, vector<2x1xf32>
    tpu.vector_store %arg31[%c0_333, %c0_334], %930 {strides = array<i32>} : memref<2x1xf32, #tpu.memory_space<vmem>>, vector<2x1xf32>,
    return
  }
}

</mosaic_0001>

<bundles_post_ra>
// kernel: rl_enhanced_decoder_forward.1
= control target key start
LH: loop header
LB: loop body
LE: loop exit
PB: predicated region body
PF: predicated region fallthrough
CT: control target
= control target key end

     0   :  { %s4830_s3 = smov 12   ;;  %s4831_s7 = smov 1   ;;  %vm206_vm0 = vcmask 261120   ;;  %vm346_vm1 = vcmask 64512   ;;  %s5947_s0 = inlined_call_operand.smem [shape: u32[32], index: -1, kind: input, shape index: {}] }
   0x1   :  { %s4369_s6 = sld [smem:[%s5947_s0 + %s4830_s3]]   ;;  %s4832_s11 = smov 4  }
   0x2   :  { %s4878_s10 = sld [smem:[%s5947_s0 + %s4831_s7]]   ;;  %s4833_s15 = smov 2  }
   0x3   :  { %s4883_s14 = sld [smem:[%s5947_s0 + %s4832_s11]]   ;;  %s4834_s22 = smov 14  }
   0x4   :  { %s4888_s18 = sld [smem:[%s5947_s0 + %s4833_s15]]   ;;  %s4835_s26 = smov 13  }
   0x5   :  { %s4893_s21 = sld [smem:[%s5947_s0]]   ;;  %s4836_s30 = smov 5  }
   0x6   :  { %s4898_s25 = sld [smem:[%s5947_s0 + %s4834_s22]]   ;;  %s4837_s4 = smov 3  }
   0x7   :  { %v163_v0 = vld [vmem:[%s4369_s6 + $0x18] sm:$0xff]  ;;  %v162_v1 = vld [vmem:[%s4369_s6 + $0x10] sm:$0xff]  ;;  %s4903_s29 = sld [smem:[%s5947_s0 + %s4835_s26]]   ;;  %v161_v2 = vld [vmem:[%s4369_s6 + $0x8] sm:$0xff]  ;;  %s4838_s8 = smov 15  }
   0x8   :  { %225 = vmatpush.msra.mxu2 %v163_v0  ;;  %v160_v5 = vld [vmem:[%s4369_s6] sm:$0xff]  ;;  %s4927_s3 = sld [smem:[%s5947_s0 + %s4836_s30]]   ;;  %v134_v18 = vld [vmem:[%s4878_s10 + $0x8] sm:$0xff]  ;;  %s4839_s12 = smov 6  }
   0x9   :  { %v143_v3 = vld [vmem:[%s4883_s14 + $0x18] sm:$0xff]  ;;  %v142_v4 = vld [vmem:[%s4883_s14 + $0x10] sm:$0xff]  ;;  %v141_v6 = vld [vmem:[%s4883_s14 + $0x8] sm:$0xff]  ;;  %s4936_s7 = sld [smem:[%s5947_s0 + %s4837_s4]]   ;;  %s4840_s17 = smov 112  }
   0xa   :  { %226 = vmatpush.msra.mxu2 %v162_v1  ;;  %309 = vmatpush.msra.mxu3 %v143_v3  ;;  %v133_v7 = vld [vmem:[%s4878_s10] sm:$0xff]  ;;  %v138_v11 = vld [vmem:[%s4888_s18 + $0x18] sm:$0xff]  ;;  %v137_v14 = vld [vmem:[%s4888_s18 + $0x10] sm:$0xff]  ;;  %s4943_s11 = sld [smem:[%s5947_s0 + %s4838_s8]]   ;;  %s4841_s19 = smov 120  }
   0xb   :  { %v140_v10 = vld [vmem:[%s4883_s14] sm:$0xff]  ;;  %v136_v16 = vld [vmem:[%s4888_s18 + $0x8] sm:$0xff]  ;;  %s4948_s16 = sld [smem:[%s5947_s0 + %s4839_s12]]   ;;  %s4842_s20 = smov 7  }
   0xc   :  { %227 = vmatpush.msra.mxu2 %v161_v2  ;;  %310 = vmatpush.msra.mxu3 %v142_v4  ;;  %v168_v8 = vld [vmem:[%s4898_s25 + $0x18] sm:$0xff]  ;;  %v167_v9 = vld [vmem:[%s4898_s25 + $0x10] sm:$0xff]  ;;  %v4914_v12 = vld [vmem:[%s4893_s21] sm:$0xff]  ;;  %s4982_s23 = sld [smem:[%s5947_s0 + %s4842_s20]]   ;;  %s4843_s24 = smov 104  }
   0xd   :  { %251 = vmatpush.msra.mxu1 %v168_v8  ;;  %v166_v13 = vld [vmem:[%s4898_s25 + $0x8] sm:$0xff]  ;;  %v165_v15 = vld [vmem:[%s4898_s25] sm:$0xff]  ;;  %s4844_s25 = smov 8   ;;  %s4845_s30 = smov 9  }
   0xe   :  { %228 = vmatpush.msra.mxu2 %v160_v5  ;;  %311 = vmatpush.msra.mxu3 %v141_v6  ;;  %v135_v17 = vld [vmem:[%s4888_s18] sm:$0xff]  ;;  %v4955_v23 = vld [vmem:[%s4893_s21 + $0x8] sm:$0xff]  ;;  %s5031_s28 = sld [smem:[%s5947_s0 + %s4844_s25]]   ;;  %s4848_s9 = smov 19  }
   0xf   :  { %4389 = vmatmul.msk.f32.vlgmr.msra.gmra.mxu2 %vm206_vm0, %v133_v7  ;;  %252 = vmatpush.msra.mxu1 %v167_v9  ;;  %v4966_v24 = vld [vmem:[%s4927_s3] ss:$0 sm:$0xff]  ;;  %s5098_s4 = sld [smem:[%s5947_s0 + %s4845_s30]]   ;;  %s4849_s13 = smov 10  }
  0x10   :  { %312 = vmatpush.msra.mxu3 %v140_v10  ;;  %283 = vmatpush.msrb.mxu2 %v138_v11  ;;  %v4987_v29 = vld [vmem:[%s4936_s7] ss:$0 sm:$0xff]  ;;  %s5160_s12 = sld [smem:[%s5947_s0 + %s4848_s9]]   ;;  %s4850_s22 = smov 11  }
  0x11   :  { %4395 = vmatmul.msk.f32.vlgmr.msra.gmra.mxu3 %vm206_vm0, %v4914_v12  ;;  %253 = vmatpush.msra.mxu1 %v166_v13  ;;  %v148_v19 = vld [vmem:[%s4948_s16 + $0x18] sm:$0xff]  ;;  %v147_v20 = vld [vmem:[%s4948_s16 + $0x10] sm:$0xff]  ;;  %v146_v21 = vld [vmem:[%s4948_s16 + $0x8] sm:$0xff]  ;;  %s5169_s21 = sld [smem:[%s5947_s0 + %s4849_s13]]   ;;  %s4851_s30 = smov 16  }
  0x12   :  { %284 = vmatpush.msrb.mxu2 %v137_v14  ;;  %335 = vmatpush.msra.mxu0 %v148_v19  ;;  %v145_v22 = vld [vmem:[%s4948_s16] sm:$0xff]  ;;  %s5185_s27 = sld [smem:[%s5947_s0 + %s4850_s22]]   ;;  %s4852_s5 = smov 17  }
  0x13   :  { %254 = vmatpush.msra.mxu1 %v165_v15  ;;  %v4994_v32 = vld [vmem:[%s4982_s23] ss:$0 sm:$0xff]  ;;  %s5331_s10 = sld [smem:[%s5947_s0 + %s4852_s5]]   ;;  %s4856_s5 = smov 25  }
  0x14   :  { %285 = vmatpush.msrb.mxu2 %v136_v16  ;;  %4391 = vmatmul.msk.f32.vlgmr.msra.gmra.mxu1 %vm206_vm0, %v133_v7  ;;  %v5034_v5 = vld [vmem:[%s5031_s28] sm:$0xff]  ;;  %s4858_s22 = smov 26   ;;  %s4860_s1 = smov 22  }
  0x15   :  { %4542 = vmatpush.msrb.mxu1 %v148_v19  ;;  %336 = vmatpush.msra.mxu0 %v147_v20  ;;  %s5505_s9 = sld [smem:[%s5947_s0 + %s4860_s1]]  }
  0x16   :  { %286 = vmatpush.msrb.mxu2 %v135_v17 }
  0x17   :  { %4390 = vmatmul.msk.f32.gmra.mxu2 %vm206_vm0, %v134_v18  ;;  %4543 = vmatpush.msrb.mxu1 %v147_v20 }
  0x18   :  { %337 = vmatpush.msra.mxu0 %v146_v21 }
  0x19   :  { %4544 = vmatpush.msrb.mxu1 %v146_v21  ;;  %4396 = vmatmul.msk.f32.gmra.mxu3 %vm206_vm0, %v4955_v23 }
  0x1a   :  { %338 = vmatpush.msra.mxu0 %v145_v22 }
  0x1b   :  { %4545 = vmatpush.msrb.mxu1 %v145_v22  ;;  %4397 = vmatmul.msk.f32.vlgmr.msra.gmra.mxu0 %vm206_vm0, %v4914_v12 }
  0x1c   :  { %4392 = vmatmul.msk.f32.gmra.mxu1 %vm206_vm0, %v134_v18 }
  0x1f   :  { %4393 = vmatmul.msk.f32.vlgmr.msrb.gmra.mxu2 %vm206_vm0, %v4914_v12 }
  0x24   :  { %4398 = vmatmul.msk.f32.vlgmr.msrb.gmra.mxu1 %vm206_vm0, %v4955_v23 }
  0x27   :  { %4394 = vmatmul.msk.f32.gmra.mxu2 %vm206_vm0, %v4955_v23 }
  0x91   :  { %v5012_v46 = vpop.f32.mrf.mxu1 }
  0x92   :  { %v4968_v25 = vpop.f32.mrf.mxu2 }
  0x94   :  { %v314_v26 = vpop.f32.mrf.mxu3 }
  0x95   :  { %v4971_v27 = vadd.f32 %v4966_v24, %v314_v26 }
  0x97   :  { %549 = vrot.lane.b32.xlu1 %v4971_v27, %s4840_s17  ;;  %423 = vrot.lane.b32.xlu0 %v4971_v27, %s4841_s19 }
  0x98   :  { %4399 = vmatpush.xpose.msk.msra.mxu1 %vm346_vm1, %v4971_v27  ;;  %v340_v33 = vpop.f32.mrf.mxu0 }
  0x99   :  { %v4997_v34 = vadd.f32 %v4994_v32, %v340_v33  ;;  %v5014_v47 = vpop.f32.mrf.mxu1 }
  0x9a   :  { %v4984_v28 = vpop.f32.mrf.mxu2 }
  0x9b   :  { %416 = vmatpush.msra.mxu2 %v4997_v34 }
  0x9c   :  { %v5004_v39 = vpop.f32.mrf.mxu3 }
  0xa1   :  { %v5016_v48 = vpop.f32.mrf.mxu1 }
  0xa2   :  { %v288_v30 = vpop.f32.mrf.mxu2 }
  0xa3   :  { %v289_v31 = vadd.f32 %v4987_v29, %v288_v30 }
  0xa5   :  { %547 = vrot.lane.b32.xlu1 %v289_v31, %s4840_s17  ;;  %421 = vrot.lane.b32.xlu0 %v289_v31, %s4841_s19 }
  0xa6   :  { %4400 = vmatmul.msk.f32.vlgmr.msra.gmra.mxu1 %vm346_vm1, %v289_v31 }
 0x109   :  { %v550_v35 = vpop.permute.xlu1 %549  ;;  %v424_v36 = vpop.permute.xlu0 %423 }
 0x10a   :  { %4402 = vmatpush.xpose.msk.msrb.mxu3 %vm346_vm1, %v424_v36  ;;  %4407 = vmatpush.xpose.msk.msrb.mxu0 %vm346_vm1, %v550_v35 }
 0x10e   :  { %542 = vmatpush.msra.mxu3 %v5034_v5 }
 0x117   :  { %v548_v37 = vpop.permute.xlu1 %547  ;;  %v422_v38 = vpop.permute.xlu0 %421 }
 0x118   :  { %4403 = vmatmul.msk.f32.vlgmr.msrb.gmra.mxu3 %vm346_vm1, %v422_v38  ;;  %4408 = vmatmul.msk.f32.vlgmr.msrb.gmra.mxu0 %vm346_vm1, %v548_v37 }
 0x123   :  { %v370_v49 = vpop.f32.mrf.mxu1 }
 0x124   :  { %v373_v50 = vmul.f32 0.35355338, %v370_v49 }
 0x126   :  { %v374_v51 = vsel %vm346_vm1, %v373_v50, -inf }
 0x195   :  { %v572_v43 = vpop.f32.mrf.mxu0 }
 0x196   :  { %v575_v44 = vmul.f32 0.35355338, %v572_v43 }
 0x198   :  { %v576_v45 = vsel %vm346_vm1, %v575_v44, -inf }
 0x19b   :  { %v446_v40 = vpop.f32.mrf.mxu3 }
 0x19c   :  { %v449_v41 = vmul.f32 0.35355338, %v446_v40  ;;  %v151_v40 = vld [vmem:[%s5031_s28 + $0x8] sm:$0xff] }
 0x19d   :  { %519 = vmatpush.msrb.mxu2 %v151_v40 }
 0x19e   :  { %v450_v42 = vsel %vm346_vm1, %v449_v41, -inf }
 0x19f   :  { %451 = vmax.xlane.f32.xlu2 %v450_v42 }
 0x1a7   :  { %577 = vmax.xlane.f32.xlu2 %v576_v45 }
 0x1bf   :  { %475 = vrot.lane.b32.xlu2 %v4997_v34, %s4841_s19 }
 0x1c7   :  { %600 = vrot.lane.b32.xlu2 %v4997_v34, %s4840_s17 }
 0x1f0   :  { %375 = vmax.xlane.f32.xlu2 %v374_v51 }
 0x212   :  { %v452_v52 = vpop.xlane.xlu2 %451 }
 0x213   :  { %v453_v53 = vsub.f32 %v449_v41, %v452_v52 }
 0x215   :  { %v454_v54 = vmul.f32 1.442695, %v453_v53 }
 0x217   :  { %4600 = vpow2.f32 %v454_v54 }
 0x21a   :  { %v578_v55 = vpop.xlane.xlu2 %577 }
 0x21b   :  { %v579_v56 = vsub.f32 %v575_v44, %v578_v55 }
 0x21d   :  { %v4601_v57 = vpop.eup %4600  ;;  %v580_v58 = vmul.f32 1.442695, %v579_v56  ;;  %v152_v56 = vld [vmem:[%s5031_s28 + $0x10] sm:$0xff] }
 0x21e   :  { %v456_v59 = vsel %vm346_vm1, %v4601_v57, 0.0 }
 0x21f   :  { %4602 = vpow2.f32 %v580_v58  ;;  %457 = vadd.xlane.f32.xlu0 %v456_v59 }
 0x222   :  { %v476_v60 = vpop.permute.xlu2 %475 }
 0x223   :  { %496 = vmatpush.msrb.mxu1 %v476_v60  ;;  %v291_v60 = vpop.f32.mrf.mxu2 }
 0x225   :  { %v4603_v61 = vpop.eup %4602 }
 0x226   :  { %v582_v62 = vsel %vm346_vm1, %v4603_v61, 0.0 }
 0x227   :  { %583 = vadd.xlane.f32.xlu1 %v582_v62  ;;  %v5053_v62 = vadd.f32 %v4994_v32, %v5016_v48 }
 0x22a   :  { %v601_v63 = vpop.permute.xlu2 %600 }
 0x22b   :  { %621 = vmatpush.msra.mxu1 %v601_v63 }
 0x240   :  { %652 = vrot.lane.b32.xlu1 %v4971_v27, %s4843_s24 }
 0x263   :  { %v376_v0 = vpop.xlane.xlu2 %375 }
 0x264   :  { %v377_v1 = vsub.f32 %v373_v50, %v376_v0 }
 0x266   :  { %v378_v2 = vmul.f32 1.442695, %v377_v1 }
 0x268   :  { %4604 = vpow2.f32 %v378_v2 }
 0x26e   :  { %v5023_v3 = vpop.eup %4604 }
 0x26f   :  { %v380_v4 = vsel %vm346_vm1, %v5023_v3, 0.0 }
 0x270   :  { %381 = vadd.xlane.f32.xlu0 %v380_v4 }
 0x284   :  { %650 = vrot.lane.b32.xlu0 %v289_v31, %s4843_s24 }
 0x292   :  { %v458_v6 = vpop.xlane.xlu0 %457 }
 0x293   :  { %4606 = vrcp.f32 %v458_v6  ;;  %v470_v11 = vand.u32 2147483648, %v458_v6  ;;  %v468_v14 = vand.u32 2147483647, %v458_v6  ;;  %vm464_vm3 = vweird.f32 %v458_v6 }
 0x295   :  { %v471_v17 = vor.u32 1.1754944e-38, %v470_v11  ;;  %vm469_vm5 = vcmp.eq.f32.partialorder %v468_v14, 8.507059e+37 }
 0x299   :  { %v4607_v7 = vpop.eup %4606 }
 0x29a   :  { %v460_v8 = vmul.f32 %v4607_v7, %v458_v6  ;;  %v584_v9 = vpop.xlane.xlu1 %583  ;;  %vm465_vm2 = vweird.f32 %v4607_v7 }
 0x29b   :  { %4608 = vrcp.f32 %v584_v9  ;;  %vm466_vm4 = vmor %vm464_vm3, %vm465_vm2  ;;  %v596_v26 = vand.u32 2147483648, %v584_v9  ;;  %v594_v30 = vand.u32 2147483647, %v584_v9  ;;  %vm590_vm7 = vweird.f32 %v584_v9 }
 0x29c   :  { %v461_v10 = vsub.f32 1.0, %v460_v8 }
 0x29d   :  { %v597_v33 = vor.u32 1.1754944e-38, %v596_v26  ;;  %vm595_vm9 = vcmp.eq.f32.partialorder %v594_v30, 8.507059e+37 }
 0x29e   :  { %v462_v13 = vmul.f32 %v4607_v7, %v461_v10 }
 0x2a0   :  { %v463_v15 = vadd.f32 %v4607_v7, %v462_v13 }
 0x2a1   :  { %v4609_v16 = vpop.eup %4608 }
 0x2a2   :  { %v467_v18 = vsel %vm466_vm4, %v4607_v7, %v463_v15  ;;  %v586_v19 = vmul.f32 %v4609_v16, %v584_v9  ;;  %vm591_vm6 = vweird.f32 %v4609_v16 }
 0x2a3   :  { %v472_v20 = vsel %vm469_vm5, %v471_v17, %v467_v18  ;;  %vm592_vm8 = vmor %vm590_vm7, %vm591_vm6 }
 0x2a4   :  { %v587_v21 = vsub.f32 1.0, %v586_v19  ;;  %v473_v22 = vmul.f32 %v4601_v57, %v472_v20  ;;  %v318_v57 = vadd.f32 %v4966_v24, %v5004_v39 }
 0x2a6   :  { %v588_v27 = vmul.f32 %v4609_v16, %v587_v21  ;;  %4404 = vmatmul.msk.f32.vlgmr.msrb.gmra.mxu1 %vm346_vm1, %v473_v22 }
 0x2a8   :  { %v589_v31 = vadd.f32 %v4609_v16, %v588_v27 }
 0x2aa   :  { %v593_v35 = vsel %vm592_vm8, %v4609_v16, %v589_v31 }
 0x2ab   :  { %v598_v36 = vsel %vm595_vm9, %v597_v33, %v593_v35 }
 0x2ac   :  { %v599_v37 = vmul.f32 %v4603_v61, %v598_v36  ;;  %v292_v61 = vadd.f32 %v4987_v29, %v291_v60  ;;  %v5101_v60 = vld [vmem:[%s5031_s28 + $0x18] sm:$0xff] }
 0x2ad   :  { %747 = vmatpush.msrb.mxu1 %v5101_v60 }
 0x2ae   :  { %4409 = vmatmul.msk.f32.vlgmr.msra.gmra.mxu1 %vm346_vm1, %v599_v37 }
 0x2b2   :  { %v653_v38 = vpop.permute.xlu1 %652 }
 0x2b3   :  { %4411 = vmatpush.xpose.msk.msrb.mxu3 %vm346_vm1, %v653_v38 }
 0x2e3   :  { %v382_v41 = vpop.xlane.xlu0 %381 }
 0x2e4   :  { %4610 = vrcp.f32 %v382_v41  ;;  %v394_v45 = vand.u32 2147483648, %v382_v41  ;;  %v392_v50 = vand.u32 2147483647, %v382_v41  ;;  %vm388_vm11 = vweird.f32 %v382_v41 }
 0x2e6   :  { %v395_v52 = vor.u32 1.1754944e-38, %v394_v45  ;;  %vm393_vm13 = vcmp.eq.f32.partialorder %v392_v50, 8.507059e+37 }
 0x2ea   :  { %v4611_v42 = vpop.eup %4610 }
 0x2eb   :  { %v384_v43 = vmul.f32 %v4611_v42, %v382_v41  ;;  %vm389_vm10 = vweird.f32 %v4611_v42 }
 0x2ec   :  { %vm390_vm12 = vmor %vm388_vm11, %vm389_vm10 }
 0x2ed   :  { %v385_v44 = vsub.f32 1.0, %v384_v43 }
 0x2ef   :  { %v386_v49 = vmul.f32 %v4611_v42, %v385_v44 }
 0x2f1   :  { %v387_v51 = vadd.f32 %v4611_v42, %v386_v49 }
 0x2f3   :  { %v391_v53 = vsel %vm390_vm12, %v4611_v42, %v387_v51 }
 0x2f4   :  { %v396_v54 = vsel %vm393_vm13, %v395_v52, %v391_v53 }
 0x2f5   :  { %v397_v55 = vmul.f32 %v5023_v3, %v396_v54 }
 0x2f6   :  { %v651_v39 = vpop.permute.xlu0 %650 }
 0x2f7   :  { %4401 = vmatmul.msk.f32.vlgmr.msra.gmra.mxu2 %vm346_vm1, %v397_v55 }
 0x2f8   :  { %644 = vmatpush.msra.mxu2 %v152_v56 }
 0x323   :  { %v498_v58 = vpop.f32.mrf.mxu1 }
 0x324   :  { %4405 = vmatmul.msk.f32.vlgmr.msrb.gmra.mxu2 %vm346_vm1, %v498_v58 }
 0x325   :  { %4415 = vmatpush.xpose.msk.msrb.mxu2 %vm346_vm1, %v318_v57 }
 0x32b   :  { %v623_v59 = vpop.f32.mrf.mxu1 }
 0x32c   :  { %4410 = vmatmul.msk.f32.vlgmr.msra.gmra.mxu2 %vm346_vm1, %v623_v59 }
 0x32d   :  { %925 = vmatpush.msra.mxu2 %v151_v40 }
 0x334   :  { %4416 = vmatmul.msk.f32.vlgmr.msrb.gmra.mxu2 %vm346_vm1, %v292_v61 }
 0x335   :  { %1050 = vmatpush.msrb.mxu2 %v152_v56  ;;  %v5085_v56 = vld [vmem:[%s4903_s29] ss:$0 sm:$0xff]  ;;  %s4846_s29 = smov 18  }
 0x336   :  { %s5139_s8 = sld [smem:[%s5947_s0 + %s4846_s29]]  }
 0x337   :  { %s5234_s29 = sld [smem:[%s5947_s0 + %s4851_s30]]  }
 0x338   :  { %s5455_s30 = sld [smem:[%s5947_s0 + %s4858_s22]]  }
 0x37a   :  { %v418_v24 = vpop.f32.mrf.mxu2 }
 0x37b   :  { %4406 = vmatmul.msk.f32.vlgmr.msra.gmra.mxu3 %vm346_vm1, %v418_v24 }
 0x37c   :  { %822 = vmatpush.msra.mxu3 %v5053_v62 }
 0x383   :  { %4412 = vmatmul.msk.f32.vlgmr.msrb.gmra.mxu3 %vm346_vm1, %v651_v39 }
 0x384   :  { %948 = vmatpush.msrb.mxu3 %v5034_v5 }
 0x3a7   :  { %v5059_v63 = vpop.f32.mrf.mxu2 }
 0x3af   :  { %v5061_v29 = vpop.f32.mrf.mxu2 }
 0x3b7   :  { %v776_v0 = vpop.f32.mrf.mxu2 }
 0x3b8   :  { %v779_v1 = vmul.f32 0.35355338, %v776_v0 }
 0x3ba   :  { %v780_v2 = vsel %vm346_vm1, %v779_v1, -inf }
 0x3bb   :  { %781 = vmax.xlane.f32.xlu1 %v780_v2 }
 0x3d4   :  { %829 = vrot.lane.b32.xlu1 %v318_v57, %s4841_s19 }
 0x3fe   :  { %v5065_v32 = vpop.f32.mrf.mxu3 }
 0x406   :  { %v675_v48 = vpop.f32.mrf.mxu3 }
 0x407   :  { %v678_v3 = vmul.f32 0.35355338, %v675_v48 }
 0x409   :  { %v679_v4 = vsel %vm346_vm1, %v678_v3, -inf }
 0x40a   :  { %680 = vmax.xlane.f32.xlu2 %v679_v4 }
 0x42e   :  { %v782_v6 = vpop.xlane.xlu1 %781 }
 0x42f   :  { %v783_v5 = vsub.f32 %v779_v1, %v782_v6 }
 0x431   :  { %v784_v7 = vmul.f32 1.442695, %v783_v5 }
 0x433   :  { %4612 = vpow2.f32 %v784_v7 }
 0x439   :  { %v4613_v8 = vpop.eup %4612 }
 0x43a   :  { %v786_v9 = vsel %vm346_vm1, %v4613_v8, 0.0 }
 0x43b   :  { %787 = vadd.xlane.f32.xlu0 %v786_v9 }
 0x446   :  { %v830_v38 = vpop.permute.xlu1 %829 }
 0x44f   :  { %827 = vrot.lane.b32.xlu0 %v292_v61, %s4841_s19 }
 0x457   :  { %1056 = vrot.lane.b32.xlu0 %v292_v61, %s4843_s24 }
 0x47d   :  { %v681_v10 = vpop.xlane.xlu2 %680 }
 0x47e   :  { %v682_v11 = vsub.f32 %v678_v3, %v681_v10 }
 0x480   :  { %v683_v13 = vmul.f32 1.442695, %v682_v11 }
 0x482   :  { %4614 = vpow2.f32 %v683_v13 }
 0x488   :  { %v4615_v14 = vpop.eup %4614 }
 0x489   :  { %v685_v15 = vsel %vm346_vm1, %v4615_v14, 0.0 }
 0x48a   :  { %686 = vadd.xlane.f32.xlu2 %v685_v15 }
 0x4a2   :  { %703 = vrot.lane.b32.xlu2 %v4997_v34, %s4843_s24 }
 0x4aa   :  { %955 = vrot.lane.b32.xlu2 %v318_v57, %s4840_s17 }
 0x4ae   :  { %v788_v16 = vpop.xlane.xlu0 %787 }
 0x4af   :  { %4616 = vrcp.f32 %v788_v16  ;;  %v800_v20 = vand.u32 2147483648, %v788_v16  ;;  %v798_v22 = vand.u32 2147483647, %v788_v16  ;;  %vm794_vm15 = vweird.f32 %v788_v16 }
 0x4b1   :  { %v801_v27 = vor.u32 1.1754944e-38, %v800_v20  ;;  %vm799_vm3 = vcmp.eq.f32.partialorder %v798_v22, 8.507059e+37 }
 0x4b2   :  { %1058 = vrot.lane.b32.xlu2 %v318_v57, %s4843_s24  ;;  %v5089_v57 = vadd.f32 %v5085_v56, %v4968_v25 }
 0x4b5   :  { %v4617_v17 = vpop.eup %4616 }
 0x4b6   :  { %v790_v18 = vmul.f32 %v4617_v17, %v788_v16  ;;  %vm795_vm14 = vweird.f32 %v4617_v17 }
 0x4b7   :  { %vm796_vm2 = vmor %vm794_vm15, %vm795_vm14 }
 0x4b8   :  { %v791_v19 = vsub.f32 1.0, %v790_v18 }
 0x4ba   :  { %v792_v21 = vmul.f32 %v4617_v17, %v791_v19  ;;  %953 = vrot.lane.b32.xlu2 %v292_v61, %s4840_s17  ;;  %v545_v19 = vadd.f32 %v5065_v32, %v5059_v63 }
 0x4bc   :  { %v793_v26 = vadd.f32 %v4617_v17, %v792_v21  ;;  %v649_v22 = vadd.f32 %v5061_v29, %v545_v19 }
 0x4be   :  { %v797_v34 = vsel %vm796_vm2, %v4617_v17, %v793_v26 }
 0x4bf   :  { %v802_v30 = vsel %vm799_vm3, %v801_v27, %v797_v34  ;;  %v5120_v27 = vld [vmem:[%s5098_s4] ss:$0 sm:$0xff] }
 0x4c0   :  { %v803_v31 = vmul.f32 %v4613_v8, %v802_v30 }
 0x4c1   :  { %v828_v54 = vpop.permute.xlu0 %827 }
 0x4c2   :  { %4417 = vmatmul.msk.f32.vlgmr.msra.gmra.mxu3 %vm346_vm1, %v803_v31 }
 0x4c9   :  { %v1057_v59 = vpop.permute.xlu0 %1056 }
 0x4fd   :  { %v687_v33 = vpop.xlane.xlu2 %686 }
 0x4fe   :  { %4618 = vrcp.f32 %v687_v33  ;;  %v699_v41 = vand.u32 2147483648, %v687_v33  ;;  %v697_v43 = vand.u32 2147483647, %v687_v33  ;;  %vm693_vm5 = vweird.f32 %v687_v33 }
 0x500   :  { %v700_v45 = vor.u32 1.1754944e-38, %v699_v41  ;;  %vm698_vm7 = vcmp.eq.f32.partialorder %v697_v43, 8.507059e+37 }
 0x504   :  { %v4619_v35 = vpop.eup %4618 }
 0x505   :  { %v689_v36 = vmul.f32 %v4619_v35, %v687_v33  ;;  %v704_v37 = vpop.permute.xlu2 %703  ;;  %vm694_vm4 = vweird.f32 %v4619_v35 }
 0x506   :  { %724 = vmatpush.msra.mxu0 %v704_v37  ;;  %vm695_vm6 = vmor %vm693_vm5, %vm694_vm4 }
 0x507   :  { %v690_v40 = vsub.f32 1.0, %v689_v36 }
 0x508   :  { %4418 = vmatpush.xpose.msk.msrb.mxu0 %vm346_vm1, %v830_v38 }
 0x509   :  { %v691_v42 = vmul.f32 %v4619_v35, %v690_v40 }
 0x50b   :  { %v692_v44 = vadd.f32 %v4619_v35, %v691_v42 }
 0x50d   :  { %v696_v49 = vsel %vm695_vm6, %v4619_v35, %v692_v44  ;;  %v956_v50 = vpop.permute.xlu2 %955 }
 0x50e   :  { %v701_v51 = vsel %vm698_vm7, %v700_v45, %v696_v49 }
 0x50f   :  { %v702_v52 = vmul.f32 %v4615_v14, %v701_v51 }
 0x511   :  { %4413 = vmatmul.msk.f32.vlgmr.msra.gmra.mxu0 %vm346_vm1, %v702_v52 }
 0x512   :  { %4423 = vmatpush.xpose.msk.msra.mxu0 %vm346_vm1, %v956_v50 }
 0x515   :  { %v1059_v53 = vpop.permute.xlu2 %1058 }
 0x516   :  { %4427 = vmatpush.xpose.msk.msra.mxu3 %vm346_vm1, %v1059_v53 }
 0x519   :  { %4419 = vmatmul.msk.f32.vlgmr.msrb.gmra.mxu0 %vm346_vm1, %v828_v54 }
 0x51d   :  { %v954_v55 = vpop.permute.xlu2 %953 }
 0x521   :  { %4424 = vmatmul.msk.f32.vlgmr.msra.gmra.mxu0 %vm346_vm1, %v954_v55 }
 0x545   :  { %v824_v58 = vpop.f32.mrf.mxu3 }
 0x546   :  { %4422 = vmatmul.msk.f32.vlgmr.msrb.gmra.mxu3 %vm346_vm1, %v824_v58 }
 0x547   :  { %4433 = vmatpush.xpose.msk.msrb.mxu3 %vm346_vm1, %v5089_v57 }
 0x54e   :  { %4428 = vmatmul.msk.f32.vlgmr.msra.gmra.mxu3 %vm346_vm1, %v1057_v59 }
 0x58e   :  { %v726_v25 = vpop.f32.mrf.mxu0 }
 0x58f   :  { %4414 = vmatmul.msk.f32.vlgmr.msrb.gmra.mxu1 %vm346_vm1, %v726_v25 }
 0x596   :  { %v852_v61 = vpop.f32.mrf.mxu0 }
 0x597   :  { %v855_v24 = vmul.f32 0.35355338, %v852_v61 }
 0x599   :  { %v856_v39 = vsel %vm346_vm1, %v855_v24, -inf }
 0x59a   :  { %857 = vmax.xlane.f32.xlu1 %v856_v39  ;;  %v4847_v39 = vmov 32.0  }
 0x59e   :  { %v978_v0 = vpop.f32.mrf.mxu0 }
 0x59f   :  { %v981_v1 = vmul.f32 0.35355338, %v978_v0 }
 0x5a1   :  { %v982_v2 = vsel %vm346_vm1, %v981_v1, -inf }
 0x5a2   :  { %983 = vmax.xlane.f32.xlu2 %v982_v2 }
 0x5c9   :  { %v5107_v48 = vpop.f32.mrf.mxu3 }
 0x5d1   :  { %v1081_v3 = vpop.f32.mrf.mxu3 }
 0x5d2   :  { %v1084_v4 = vmul.f32 0.35355338, %v1081_v3 }
 0x5d4   :  { %v1085_v6 = vsel %vm346_vm1, %v1084_v4, -inf }
 0x5d5   :  { %1086 = vmax.xlane.f32.xlu0 %v1085_v6 }
 0x60c   :  { %v749_v21 = vpop.f32.mrf.mxu1 }
 0x60d   :  { %v858_v5 = vpop.xlane.xlu1 %857  ;;  %v752_v26 = vadd.f32 %v749_v21, %v649_v22 }
 0x60e   :  { %v859_v7 = vsub.f32 %v855_v24, %v858_v5 }
 0x60f   :  { %v1162_v30 = vadd.f32 %v5120_v27, %v752_v26 }
 0x610   :  { %v860_v8 = vmul.f32 1.442695, %v859_v7 }
 0x611   :  { %v5128_v33 = vadd.f32 %v1162_v30, %v4914_v12 }
 0x612   :  { %4620 = vpow2.f32 %v860_v8 }
 0x613   :  { %v1166_v63 = vsel %vm206_vm0, %v5128_v33, 0.0 }
 0x615   :  { %v984_v9 = vpop.xlane.xlu2 %983 }
 0x616   :  { %v985_v10 = vsub.f32 %v981_v1, %v984_v9 }
 0x618   :  { %v4621_v11 = vpop.eup %4620  ;;  %v986_v13 = vmul.f32 1.442695, %v985_v10 }
 0x619   :  { %v862_v14 = vsel %vm346_vm1, %v4621_v11, 0.0 }
 0x61a   :  { %4622 = vpow2.f32 %v986_v13  ;;  %863 = vadd.xlane.f32.xlu1 %v862_v14 }
 0x620   :  { %v4623_v15 = vpop.eup %4622 }
 0x621   :  { %v988_v16 = vsel %vm346_vm1, %v4623_v15, 0.0 }
 0x622   :  { %989 = vadd.xlane.f32.xlu2 %v988_v16 }
 0x633   :  { %881 = vrot.lane.b32.xlu1 %v5053_v62, %s4841_s19 }
 0x63a   :  { %1006 = vrot.lane.b32.xlu2 %v5053_v62, %s4840_s17 }
 0x648   :  { %v1087_v17 = vpop.xlane.xlu0 %1086 }
 0x649   :  { %v1088_v18 = vsub.f32 %v1084_v4, %v1087_v17 }
 0x64b   :  { %v1089_v20 = vmul.f32 1.442695, %v1088_v18 }
 0x64d   :  { %4624 = vpow2.f32 %v1089_v20  ;;  %v5148_v20 = vld [vmem:[%s4943_s11] ss:$0 sm:$0xff]  ;;  %s4853_s11 = smov 20  }
 0x64e   :  { %s5390_s20 = sld [smem:[%s5947_s0 + %s4853_s11]]  }
 0x64f   :  { %s5415_s11 = sld [smem:[%s5947_s0 + %s4856_s5]]  }
 0x653   :  { %v5122_v34 = vpop.eup %4624 }
 0x654   :  { %v1091_v31 = vsel %vm346_vm1, %v5122_v34, 0.0 }
 0x655   :  { %1092 = vadd.xlane.f32.xlu0 %v1091_v31  ;;  %v5153_v31 = vadd.f32 %v5148_v20, %v5012_v46  ;;  %v158_v46 = vld [vmem:[%s5169_s21 + $0x18] sm:$0xff] }
 0x65d   :  { %1167 = vadd.xlane.f32.xlu1 %v1166_v63  ;;  %v157_v63 = vld [vmem:[%s5169_s21 + $0x10] sm:$0xff] }
 0x669   :  { %1109 = vrot.lane.b32.xlu0 %v5053_v62, %s4843_s24 }
 0x68d   :  { %v864_v29 = vpop.xlane.xlu1 %863 }
 0x68e   :  { %4626 = vrcp.f32 %v864_v29  ;;  %v876_v12 = vand.u32 2147483648, %v864_v29  ;;  %vm870_vm9 = vweird.f32 %v864_v29  ;;  %v874_v42 = vand.u32 2147483647, %v864_v29 }
 0x690   :  { %v877_v49 = vor.u32 1.1754944e-38, %v876_v12  ;;  %vm875_vm11 = vcmp.eq.f32.partialorder %v874_v42, 8.507059e+37 }
 0x694   :  { %v4627_v32 = vpop.eup %4626 }
 0x695   :  { %v866_v35 = vmul.f32 %v4627_v32, %v864_v29  ;;  %v990_v36 = vpop.xlane.xlu2 %989  ;;  %vm871_vm8 = vweird.f32 %v4627_v32  ;;  %v156_v29 = vld [vmem:[%s5169_s21 + $0x8] sm:$0xff] }
 0x696   :  { %4628 = vrcp.f32 %v990_v36  ;;  %vm872_vm10 = vmor %vm870_vm9, %vm871_vm8  ;;  %v1002_v52 = vand.u32 2147483648, %v990_v36  ;;  %vm996_vm13 = vweird.f32 %v990_v36  ;;  %v1000_v53 = vand.u32 2147483647, %v990_v36 }
 0x697   :  { %v867_v37 = vsub.f32 1.0, %v866_v35  ;;  %4630 = vrcp.f32 %v4847_v39 }
 0x698   :  { %v1003_v25 = vor.u32 1.1754944e-38, %v1002_v52  ;;  %vm1001_vm15 = vcmp.eq.f32.partialorder %v1000_v53, 8.507059e+37 }
 0x699   :  { %v868_v38 = vmul.f32 %v4627_v32, %v867_v37 }
 0x69b   :  { %v869_v40 = vadd.f32 %v4627_v32, %v868_v38 }
 0x69c   :  { %v4629_v41 = vpop.eup %4628 }
 0x69d   :  { %v992_v43 = vmul.f32 %v4629_v41, %v990_v36  ;;  %v873_v44 = vsel %vm872_vm10, %v4627_v32, %v869_v40  ;;  %vm997_vm12 = vweird.f32 %v4629_v41  ;;  %v1007_v59 = vpop.permute.xlu2 %1006  ;;  %v4631_v0 = vpop.eup %4630  ;;  %v155_v32 = vld [vmem:[%s5169_s21] sm:$0xff] }
 0x69e   :  { %v878_v50 = vsel %vm875_vm11, %v877_v49, %v873_v44  ;;  %vm998_vm14 = vmor %vm996_vm13, %vm997_vm12  ;;  %v1173_v1 = vmul.f32 32.0, %v4631_v0  ;;  %vm1177_vm2 = vweird.f32 %v4631_v0  ;;  %v4589_v49 = vld [vmem:[%s5139_s8] ss:$0 sm:$0xff] }
 0x69f   :  { %v993_v45 = vsub.f32 1.0, %v992_v43  ;;  %v879_v55 = vmul.f32 %v4621_v11, %v878_v50 }
 0x6a0   :  { %v1174_v2 = vsub.f32 1.0, %v1173_v1  ;;  %v5197_v1 = vld [vmem:[%s5185_s27] ss:$0 sm:$0xff] }
 0x6a1   :  { %v994_v62 = vmul.f32 %v4629_v41, %v993_v45 }
 0x6a2   :  { %v1175_v3 = vmul.f32 %v4631_v0, %v1174_v2 }
 0x6a3   :  { %v995_v51 = vadd.f32 %v4629_v41, %v994_v62 }
 0x6a4   :  { %v1176_v6 = vadd.f32 %v4631_v0, %v1175_v3 }
 0x6a5   :  { %v882_v54 = vpop.permute.xlu1 %881  ;;  %v999_v58 = vsel %vm998_vm14, %v4629_v41, %v995_v51  ;;  %v4590_v51 = vld [vmem:[%s5160_s12] ss:$0 sm:$0xff] }
 0x6a6   :  { %902 = vmatpush.msra.mxu1 %v882_v54  ;;  %v1004_v61 = vsel %vm1001_vm15, %v1003_v25, %v999_v58 }
 0x6a7   :  { %4420 = vmatmul.msk.f32.vlgmr.msra.gmra.mxu1 %vm346_vm1, %v879_v55  ;;  %v1005_v24 = vmul.f32 %v4623_v15, %v1004_v61 }
 0x6a8   :  { %1027 = vmatpush.msrb.mxu1 %v1007_v59 }
 0x6aa   :  { %1153 = vmatpush.msra.mxu1 %v5101_v60  ;;  %v5142_v60 = vsel %vm1177_vm2, %v4631_v0, %v1176_v6 }
 0x6af   :  { %4425 = vmatmul.msk.f32.vlgmr.msrb.gmra.mxu1 %vm346_vm1, %v1005_v24 }
 0x6c8   :  { %v1093_v4 = vpop.xlane.xlu0 %1092 }
 0x6c9   :  { %4632 = vrcp.f32 %v1093_v4  ;;  %v1105_v11 = vand.u32 2147483648, %v1093_v4  ;;  %v1103_v15 = vand.u32 2147483647, %v1093_v4  ;;  %vm1099_vm4 = vweird.f32 %v1093_v4 }
 0x6cb   :  { %v1106_v18 = vor.u32 1.1754944e-38, %v1105_v11  ;;  %vm1104_vm6 = vcmp.eq.f32.partialorder %v1103_v15, 8.507059e+37 }
 0x6cf   :  { %v4633_v5 = vpop.eup %4632 }
 0x6d0   :  { %v1095_v7 = vmul.f32 %v4633_v5, %v1093_v4  ;;  %v1168_v8 = vpop.xlane.xlu1 %1167  ;;  %vm1100_vm3 = vweird.f32 %v4633_v5 }
 0x6d1   :  { %v1179_v9 = vmul.f32 %v5142_v60, %v1168_v8  ;;  %vm1101_vm5 = vmor %vm1099_vm4, %vm1100_vm3 }
 0x6d2   :  { %v1096_v10 = vsub.f32 1.0, %v1095_v7 }
 0x6d3   :  { %v1181_v13 = vsub.f32 %v5128_v33, %v1179_v9 }
 0x6d4   :  { %v1097_v14 = vmul.f32 %v4633_v5, %v1096_v10 }
 0x6d5   :  { %v1183_v16 = vmul.f32 %v1181_v13, %v1181_v13 }
 0x6d6   :  { %v1098_v17 = vadd.f32 %v4633_v5, %v1097_v14 }
 0x6d7   :  { %v1185_v19 = vsel %vm206_vm0, %v1183_v16, 0.0 }
 0x6d8   :  { %v1102_v21 = vsel %vm1101_vm5, %v4633_v5, %v1098_v17  ;;  %1186 = vadd.xlane.f32.xlu0 %v1185_v19 }
 0x6d9   :  { %v1107_v22 = vsel %vm1104_vm6, %v1106_v18, %v1102_v21 }
 0x6da   :  { %v1108_v26 = vmul.f32 %v5122_v34, %v1107_v22 }
 0x6db   :  { %v1110_v30 = vpop.permute.xlu0 %1109 }
 0x6dc   :  { %1130 = vmatpush.msrb.mxu0 %v1110_v30 }
 0x6dd   :  { %4429 = vmatmul.msk.f32.vlgmr.msrb.gmra.mxu0 %vm346_vm1, %v1108_v26 }
 0x6de   :  { %1328 = vmatpush.msra.mxu0 %v5153_v31 }
 0x6ec   :  { %1461 = vrot.lane.b32.xlu0 %v5089_v57, %s4840_s17 }
 0x724   :  { %v904_v34 = vpop.f32.mrf.mxu1 }
 0x725   :  { %4421 = vmatmul.msk.f32.vlgmr.msra.gmra.mxu2 %vm346_vm1, %v904_v34 }
 0x726   :  { %1248 = vmatpush.msra.mxu2 %v158_v46 }
 0x728   :  { %1249 = vmatpush.msra.mxu2 %v157_v63 }
 0x72a   :  { %1250 = vmatpush.msra.mxu2 %v156_v29 }
 0x72c   :  { %v1029_v33 = vpop.f32.mrf.mxu1  ;;  %1251 = vmatpush.msra.mxu2 %v155_v32 }
 0x72d   :  { %4426 = vmatmul.msk.f32.vlgmr.msrb.gmra.mxu2 %vm346_vm1, %v1029_v33 }
 0x74b   :  { %v1187_v35 = vpop.xlane.xlu0 %1186 }
 0x74c   :  { %v1191_v36 = vmul.f32 %v1187_v35, %v5142_v60 }
 0x74e   :  { %v1193_v37 = vadd.f32 1e-05, %v1191_v36 }
 0x750   :  { %4634 = vrsqrt.f32 %v1193_v37  ;;  %vm1201_vm8 = vweird.f32 %v1193_v37 }
 0x756   :  { %v4635_v38 = vpop.eup %4634 }
 0x757   :  { %v1196_v40 = vmul.f32 %v4635_v38, %v1193_v37  ;;  %vm1202_vm7 = vweird.f32 %v4635_v38 }
 0x758   :  { %vm1203_vm9 = vmor %vm1201_vm8, %vm1202_vm7 }
 0x759   :  { %v1197_v41 = vmul.f32 %v4635_v38, %v1196_v40 }
 0x75a   :  { %v1132_v12 = vpop.f32.mrf.mxu0 }
 0x75b   :  { %v1198_v42 = vmul.f32 0.5, %v1197_v41  ;;  %4430 = vmatmul.msk.f32.vlgmr.msra.gmra.mxu1 %vm346_vm1, %v1132_v12 }
 0x75d   :  { %v1199_v43 = vsub.f32 1.5, %v1198_v42 }
 0x75e   :  { %v5177_v44 = vpop.permute.xlu0 %1461 }
 0x75f   :  { %v1200_v45 = vmul.f32 %v4635_v38, %v1199_v43  ;;  %4441 = vmatpush.xpose.msk.msrb.mxu2 %vm346_vm1, %v5177_v44 }
 0x761   :  { %v1204_v62 = vsel %vm1203_vm9, %v4635_v38, %v1200_v45  ;;  %v5237_v38 = vld [vmem:[%s5234_s29] sm:$0xff] }
 0x762   :  { %v1215_v50 = vmul.f32 %v1204_v62, %v1181_v13 }
 0x764   :  { %v1220_v52 = vmul.f32 %v4589_v49, %v1215_v50 }
 0x766   :  { %v5188_v53 = vadd.f32 %v4590_v51, %v1220_v52 }
 0x768   :  { %4431 = vmatmul.msk.f32.vlgmr.msra.gmra.mxu2 %vm206_vm0, %v5188_v53 }
 0x7a8   :  { %v927_v54 = vpop.f32.mrf.mxu2 }
 0x7a9   :  { %v951_v58 = vadd.f32 %v5107_v48, %v927_v54 }
 0x7b0   :  { %v1052_v55 = vpop.f32.mrf.mxu2 }
 0x7b1   :  { %v1055_v59 = vadd.f32 %v1052_v55, %v951_v58 }
 0x7d8   :  { %v1155_v25 = vpop.f32.mrf.mxu1 }
 0x7d9   :  { %v1158_v61 = vadd.f32 %v1155_v25, %v1055_v59 }
 0x7db   :  { %v1163_v24 = vadd.f32 %v5120_v27, %v1158_v61 }
 0x7dd   :  { %v1165_v39 = vadd.f32 %v1163_v24, %v4955_v23 }
 0x7df   :  { %v1169_v0 = vsel %vm206_vm0, %v1165_v39, 0.0 }
 0x7e0   :  { %1170 = vadd.xlane.f32.xlu2 %v1169_v0 }
 0x7eb   :  { %v1253_v2 = vpop.f32.mrf.mxu2 }
 0x7ec   :  { %v5200_v3 = vadd.f32 %v5197_v1, %v1253_v2 }
 0x7ee   :  { %1459 = vrot.lane.b32.xlu0 %v5200_v3, %s4840_s17  ;;  %4434 = vmatmul.msk.f32.vlgmr.msrb.gmra.mxu3 %vm346_vm1, %v5200_v3 }
 0x7f8   :  { %1335 = vrot.lane.b32.xlu2 %v5089_v57, %s4841_s19 }
 0x853   :  { %v1171_v48 = vpop.xlane.xlu2 %1170 }
 0x854   :  { %v1180_v23 = vmul.f32 %v5142_v60, %v1171_v48 }
 0x856   :  { %v1182_v27 = vsub.f32 %v1165_v39, %v1180_v23 }
 0x858   :  { %v1184_v4 = vmul.f32 %v1182_v27, %v1182_v27 }
 0x85a   :  { %v1188_v6 = vsel %vm206_vm0, %v1184_v4, 0.0 }
 0x85b   :  { %1189 = vadd.xlane.f32.xlu1 %v1188_v6  ;;  %v5210_v5 = vpop.permute.xlu2 %1335 }
 0x85c   :  { %4436 = vmatpush.xpose.msk.msrb.mxu1 %vm346_vm1, %v5210_v5 }
 0x860   :  { %v1460_v26 = vpop.permute.xlu0 %1459  ;;  %1454 = vmatpush.msra.mxu1 %v5237_v38 }
 0x871   :  { %v1282_v12 = vpop.f32.mrf.mxu3 }
 0x872   :  { %v1285_v42 = vmul.f32 0.35355338, %v1282_v12 }
 0x874   :  { %1333 = vrot.lane.b32.xlu1 %v5200_v3, %s4841_s19 }
 0x8ce   :  { %v1190_v7 = vpop.xlane.xlu1 %1189 }
 0x8cf   :  { %v1192_v8 = vmul.f32 %v1190_v7, %v5142_v60 }
 0x8d1   :  { %v1194_v9 = vadd.f32 1e-05, %v1192_v8 }
 0x8d3   :  { %4636 = vrsqrt.f32 %v1194_v9  ;;  %vm1211_vm11 = vweird.f32 %v1194_v9 }
 0x8d9   :  { %v4637_v10 = vpop.eup %4636 }
 0x8da   :  { %v1206_v11 = vmul.f32 %v4637_v10, %v1194_v9  ;;  %vm1212_vm10 = vweird.f32 %v4637_v10 }
 0x8db   :  { %vm1213_vm12 = vmor %vm1211_vm11, %vm1212_vm10 }
 0x8dc   :  { %v1207_v13 = vmul.f32 %v4637_v10, %v1206_v11 }
 0x8de   :  { %v1208_v14 = vmul.f32 0.5, %v1207_v13 }
 0x8e0   :  { %v1209_v15 = vsub.f32 1.5, %v1208_v14 }
 0x8e2   :  { %v1210_v16 = vmul.f32 %v4637_v10, %v1209_v15 }
 0x8e4   :  { %v1214_v17 = vsel %vm1213_vm12, %v4637_v10, %v1210_v16 }
 0x8e5   :  { %v1216_v18 = vmul.f32 %v1214_v17, %v1182_v27 }
 0x8e6   :  { %v1334_v19 = vpop.permute.xlu1 %1333 }
 0x8e7   :  { %4437 = vmatmul.msk.f32.vlgmr.msrb.gmra.mxu1 %vm346_vm1, %v1334_v19  ;;  %v1221_v21 = vmul.f32 %v4589_v49, %v1216_v18  ;;  %v1286_v49 = vsel %vm346_vm1, %v1285_v42, -inf }
 0x8e9   :  { %v5218_v22 = vadd.f32 %v4590_v51, %v1221_v21 }
 0x8eb   :  { %4432 = vmatmul.msk.f32.gmra.mxu2 %vm206_vm0, %v5218_v22 }
 0x8f3   :  { %4442 = vmatmul.msk.f32.vlgmr.msrb.gmra.mxu2 %vm346_vm1, %v1460_v26 }
 0x964   :  { %v1358_v30 = vpop.f32.mrf.mxu1 }
 0x965   :  { %v1361_v34 = vmul.f32 0.35355338, %v1358_v30 }
 0x967   :  { %v1362_v33 = vsel %vm346_vm1, %v1361_v34, -inf }
 0x968   :  { %1363 = vmax.xlane.f32.xlu2 %v1362_v33  ;;  %v171_v33 = vld [vmem:[%s5234_s29 + $0x8] sm:$0xff] }
 0x969   :  { %1431 = vmatpush.msrb.mxu0 %v171_v33 }
 0x96e   :  { %v5224_v46 = vpop.f32.mrf.mxu2 }
 0x976   :  { %v1484_v63 = vpop.f32.mrf.mxu2 }
 0x977   :  { %v1487_v29 = vmul.f32 0.35355338, %v1484_v63 }
 0x979   :  { %v1488_v32 = vsel %vm346_vm1, %v1487_v29, -inf }
 0x97a   :  { %1489 = vmax.xlane.f32.xlu0 %v1488_v32 }
 0x98e   :  { %1387 = vrot.lane.b32.xlu0 %v5153_v31, %s4841_s19 }
 0x996   :  { %1564 = vrot.lane.b32.xlu0 %v5089_v57, %s4843_s24 }
 0x9db   :  { %v1364_v35 = vpop.xlane.xlu2 %1363 }
 0x9dc   :  { %v1365_v36 = vsub.f32 %v1361_v34, %v1364_v35 }
 0x9de   :  { %v1366_v37 = vmul.f32 1.442695, %v1365_v36 }
 0x9e0   :  { %4638 = vpow2.f32 %v1366_v37 }
 0x9e6   :  { %v4639_v40 = vpop.eup %4638 }
 0x9e7   :  { %v1368_v41 = vsel %vm346_vm1, %v4639_v40, 0.0 }
 0x9e8   :  { %1369 = vadd.xlane.f32.xlu1 %v1368_v41 }
 0x9ed   :  { %v1490_v43 = vpop.xlane.xlu0 %1489 }
 0x9ee   :  { %v1491_v45 = vsub.f32 %v1487_v29, %v1490_v43 }
 0x9f0   :  { %v1492_v62 = vmul.f32 1.442695, %v1491_v45  ;;  %1287 = vmax.xlane.f32.xlu1 %v1286_v49  ;;  %v172_v45 = vld [vmem:[%s5234_s29 + $0x10] sm:$0xff]  ;;  %v5265_v49 = vadd.f32 %v5085_v56, %v4984_v28  ;;  %v5276_v28 = vadd.f32 %v5148_v20, %v5014_v47 }
 0x9f2   :  { %4640 = vpow2.f32 %v1492_v62 }
 0x9f8   :  { %v4641_v50 = vpop.eup %4640 }
 0x9f9   :  { %v1494_v51 = vsel %vm346_vm1, %v4641_v50, 0.0 }
 0x9fa   :  { %1495 = vadd.xlane.f32.xlu2 %v1494_v51  ;;  %v1257_v51 = vadd.f32 %v5197_v1, %v5224_v46 }
 0xa00   :  { %v5243_v52 = vpop.permute.xlu0 %1387 }
 0xa01   :  { %1408 = vmatpush.msra.mxu3 %v5243_v52 }
 0xa08   :  { %v5246_v54 = vpop.permute.xlu0 %1564 }
 0xa09   :  { %4445 = vmatpush.xpose.msk.msrb.mxu1 %vm346_vm1, %v5246_v54 }
 0xa12   :  { %1512 = vrot.lane.b32.xlu2 %v5153_v31, %s4840_s17 }
 0xa5b   :  { %v1370_v55 = vpop.xlane.xlu1 %1369 }
 0xa5c   :  { %4642 = vrcp.f32 %v1370_v55  ;;  %v1382_v39 = vand.u32 2147483648, %v1370_v55  ;;  %v1380_v48 = vand.u32 2147483647, %v1370_v55  ;;  %vm1376_vm14 = vweird.f32 %v1370_v55 }
 0xa5e   :  { %v1383_v27 = vor.u32 1.1754944e-38, %v1382_v39  ;;  %vm1381_vm2 = vcmp.eq.f32.partialorder %v1380_v48, 8.507059e+37 }
 0xa62   :  { %v4643_v58 = vpop.eup %4642 }
 0xa63   :  { %v1372_v59 = vmul.f32 %v4643_v58, %v1370_v55  ;;  %v1288_v25 = vpop.xlane.xlu1 %1287  ;;  %vm1377_vm13 = vweird.f32 %v4643_v58 }
 0xa64   :  { %v1289_v61 = vsub.f32 %v1285_v42, %v1288_v25  ;;  %vm1378_vm15 = vmor %vm1376_vm14, %vm1377_vm13 }
 0xa65   :  { %v1373_v24 = vsub.f32 1.0, %v1372_v59 }
 0xa66   :  { %v1290_v0 = vmul.f32 1.442695, %v1289_v61 }
 0xa67   :  { %v1374_v2 = vmul.f32 %v4643_v58, %v1373_v24 }
 0xa68   :  { %4644 = vpow2.f32 %v1290_v0 }
 0xa69   :  { %v1375_v23 = vadd.f32 %v4643_v58, %v1374_v2 }
 0xa6b   :  { %v1379_v4 = vsel %vm1378_vm15, %v4643_v58, %v1375_v23 }
 0xa6c   :  { %v1384_v6 = vsel %vm1381_vm2, %v1383_v27, %v1379_v4 }
 0xa6d   :  { %v1496_v7 = vpop.xlane.xlu2 %1495  ;;  %v1385_v8 = vmul.f32 %v4639_v40, %v1384_v6 }
 0xa6e   :  { %v4645_v9 = vpop.eup %4644  ;;  %4646 = vrcp.f32 %v1496_v7  ;;  %v1508_v16 = vand.u32 2147483648, %v1496_v7  ;;  %v1506_v18 = vand.u32 2147483647, %v1496_v7  ;;  %vm1502_vm4 = vweird.f32 %v1496_v7 }
 0xa6f   :  { %4438 = vmatmul.msk.f32.vlgmr.msra.gmra.mxu3 %vm346_vm1, %v1385_v8  ;;  %v1292_v10 = vsel %vm346_vm1, %v4645_v9, 0.0 }
 0xa70   :  { %1293 = vadd.xlane.f32.xlu1 %v1292_v10  ;;  %v1509_v21 = vor.u32 1.1754944e-38, %v1508_v16  ;;  %vm1507_vm6 = vcmp.eq.f32.partialorder %v1506_v18, 8.507059e+37 }
 0xa74   :  { %v4647_v11 = vpop.eup %4646 }
 0xa75   :  { %v1498_v13 = vmul.f32 %v4647_v11, %v1496_v7  ;;  %v5254_v14 = vpop.permute.xlu2 %1512  ;;  %vm1503_vm3 = vweird.f32 %v4647_v11 }
 0xa76   :  { %1533 = vmatpush.msrb.mxu3 %v5254_v14  ;;  %vm1504_vm5 = vmor %vm1502_vm4, %vm1503_vm3 }
 0xa77   :  { %v1499_v15 = vsub.f32 1.0, %v1498_v13 }
 0xa79   :  { %v1500_v17 = vmul.f32 %v4647_v11, %v1499_v15 }
 0xa7b   :  { %v1501_v19 = vadd.f32 %v4647_v11, %v1500_v17 }
 0xa7d   :  { %v1505_v26 = vsel %vm1504_vm5, %v4647_v11, %v1501_v19 }
 0xa7e   :  { %v1510_v30 = vsel %vm1507_vm6, %v1509_v21, %v1505_v26 }
 0xa7f   :  { %v1511_v34 = vmul.f32 %v4641_v50, %v1510_v30 }
 0xa81   :  { %4443 = vmatmul.msk.f32.vlgmr.msrb.gmra.mxu3 %vm346_vm1, %v1511_v34 }
 0xa89   :  { %1562 = vrot.lane.b32.xlu1 %v5200_v3, %s4843_s24 }
 0xae3   :  { %v1294_v63 = vpop.xlane.xlu1 %1293 }
 0xae4   :  { %4648 = vrcp.f32 %v1294_v63  ;;  %v1306_v36 = vand.u32 2147483648, %v1294_v63  ;;  %v1304_v40 = vand.u32 2147483647, %v1294_v63  ;;  %vm1300_vm8 = vweird.f32 %v1294_v63 }
 0xae6   :  { %v1307_v12 = vor.u32 1.1754944e-38, %v1306_v36  ;;  %vm1305_vm10 = vcmp.eq.f32.partialorder %v1304_v40, 8.507059e+37 }
 0xaea   :  { %v4649_v29 = vpop.eup %4648 }
 0xaeb   :  { %v1296_v32 = vmul.f32 %v4649_v29, %v1294_v63  ;;  %vm1301_vm7 = vweird.f32 %v4649_v29 }
 0xaec   :  { %vm1302_vm9 = vmor %vm1300_vm8, %vm1301_vm7 }
 0xaed   :  { %v1297_v35 = vsub.f32 1.0, %v1296_v32 }
 0xaef   :  { %v1298_v37 = vmul.f32 %v4649_v29, %v1297_v35 }
 0xaf1   :  { %v1299_v41 = vadd.f32 %v4649_v29, %v1298_v37 }
 0xaf2   :  { %v1410_v62 = vpop.f32.mrf.mxu3 }
 0xaf3   :  { %v1303_v42 = vsel %vm1302_vm9, %v4649_v29, %v1299_v41 }
 0xaf4   :  { %v1308_v43 = vsel %vm1305_vm10, %v1307_v12, %v1303_v42 }
 0xaf5   :  { %v1309_v3 = vmul.f32 %v4645_v9, %v1308_v43 }
 0xaf7   :  { %4435 = vmatmul.msk.f32.vlgmr.msra.gmra.mxu0 %vm346_vm1, %v1309_v3 }
 0xaf8   :  { %1556 = vmatpush.msra.mxu0 %v172_v45 }
 0xafb   :  { %v1563_v55 = vpop.permute.xlu1 %1562 }
 0xaff   :  { %4439 = vmatmul.msk.f32.vlgmr.msrb.gmra.mxu0 %vm346_vm1, %v1410_v62 }
 0xb00   :  { %4449 = vmatpush.xpose.msk.msrb.mxu0 %vm346_vm1, %v5265_v49 }
 0xb04   :  { %v1535_v50 = vpop.f32.mrf.mxu3 }
 0xb07   :  { %4444 = vmatmul.msk.f32.vlgmr.msra.gmra.mxu0 %vm346_vm1, %v1535_v50 }
 0xb08   :  { %1837 = vmatpush.msra.mxu0 %v171_v33 }
 0xb0f   :  { %4450 = vmatmul.msk.f32.vlgmr.msrb.gmra.mxu0 %vm346_vm1, %v1257_v51 }
 0xb10   :  { %1962 = vmatpush.msrb.mxu0 %v172_v45 }
 0xb74   :  { %v1330_v56 = vpop.f32.mrf.mxu0 }
 0xb75   :  { %4440 = vmatmul.msk.f32.vlgmr.msra.gmra.mxu1 %vm346_vm1, %v1330_v56 }
 0xb76   :  { %1734 = vmatpush.msra.mxu1 %v5276_v28 }
 0xb7c   :  { %v5280_v58 = vpop.f32.mrf.mxu0 }
 0xb7d   :  { %4446 = vmatmul.msk.f32.vlgmr.msrb.gmra.mxu1 %vm346_vm1, %v1563_v55  ;;  %v5325_v55 = vld [vmem:[%s5234_s29 + $0x18] sm:$0xff] }
 0xb7e   :  { %1860 = vmatpush.msrb.mxu1 %v5237_v38  ;;  %1659 = vmatpush.msra.mxu3 %v5325_v55 }
 0xb84   :  { %v5284_v1 = vpop.f32.mrf.mxu0 }
 0xb8c   :  { %v1688_v46 = vpop.f32.mrf.mxu0 }
 0xb8d   :  { %v1691_v59 = vmul.f32 0.35355338, %v1688_v46 }
 0xb8f   :  { %v1692_v25 = vsel %vm346_vm1, %v1691_v59, -inf }
 0xb90   :  { %1693 = vmax.xlane.f32.xlu2 %v1692_v25 }
 0xbf2   :  { %v5287_v47 = vpop.f32.mrf.mxu1 }
 0xbfa   :  { %v1587_v20 = vpop.f32.mrf.mxu1 }
 0xbfb   :  { %v1590_v61 = vmul.f32 0.35355338, %v1587_v20 }
 0xbfd   :  { %v1591_v24 = vsel %vm346_vm1, %v1590_v61, -inf }
 0xbfe   :  { %1592 = vmax.xlane.f32.xlu1 %v1591_v24 }
 0xc03   :  { %v1694_v39 = vpop.xlane.xlu2 %1693 }
 0xc04   :  { %v1695_v0 = vsub.f32 %v1691_v59, %v1694_v39 }
 0xc06   :  { %v1696_v2 = vmul.f32 1.442695, %v1695_v0 }
 0xc08   :  { %4650 = vpow2.f32 %v1696_v2 }
 0xc0e   :  { %v4651_v48 = vpop.eup %4650 }
 0xc0f   :  { %v1698_v38 = vsel %vm346_vm1, %v4651_v48, 0.0 }
 0xc10   :  { %1699 = vadd.xlane.f32.xlu0 %v1698_v38 }
 0xc17   :  { %1739 = vrot.lane.b32.xlu1 %v1257_v51, %s4841_s19 }
 0xc24   :  { %1615 = vrot.lane.b32.xlu0 %v5153_v31, %s4843_s24 }
 0xc2c   :  { %1867 = vrot.lane.b32.xlu0 %v5265_v49, %s4840_s17 }
 0xc34   :  { %1970 = vrot.lane.b32.xlu0 %v5265_v49, %s4843_s24 }
 0xc3c   :  { %1968 = vrot.lane.b32.xlu0 %v1257_v51, %s4843_s24 }
 0xc71   :  { %v1593_v23 = vpop.xlane.xlu1 %1592 }
 0xc72   :  { %v1594_v27 = vsub.f32 %v1590_v61, %v1593_v23 }
 0xc74   :  { %v1595_v4 = vmul.f32 1.442695, %v1594_v27 }
 0xc76   :  { %4652 = vpow2.f32 %v1595_v4 }
 0xc7c   :  { %v4653_v6 = vpop.eup %4652 }
 0xc7d   :  { %v1597_v7 = vsel %vm346_vm1, %v4653_v6, 0.0 }
 0xc7e   :  { %1598 = vadd.xlane.f32.xlu2 %v1597_v7 }
 0xc83   :  { %v1700_v8 = vpop.xlane.xlu0 %1699 }
 0xc84   :  { %4654 = vrcp.f32 %v1700_v8  ;;  %v1712_v13 = vand.u32 2147483648, %v1700_v8  ;;  %v1710_v16 = vand.u32 2147483647, %v1700_v8  ;;  %vm1706_vm12 = vweird.f32 %v1700_v8 }
 0xc86   :  { %v1713_v18 = vor.u32 1.1754944e-38, %v1712_v13  ;;  %vm1711_vm14 = vcmp.eq.f32.partialorder %v1710_v16, 8.507059e+37 }
 0xc89   :  { %v1740_v62 = vpop.permute.xlu1 %1739 }
 0xc8a   :  { %v4655_v9 = vpop.eup %4654 }
 0xc8b   :  { %v1702_v10 = vmul.f32 %v4655_v9, %v1700_v8  ;;  %vm1707_vm11 = vweird.f32 %v4655_v9 }
 0xc8c   :  { %vm1708_vm13 = vmor %vm1706_vm12, %vm1707_vm11 }
 0xc8d   :  { %v1703_v11 = vsub.f32 1.0, %v1702_v10 }
 0xc8f   :  { %v1704_v15 = vmul.f32 %v4655_v9, %v1703_v11 }
 0xc91   :  { %v1705_v17 = vadd.f32 %v4655_v9, %v1704_v15 }
 0xc93   :  { %v1709_v19 = vsel %vm1708_vm13, %v4655_v9, %v1705_v17 }
 0xc94   :  { %v1714_v21 = vsel %vm1711_vm14, %v1713_v18, %v1709_v19 }
 0xc95   :  { %v1715_v26 = vmul.f32 %v4651_v48, %v1714_v21  ;;  %v1457_v21 = vadd.f32 %v5287_v47, %v5280_v58 }
 0xc96   :  { %1741 = vrot.lane.b32.xlu2 %v5265_v49, %s4841_s19  ;;  %v5302_v30 = vpop.permute.xlu0 %1615 }
 0xc97   :  { %1636 = vmatpush.msra.mxu2 %v5302_v30  ;;  %4451 = vmatmul.msk.f32.vlgmr.msra.gmra.mxu1 %vm346_vm1, %v1715_v26 }
 0xc9e   :  { %1865 = vrot.lane.b32.xlu2 %v1257_v51, %s4840_s17  ;;  %v5307_v34 = vpop.permute.xlu0 %1867 }
 0xca6   :  { %v5309_v33 = vpop.permute.xlu0 %1970 }
 0xca7   :  { %4461 = vmatpush.xpose.msk.msra.mxu1 %vm346_vm1, %v5309_v33 }
 0xcae   :  { %v1969_v56 = vpop.permute.xlu0 %1968 }
 0xcf1   :  { %v1599_v63 = vpop.xlane.xlu2 %1598 }
 0xcf2   :  { %4656 = vrcp.f32 %v1599_v63  ;;  %v1611_v37 = vand.u32 2147483648, %v1599_v63  ;;  %v1609_v41 = vand.u32 2147483647, %v1599_v63  ;;  %vm1605_vm2 = vweird.f32 %v1599_v63 }
 0xcf4   :  { %v1612_v42 = vor.u32 1.1754944e-38, %v1611_v37  ;;  %vm1610_vm4 = vcmp.eq.f32.partialorder %v1609_v41, 8.507059e+37 }
 0xcf8   :  { %v4657_v29 = vpop.eup %4656 }
 0xcf9   :  { %v1601_v32 = vmul.f32 %v4657_v29, %v1599_v63  ;;  %v5313_v35 = vpop.permute.xlu2 %1741  ;;  %vm1606_vm15 = vweird.f32 %v4657_v29  ;;  %v1561_v63 = vadd.f32 %v5284_v1, %v1457_v21  ;;  %v4772_v21 = vld [vmem:[%s4883_s14 + $0x18] sm:$0xff] }
 0xcfa   :  { %4452 = vmatpush.xpose.msk.msrb.mxu2 %vm346_vm1, %v5313_v35  ;;  %vm1607_vm3 = vmor %vm1605_vm2, %vm1606_vm15 }
 0xcfb   :  { %v1602_v36 = vsub.f32 1.0, %v1601_v32  ;;  %v5358_v32 = vld [vmem:[%s5331_s10] ss:$0 sm:$0xff] }
 0xcfd   :  { %v1603_v40 = vmul.f32 %v4657_v29, %v1602_v36 }
 0xcff   :  { %v1604_v12 = vadd.f32 %v4657_v29, %v1603_v40 }
 0xd01   :  { %v1608_v43 = vsel %vm1607_vm3, %v4657_v29, %v1604_v12  ;;  %v1866_v50 = vpop.permute.xlu2 %1865 }
 0xd02   :  { %v1613_v3 = vsel %vm1610_vm4, %v1612_v42, %v1608_v43 }
 0xd03   :  { %v1614_v45 = vmul.f32 %v4653_v6, %v1613_v3 }
 0xd05   :  { %4447 = vmatmul.msk.f32.vlgmr.msra.gmra.mxu2 %vm346_vm1, %v1614_v45 }
 0xd06   :  { %4457 = vmatpush.xpose.msk.msra.mxu2 %vm346_vm1, %v5307_v34 }
 0xd0d   :  { %4453 = vmatmul.msk.f32.vlgmr.msrb.gmra.mxu2 %vm346_vm1, %v1740_v62 }
 0xd14   :  { %v1736_v51 = vpop.f32.mrf.mxu1 }
 0xd15   :  { %4456 = vmatmul.msk.f32.vlgmr.msrb.gmra.mxu1 %vm346_vm1, %v1736_v51  ;;  %4458 = vmatmul.msk.f32.vlgmr.msra.gmra.mxu2 %vm346_vm1, %v1866_v50 }
 0xd1d   :  { %4462 = vmatmul.msk.f32.vlgmr.msra.gmra.mxu1 %vm346_vm1, %v1969_v56 }
 0xd88   :  { %v1638_v46 = vpop.f32.mrf.mxu2 }
 0xd89   :  { %4448 = vmatmul.msk.f32.vlgmr.msra.gmra.mxu3 %vm346_vm1, %v1638_v46 }
 0xd90   :  { %v1764_v59 = vpop.f32.mrf.mxu2 }
 0xd91   :  { %v1767_v25 = vmul.f32 0.35355338, %v1764_v59 }
 0xd92   :  { %v5334_v20 = vpop.f32.mrf.mxu1 }
 0xd93   :  { %v1768_v61 = vsel %vm346_vm1, %v1767_v25, -inf }
 0xd94   :  { %1769 = vmax.xlane.f32.xlu2 %v1768_v61 }
 0xd98   :  { %v1890_v24 = vpop.f32.mrf.mxu2 }
 0xd99   :  { %v1893_v39 = vmul.f32 0.35355338, %v1890_v24 }
 0xd9a   :  { %v1993_v0 = vpop.f32.mrf.mxu1 }
 0xd9b   :  { %v1996_v2 = vmul.f32 0.35355338, %v1993_v0  ;;  %v1894_v48 = vsel %vm346_vm1, %v1893_v39, -inf }
 0xd9c   :  { %1895 = vmax.xlane.f32.xlu0 %v1894_v48 }
 0xd9d   :  { %v1997_v38 = vsel %vm346_vm1, %v1996_v2, -inf }
 0xd9e   :  { %1998 = vmax.xlane.f32.xlu1 %v1997_v38 }
 0xe07   :  { %v1770_v23 = vpop.xlane.xlu2 %1769 }
 0xe08   :  { %v1771_v27 = vsub.f32 %v1767_v25, %v1770_v23 }
 0xe0a   :  { %v1772_v4 = vmul.f32 1.442695, %v1771_v27 }
 0xe0c   :  { %4658 = vpow2.f32 %v1772_v4  ;;  %v1661_v26 = vpop.f32.mrf.mxu3 }
 0xe0d   :  { %v1664_v29 = vadd.f32 %v1661_v26, %v1561_v63 }
 0xe0f   :  { %v1896_v6 = vpop.xlane.xlu0 %1895  ;;  %v2074_v36 = vadd.f32 %v5358_v32, %v1664_v29  ;;  %v4774_v29 = vld [vmem:[%s4883_s14 + $0x8] sm:$0xff] }
 0xe10   :  { %v1897_v7 = vsub.f32 %v1893_v39, %v1896_v6 }
 0xe11   :  { %v1999_v8 = vpop.xlane.xlu1 %1998  ;;  %v5362_v37 = vadd.f32 %v2074_v36, %v5188_v53  ;;  %v4775_v36 = vld [vmem:[%s4888_s18 + $0x18] sm:$0xff] }
 0xe12   :  { %v4659_v9 = vpop.eup %4658  ;;  %v1898_v10 = vmul.f32 1.442695, %v1897_v7  ;;  %v2000_v11 = vsub.f32 %v1996_v2, %v1999_v8 }
 0xe13   :  { %v1774_v13 = vsel %vm346_vm1, %v4659_v9, 0.0  ;;  %v2078_v40 = vsel %vm206_vm0, %v5362_v37, 0.0 }
 0xe14   :  { %4660 = vpow2.f32 %v1898_v10  ;;  %v2001_v15 = vmul.f32 1.442695, %v2000_v11  ;;  %1775 = vadd.xlane.f32.xlu2 %v1774_v13 }
 0xe16   :  { %4662 = vpow2.f32 %v2001_v15 }
 0xe1a   :  { %v5340_v16 = vpop.eup %4660 }
 0xe1b   :  { %v1900_v17 = vsel %vm346_vm1, %v5340_v16, 0.0 }
 0xe1c   :  { %v5344_v18 = vpop.eup %4662  ;;  %1901 = vadd.xlane.f32.xlu0 %v1900_v17 }
 0xe1d   :  { %v2003_v19 = vsel %vm346_vm1, %v5344_v18, 0.0 }
 0xe1e   :  { %2004 = vadd.xlane.f32.xlu1 %v2003_v19 }
 0xe2c   :  { %1793 = vrot.lane.b32.xlu2 %v5276_v28, %s4841_s19 }
 0xe30   :  { %1918 = vrot.lane.b32.xlu0 %v5276_v28, %s4840_s17 }
 0xe37   :  { %2021 = vrot.lane.b32.xlu1 %v5276_v28, %s4843_s24 }
 0xe55   :  { %2079 = vadd.xlane.f32.xlu2 %v2078_v40  ;;  %v4777_v40 = vld [vmem:[%s4888_s18 + $0x10] sm:$0xff] }
 0xe87   :  { %v1776_v41 = vpop.xlane.xlu2 %1775 }
 0xe88   :  { %4664 = vrcp.f32 %v1776_v41  ;;  %v1788_v3 = vand.u32 2147483648, %v1776_v41  ;;  %v1786_v45 = vand.u32 2147483647, %v1776_v41  ;;  %vm1782_vm6 = vweird.f32 %v1776_v41 }
 0xe8a   :  { %v1789_v51 = vor.u32 1.1754944e-38, %v1788_v3  ;;  %vm1787_vm8 = vcmp.eq.f32.partialorder %v1786_v45, 8.507059e+37 }
 0xe8e   :  { %v4665_v12 = vpop.eup %4664 }
 0xe8f   :  { %v1778_v42 = vmul.f32 %v4665_v12, %v1776_v41  ;;  %v5366_v58 = vpop.permute.xlu2 %1793  ;;  %v1902_v47 = vpop.xlane.xlu0 %1901  ;;  %vm1783_vm5 = vweird.f32 %v4665_v12  ;;  %v4778_v41 = vld [vmem:[%s4888_s18 + $0x8] sm:$0xff] }
 0xe90   :  { %4666 = vrcp.f32 %v1902_v47  ;;  %1814 = vmatpush.msrb.mxu3 %v5366_v58  ;;  %vm1784_vm7 = vmor %vm1782_vm6, %vm1783_vm5  ;;  %v1914_v0 = vand.u32 2147483648, %v1902_v47  ;;  %v1912_v48 = vand.u32 2147483647, %v1902_v47  ;;  %vm1908_vm10 = vweird.f32 %v1902_v47 }
 0xe91   :  { %v1779_v1 = vsub.f32 1.0, %v1778_v42  ;;  %v2005_v43 = vpop.xlane.xlu1 %2004 }
 0xe92   :  { %4668 = vrcp.f32 %v2005_v43  ;;  %v1915_v4 = vor.u32 1.1754944e-38, %v1914_v0  ;;  %vm1913_vm12 = vcmp.eq.f32.partialorder %v1912_v48, 8.507059e+37  ;;  %vm2011_vm14 = vweird.f32 %v2005_v43 }
 0xe93   :  { %v1780_v53 = vmul.f32 %v4665_v12, %v1779_v1  ;;  %v2015_v10 = vand.u32 2147483647, %v2005_v43 }
 0xe95   :  { %v1781_v62 = vadd.f32 %v4665_v12, %v1780_v53  ;;  %vm2016_vm2 = vcmp.eq.f32.partialorder %v2015_v10, 8.507059e+37 }
 0xe96   :  { %v4667_v50 = vpop.eup %4666 }
 0xe97   :  { %v1785_v56 = vsel %vm1784_vm7, %v4665_v12, %v1781_v62  ;;  %v1904_v46 = vmul.f32 %v4667_v50, %v1902_v47  ;;  %vm1909_vm9 = vweird.f32 %v4667_v50 }
 0xe98   :  { %v4669_v59 = vpop.eup %4668  ;;  %v1790_v25 = vsel %vm1787_vm8, %v1789_v51, %v1785_v56  ;;  %vm1910_vm11 = vmor %vm1908_vm10, %vm1909_vm9  ;;  %v4780_v56 = vld [vmem:[%s4948_s16 + $0x18] sm:$0xff] }
 0xe99   :  { %v1905_v61 = vsub.f32 1.0, %v1904_v46  ;;  %v2007_v24 = vmul.f32 %v4669_v59, %v2005_v43  ;;  %v1791_v39 = vmul.f32 %v4659_v9, %v1790_v25  ;;  %vm2012_vm13 = vweird.f32 %v4669_v59 }
 0xe9a   :  { %v2017_v9 = vand.u32 2147483648, %v2005_v43  ;;  %vm2013_vm15 = vmor %vm2011_vm14, %vm2012_vm13 }
 0xe9b   :  { %v1906_v2 = vmul.f32 %v4667_v50, %v1905_v61  ;;  %v2008_v38 = vsub.f32 1.0, %v2007_v24  ;;  %4454 = vmatmul.msk.f32.vlgmr.msrb.gmra.mxu3 %vm346_vm1, %v1791_v39  ;;  %v4782_v61 = vld [vmem:[%s4948_s16 + $0x8] sm:$0xff]  ;;  %v4783_v39 = vld [vmem:[%s4948_s16] sm:$0xff] }
 0xe9c   :  { %v2018_v17 = vor.u32 1.1754944e-38, %v2017_v9 }
 0xe9d   :  { %v1907_v23 = vadd.f32 %v4667_v50, %v1906_v2  ;;  %v2009_v27 = vmul.f32 %v4669_v59, %v2008_v38 }
 0xe9f   :  { %v1911_v6 = vsel %vm1910_vm11, %v4667_v50, %v1907_v23  ;;  %v2010_v7 = vadd.f32 %v4669_v59, %v2009_v27 }
 0xea0   :  { %v1916_v8 = vsel %vm1913_vm12, %v1915_v4, %v1911_v6  ;;  %v5425_v4 = vld [vmem:[%s5390_s20] ss:$0 sm:$0xff] }
 0xea1   :  { %v1917_v11 = vmul.f32 %v5340_v16, %v1916_v8  ;;  %v2014_v15 = vsel %vm2013_vm15, %v4669_v59, %v2010_v7  ;;  %v4773_v16 = vld [vmem:[%s4883_s14 + $0x10] sm:$0xff] }
 0xea2   :  { %v5371_v13 = vpop.permute.xlu0 %1918  ;;  %v2019_v19 = vsel %vm2016_vm2, %v2018_v17, %v2014_v15  ;;  %v4781_v59 = vld [vmem:[%s4948_s16 + $0x10] sm:$0xff]  ;;  %s4857_s16 = smov 27  }
 0xea3   :  { %1939 = vmatpush.msra.mxu3 %v5371_v13  ;;  %v2020_v63 = vmul.f32 %v5344_v18, %v2019_v19  ;;  %v4779_v18 = vld [vmem:[%s4888_s18] sm:$0xff]  ;;  %s4855_s18 = smov 24  }
 0xea4   :  { %4459 = vmatmul.msk.f32.vlgmr.msra.gmra.mxu3 %vm346_vm1, %v1917_v11  ;;  %s5408_s2 = sld [smem:[%s5947_s0 + %s4855_s18]]   ;;  %v5437_v11 = vld [vmem:[%s5031_s28 + $0x8] sm:$0xff] }
 0xea5   :  { %2065 = vmatpush.msrb.mxu3 %v5325_v55  ;;  %v4776_v55 = vld [vmem:[%s4883_s14] sm:$0xff]  ;;  %s4854_s14 = smov 21  }
 0xea6   :  { %s5400_s26 = sld [smem:[%s5947_s0 + %s4854_s14]]  }
 0xea7   :  { %2367 = vmatpush.msra.mxu3 %v4772_v21  ;;  %s5445_s14 = sld [smem:[%s5947_s0 + %s4857_s16]]   ;;  %s4861_s16 = smov 23  }
 0xea8   :  { %s5516_s22 = sld [smem:[%s5947_s0 + %s4861_s16]]  }
 0xea9   :  { %2368 = vmatpush.msra.mxu3 %v4773_v16  ;;  %v5378_v26 = vpop.permute.xlu1 %2021 }
 0xeaa   :  { %2042 = vmatpush.msrb.mxu2 %v5378_v26  ;;  %v183_v62 = vld [vmem:[%s5408_s2 + $0x10] sm:$0xff]  ;;  %v182_v50 = vld [vmem:[%s5408_s2 + $0x8] sm:$0xff]  ;;  %v181_v51 = vld [vmem:[%s5408_s2] sm:$0xff] }
 0xeab   :  { %2369 = vmatpush.msra.mxu3 %v4774_v29  ;;  %4463 = vmatmul.msk.f32.vlgmr.msrb.gmra.mxu2 %vm346_vm1, %v2020_v63 }
 0xeac   :  { %2344 = vmatpush.msra.mxu2 %v4775_v36  ;;  %v5428_v8 = vld [vmem:[%s5400_s26] ss:$0 sm:$0xff] }
 0xead   :  { %2370 = vmatpush.msra.mxu3 %v4776_v55 }
 0xeae   :  { %2345 = vmatpush.msra.mxu2 %v4777_v40  ;;  %v199_v40 = vld [vmem:[%s5455_s30 + $0x68] sm:$0xff] }
 0xeb0   :  { %2346 = vmatpush.msra.mxu2 %v4778_v41  ;;  %v198_v41 = vld [vmem:[%s5455_s30 + $0x60] sm:$0xff] }
 0xeb2   :  { %2347 = vmatpush.msra.mxu2 %v4779_v18 }
 0xec8   :  { %v2080_v12 = vpop.xlane.xlu2 %2079 }
 0xec9   :  { %v2084_v42 = vmul.f32 %v2080_v12, %v5142_v60 }
 0xecb   :  { %v2086_v47 = vsub.f32 %v5362_v37, %v2084_v42  ;;  %v184_v37 = vld [vmem:[%s5408_s2 + $0x18] sm:$0xff] }
 0xecc   :  { %v197_v42 = vld [vmem:[%s5455_s30 + $0x58] sm:$0xff] }
 0xecd   :  { %v2088_v1 = vmul.f32 %v2086_v47, %v2086_v47 }
 0xecf   :  { %v2090_v43 = vsel %vm206_vm0, %v2088_v1, 0.0  ;;  %v196_v1 = vld [vmem:[%s5455_s30 + $0x50] sm:$0xff] }
 0xed0   :  { %2091 = vadd.xlane.f32.xlu0 %v2090_v43 }
 0xf1e   :  { %v1816_v3 = vpop.f32.mrf.mxu3 }
 0xf1f   :  { %4455 = vmatmul.msk.f32.vlgmr.msra.gmra.mxu0 %vm346_vm1, %v1816_v3  ;;  %v195_v3 = vld [vmem:[%s5455_s30 + $0x48] sm:$0xff] }
 0xf20   :  { %2153 = vmatpush.msra.mxu0 %v184_v37 }
 0xf22   :  { %2154 = vmatpush.msra.mxu0 %v183_v62  ;;  %v193_v62 = vld [vmem:[%s5455_s30 + $0x38] sm:$0xff] }
 0xf24   :  { %2155 = vmatpush.msra.mxu0 %v182_v50  ;;  %v192_v50 = vld [vmem:[%s5455_s30 + $0x30] sm:$0xff] }
 0xf26   :  { %2156 = vmatpush.msra.mxu0 %v181_v51  ;;  %v191_v51 = vld [vmem:[%s5455_s30 + $0x28] sm:$0xff] }
 0xf27   :  { %v1941_v53 = vpop.f32.mrf.mxu3 }
 0xf28   :  { %4460 = vmatmul.msk.f32.vlgmr.msrb.gmra.mxu0 %vm346_vm1, %v1941_v53 }
 0xf29   :  { %2390 = vmatpush.msrb.mxu0 %v4780_v56  ;;  %v190_v56 = vld [vmem:[%s5455_s30 + $0x20] sm:$0xff] }
 0xf2b   :  { %2391 = vmatpush.msrb.mxu0 %v4781_v59  ;;  %v189_v59 = vld [vmem:[%s5455_s30 + $0x18] sm:$0xff] }
 0xf2d   :  { %2392 = vmatpush.msrb.mxu0 %v4782_v61  ;;  %v188_v61 = vld [vmem:[%s5455_s30 + $0x10] sm:$0xff] }
 0xf2e   :  { %v2044_v45 = vpop.f32.mrf.mxu2 }
 0xf2f   :  { %4464 = vmatmul.msk.f32.vlgmr.msrb.gmra.mxu3 %vm346_vm1, %v2044_v45  ;;  %2393 = vmatpush.msrb.mxu0 %v4783_v39  ;;  %v194_v45 = vld [vmem:[%s5455_s30 + $0x40] sm:$0xff] }
 0xf43   :  { %v2092_v46 = vpop.xlane.xlu0 %2091 }
 0xf44   :  { %v2096_v25 = vmul.f32 %v2092_v46, %v5142_v60 }
 0xf46   :  { %v2098_v24 = vadd.f32 1e-05, %v2096_v25 }
 0xf48   :  { %4670 = vrsqrt.f32 %v2098_v24  ;;  %vm2106_vm4 = vweird.f32 %v2098_v24 }
 0xf4e   :  { %v4671_v0 = vpop.eup %4670 }
 0xf4f   :  { %v2101_v2 = vmul.f32 %v4671_v0, %v2098_v24  ;;  %vm2107_vm3 = vweird.f32 %v4671_v0 }
 0xf50   :  { %vm2108_vm5 = vmor %vm2106_vm4, %vm2107_vm3 }
 0xf51   :  { %v2102_v48 = vmul.f32 %v4671_v0, %v2101_v2 }
 0xf53   :  { %v2103_v38 = vmul.f32 0.5, %v2102_v48 }
 0xf55   :  { %v2104_v23 = vsub.f32 1.5, %v2103_v38  ;;  %v186_v38 = vld [vmem:[%s5455_s30] sm:$0xff] }
 0xf57   :  { %v2105_v27 = vmul.f32 %v4671_v0, %v2104_v23 }
 0xf59   :  { %v2109_v6 = vsel %vm2108_vm5, %v4671_v0, %v2105_v27  ;;  %v187_v0 = vld [vmem:[%s5455_s30 + $0x8] sm:$0xff] }
 0xf5a   :  { %v2120_v7 = vmul.f32 %v2109_v6, %v2086_v47  ;;  %v5481_v6 = vld [vmem:[%s5031_s28 + $0x10] sm:$0xff] }
 0xf5c   :  { %v2125_v9 = vmul.f32 %v5425_v4, %v2120_v7 }
 0xf5e   :  { %v5432_v10 = vadd.f32 %v5428_v8, %v2125_v9 }
 0xf60   :  { %4465 = vmatmul.msk.f32.vlgmr.msra.gmra.mxu0 %vm206_vm0, %v5432_v10 }
 0xf61   :  { %2573 = vmatpush.msra.mxu0 %v5437_v11 }
 0xf9c   :  { %v1839_v15 = vpop.f32.mrf.mxu0 }
 0xf9d   :  { %v1863_v19 = vadd.f32 %v5334_v20, %v1839_v15  ;;  %v201_v20 = vld [vmem:[%s5455_s30 + $0x78] sm:$0xff] }
 0xf9e   :  { %2247 = vmatpush.msrb.mxu1 %v201_v20 }
 0xfa5   :  { %v1964_v17 = vpop.f32.mrf.mxu0 }
 0xfa6   :  { %v1967_v21 = vadd.f32 %v1964_v17, %v1863_v19 }
 0xfb2   :  { %v2067_v16 = vpop.f32.mrf.mxu3 }
 0xfb3   :  { %v2070_v63 = vadd.f32 %v2067_v16, %v1967_v21 }
 0xfb5   :  { %v2075_v29 = vadd.f32 %v5358_v32, %v2070_v63  ;;  %v5460_v32 = vld [vmem:[%s5415_s11] ss:$0 sm:$0xff] }
 0xfb7   :  { %v5448_v36 = vadd.f32 %v2075_v29, %v5218_v22  ;;  %v200_v22 = vld [vmem:[%s5455_s30 + $0x70] sm:$0xff] }
 0xfb8   :  { %2248 = vmatpush.msrb.mxu1 %v200_v22 }
 0xfb9   :  { %v2081_v55 = vsel %vm206_vm0, %v5448_v36, 0.0 }
 0xfba   :  { %2082 = vadd.xlane.f32.xlu1 %v2081_v55  ;;  %2249 = vmatpush.msrb.mxu1 %v199_v40 }
 0xfbc   :  { %2250 = vmatpush.msrb.mxu1 %v198_v41 }
 0xfbe   :  { %2251 = vmatpush.msrb.mxu1 %v197_v42 }
 0xfc0   :  { %2252 = vmatpush.msrb.mxu1 %v196_v1 }
 0xfc2   :  { %2253 = vmatpush.msrb.mxu1 %v195_v3  ;;  %v4859_v3 = vmov -1.0  }
 0xfc4   :  { %2254 = vmatpush.msrb.mxu1 %v194_v45 }
 0xfc6   :  { %2255 = vmatpush.msrb.mxu1 %v193_v62 }
 0xfc8   :  { %2256 = vmatpush.msrb.mxu1 %v192_v50 }
 0xfca   :  { %2257 = vmatpush.msrb.mxu1 %v191_v51 }
 0xfcc   :  { %2258 = vmatpush.msrb.mxu1 %v190_v56 }
 0xfce   :  { %2259 = vmatpush.msrb.mxu1 %v189_v59  ;;  %v5490_v59 = vld [vmem:[%s5445_s14] ss:$0 sm:$0xff] }
 0xfd0   :  { %2260 = vmatpush.msrb.mxu1 %v188_v61 }
 0xfd2   :  { %2261 = vmatpush.msrb.mxu1 %v187_v0 }
 0xfd4   :  { %2262 = vmatpush.msrb.mxu1 %v186_v38 }
 0xfd6   :  { %2698 = vmatpush.msra.mxu1 %v5481_v6 }
 0xfdd   :  { %v2158_v18 = vpop.f32.mrf.mxu0 }
 0xfde   :  { %v5465_v12 = vadd.f32 %v5460_v32, %v2158_v18 }
 0xfe0   :  { %v2166_v47 = vmul.f32 0.70710677, %v5465_v12 }
 0xfe2   :  { %v2172_v43 = vand.u32 2147483647, %v2166_v47  ;;  %vm2168_vm10 = vcmp.ge.f32.partialorder %v2166_v47, 0.0 }
 0xfe4   :  { %v2174_v53 = vmul.f32 0.3275911, %v2172_v43  ;;  %v2226_v15 = vsub.f32 0.0, %v2172_v43 }
 0xfe6   :  { %v2176_v37 = vadd.f32 1.0, %v2174_v53  ;;  %v2228_v21 = vmul.f32 %v2226_v15, %v2172_v43  ;;  %v2170_v53 = vsel %vm2168_vm10, 1.0, %v4859_v3  ;;  %v2164_v43 = vmul.f32 0.5, %v5465_v12 }
 0xfe8   :  { %4672 = vrcp.f32 %v2176_v37  ;;  %v2189_v39 = vand.u32 2147483648, %v2176_v37  ;;  %v2187_v48 = vand.u32 2147483647, %v2176_v37  ;;  %vm2183_vm7 = vweird.f32 %v2176_v37 }
 0xfe9   :  { %v2230_v29 = vmul.f32 1.442695, %v2228_v21 }
 0xfea   :  { %v2190_v27 = vor.u32 1.1754944e-38, %v2189_v39  ;;  %vm2188_vm9 = vcmp.eq.f32.partialorder %v2187_v48, 8.507059e+37 }
 0xfeb   :  { %4674 = vpow2.f32 %v2230_v29 }
 0xfee   :  { %v4673_v46 = vpop.eup %4672 }
 0xfef   :  { %v2179_v25 = vmul.f32 %v4673_v46, %v2176_v37  ;;  %vm2184_vm6 = vweird.f32 %v4673_v46 }
 0xff0   :  { %vm2185_vm8 = vmor %vm2183_vm7, %vm2184_vm6 }
 0xff1   :  { %v2180_v24 = vsub.f32 1.0, %v2179_v25  ;;  %v4675_v18 = vpop.eup %4674 }
 0xff3   :  { %v2181_v2 = vmul.f32 %v4673_v46, %v2180_v24 }
 0xff5   :  { %v2182_v23 = vadd.f32 %v4673_v46, %v2181_v2 }
 0xff7   :  { %v2186_v7 = vsel %vm2185_vm8, %v4673_v46, %v2182_v23 }
 0xff8   :  { %v2191_v9 = vsel %vm2188_vm9, %v2190_v27, %v2186_v7 }
 0xff9   :  { %v2208_v17 = vmul.f32 1.0614054, %v2191_v9 }
 0xffb   :  { %v2210_v19 = vadd.f32 -1.4531521, %v2208_v17 }
 0xffd   :  { %v2212_v16 = vmul.f32 %v2210_v19, %v2191_v9 }
 0xfff   :  { %v2214_v63 = vadd.f32 1.4214138, %v2212_v16 }
0x1001   :  { %v2216_v55 = vmul.f32 %v2214_v63, %v2191_v9 }
0x1003   :  { %v2218_v20 = vadd.f32 -0.28449672, %v2216_v55 }
0x1005   :  { %v2220_v22 = vmul.f32 %v2218_v20, %v2191_v9 }
0x1007   :  { %v2222_v40 = vadd.f32 0.2548296, %v2220_v22 }
0x1009   :  { %v2224_v41 = vmul.f32 %v2222_v40, %v2191_v9 }
0x100b   :  { %v2234_v42 = vmul.f32 %v4675_v18, %v2224_v41 }
0x100d   :  { %v2236_v1 = vsub.f32 1.0, %v2234_v42 }
0x100f   :  { %v2238_v45 = vmul.f32 %v2236_v1, %v2170_v53 }
0x1011   :  { %v2240_v37 = vadd.f32 1.0, %v2238_v45 }
0x1013   :  { %v2242_v62 = vmul.f32 %v2240_v37, %v2164_v43 }
0x1015   :  { %2263 = vmatmul.f32.vlgmr.msrb.gmra.mxu1 %v2242_v62 }
0x102d   :  { %v2083_v50 = vpop.xlane.xlu1 %2082 }
0x102e   :  { %v2085_v51 = vmul.f32 %v2083_v50, %v5142_v60 }
0x1030   :  { %v2087_v56 = vsub.f32 %v5448_v36, %v2085_v51 }
0x1032   :  { %v2089_v46 = vmul.f32 %v2087_v56, %v2087_v56 }
0x1034   :  { %v2093_v47 = vsel %vm206_vm0, %v2089_v46, 0.0 }
0x1035   :  { %2094 = vadd.xlane.f32.xlu2 %v2093_v47 }
0x1092   :  { %v2264_v25 = vpop.f32.mrf.mxu1 }
0x1093   :  { %v2265_v61 = vadd.f32 %v5490_v59, %v2264_v25 }
0x1095   :  { %v2270_v24 = vadd.f32 %v2265_v61, %v5432_v10 }
0x1097   :  { %v2272_v12 = vsel %vm206_vm0, %v2270_v24, 0.0 }
0x1098   :  { %2273 = vadd.xlane.f32.xlu0 %v2272_v12 }
0x10a8   :  { %v2095_v39 = vpop.xlane.xlu2 %2094 }
0x10a9   :  { %v2097_v0 = vmul.f32 %v2095_v39, %v5142_v60 }
0x10ab   :  { %v2099_v2 = vadd.f32 1e-05, %v2097_v0 }
0x10ad   :  { %4676 = vrsqrt.f32 %v2099_v2  ;;  %vm2116_vm12 = vweird.f32 %v2099_v2 }
0x10b3   :  { %v4677_v36 = vpop.eup %4676 }
0x10b4   :  { %v2111_v48 = vmul.f32 %v4677_v36, %v2099_v2  ;;  %vm2117_vm11 = vweird.f32 %v4677_v36 }
0x10b5   :  { %vm2118_vm13 = vmor %vm2116_vm12, %vm2117_vm11 }
0x10b6   :  { %v2112_v38 = vmul.f32 %v4677_v36, %v2111_v48 }
0x10b8   :  { %v2113_v23 = vmul.f32 0.5, %v2112_v38 }
0x10ba   :  { %v2114_v27 = vsub.f32 1.5, %v2113_v23 }
0x10bc   :  { %v2115_v7 = vmul.f32 %v4677_v36, %v2114_v27 }
0x10be   :  { %v2119_v9 = vsel %vm2118_vm13, %v4677_v36, %v2115_v7 }
0x10bf   :  { %v2121_v15 = vmul.f32 %v2119_v9, %v2087_v56 }
0x10c1   :  { %v2126_v10 = vmul.f32 %v5425_v4, %v2121_v15 }
0x10c3   :  { %v5498_v17 = vadd.f32 %v5428_v8, %v2126_v10 }
0x10c5   :  { %4466 = vmatmul.msk.f32.gmra.mxu0 %vm206_vm0, %v5498_v17 }
0x110b   :  { %v2274_v19 = vpop.xlane.xlu0 %2273 }
0x110c   :  { %v2278_v21 = vmul.f32 %v2274_v19, %v5142_v60 }
0x110e   :  { %v5508_v16 = vsub.f32 %v2270_v24, %v2278_v21 }
0x1110   :  { %v2282_v4 = vmul.f32 %v5508_v16, %v5508_v16 }
0x1112   :  { %v2284_v8 = vsel %vm206_vm0, %v2282_v4, 0.0 }
0x1113   :  { %2285 = vadd.xlane.f32.xlu1 %v2284_v8 }
0x1142   :  { %v2161_v63 = vpop.f32.mrf.mxu0 }
0x1143   :  { %v2162_v29 = vadd.f32 %v5460_v32, %v2161_v63 }
0x1145   :  { %v2167_v55 = vmul.f32 0.70710677, %v2162_v29  ;;  %v2165_v7 = vmul.f32 0.5, %v2162_v29 }
0x1147   :  { %v2173_v20 = vand.u32 2147483647, %v2167_v55  ;;  %vm2169_vm4 = vcmp.ge.f32.partialorder %v2167_v55, 0.0 }
0x1148   :  { %v2171_v23 = vsel %vm2169_vm4, 1.0, %v4859_v3 }
0x1149   :  { %v2175_v22 = vmul.f32 0.3275911, %v2173_v20  ;;  %v2227_v50 = vsub.f32 0.0, %v2173_v20 }
0x114b   :  { %v2177_v40 = vadd.f32 1.0, %v2175_v22  ;;  %v2229_v46 = vmul.f32 %v2227_v50, %v2173_v20 }
0x114d   :  { %4678 = vrcp.f32 %v2177_v40  ;;  %v2204_v1 = vand.u32 2147483648, %v2177_v40  ;;  %v2202_v45 = vand.u32 2147483647, %v2177_v40  ;;  %vm2198_vm15 = vweird.f32 %v2177_v40 }
0x114e   :  { %v2232_v61 = vmul.f32 1.442695, %v2229_v46 }
0x114f   :  { %v2205_v37 = vor.u32 1.1754944e-38, %v2204_v1  ;;  %vm2203_vm3 = vcmp.eq.f32.partialorder %v2202_v45, 8.507059e+37 }
0x1150   :  { %4680 = vpow2.f32 %v2232_v61 }
0x1153   :  { %v4679_v41 = vpop.eup %4678 }
0x1154   :  { %v2194_v18 = vmul.f32 %v4679_v41, %v2177_v40  ;;  %vm2199_vm14 = vweird.f32 %v4679_v41  ;;  %v4597_v40 = vld [vmem:[%s5505_s9] ss:$0 sm:$0xff] }
0x1155   :  { %vm2200_vm2 = vmor %vm2198_vm15, %vm2199_vm14 }
0x1156   :  { %v2195_v42 = vsub.f32 1.0, %v2194_v18  ;;  %v4681_v36 = vpop.eup %4680  ;;  %v4598_v18 = vld [vmem:[%s5516_s22] ss:$0 sm:$0xff] }
0x1158   :  { %v2196_v53 = vmul.f32 %v4679_v41, %v2195_v42 }
0x115a   :  { %v2197_v43 = vadd.f32 %v4679_v41, %v2196_v53 }
0x115c   :  { %v2201_v62 = vsel %vm2200_vm2, %v4679_v41, %v2197_v43 }
0x115d   :  { %v2206_v32 = vsel %vm2203_vm3, %v2205_v37, %v2201_v62  ;;  %v5536_v62 = vld [vmem:[%s4982_s23] ss:$0 sm:$0xff]  ;;  %s4863_s23 = smov 28  }
0x115e   :  { %v2209_v51 = vmul.f32 1.0614054, %v2206_v32 }
0x1160   :  { %v2211_v56 = vadd.f32 -1.4531521, %v2209_v51 }
0x1162   :  { %v2213_v47 = vmul.f32 %v2211_v56, %v2206_v32  ;;  %v5543_v56 = vld [vmem:[%s4936_s7] ss:$0 sm:$0xff] }
0x1164   :  { %v2215_v25 = vadd.f32 1.4214138, %v2213_v47 }
0x1166   :  { %v2217_v24 = vmul.f32 %v2215_v25, %v2206_v32 }
0x1168   :  { %v2219_v12 = vadd.f32 -0.28449672, %v2217_v24 }
0x116a   :  { %v2221_v39 = vmul.f32 %v2219_v12, %v2206_v32 }
0x116c   :  { %v2223_v0 = vadd.f32 0.2548296, %v2221_v39 }
0x116e   :  { %v2225_v2 = vmul.f32 %v2223_v0, %v2206_v32 }
0x1170   :  { %v2235_v48 = vmul.f32 %v4681_v36, %v2225_v2 }
0x1172   :  { %v2237_v38 = vsub.f32 1.0, %v2235_v48 }
0x1174   :  { %v2239_v27 = vmul.f32 %v2237_v38, %v2171_v23 }
0x1176   :  { %v2241_v9 = vadd.f32 1.0, %v2239_v27 }
0x1178   :  { %v2243_v15 = vmul.f32 %v2241_v9, %v2165_v7 }
0x117a   :  { %2266 = vmatmul.f32.gmra.mxu1 %v2243_v15 }
0x1186   :  { %v2286_v10 = vpop.xlane.xlu1 %2285 }
0x1187   :  { %v2290_v19 = vmul.f32 %v2286_v10, %v5142_v60 }
0x1189   :  { %v2292_v21 = vadd.f32 1e-05, %v2290_v19 }
0x118b   :  { %4682 = vrsqrt.f32 %v2292_v21  ;;  %vm2300_vm6 = vweird.f32 %v2292_v21 }
0x1191   :  { %v4683_v4 = vpop.eup %4682 }
0x1192   :  { %v2295_v8 = vmul.f32 %v4683_v4, %v2292_v21  ;;  %vm2301_vm5 = vweird.f32 %v4683_v4 }
0x1193   :  { %vm2302_vm7 = vmor %vm2300_vm6, %vm2301_vm5 }
0x1194   :  { %v2296_v63 = vmul.f32 %v4683_v4, %v2295_v8  ;;  %v5576_v8 = vld [vmem:[%s5031_s28] sm:$0xff] }
0x1196   :  { %v2297_v55 = vmul.f32 0.5, %v2296_v63 }
0x1198   :  { %v2298_v20 = vsub.f32 1.5, %v2297_v55 }
0x119a   :  { %v2299_v22 = vmul.f32 %v4683_v4, %v2298_v20 }
0x119c   :  { %v2303_v29 = vsel %vm2302_vm7, %v4683_v4, %v2299_v22 }
0x119d   :  { %v2314_v41 = vmul.f32 %v2303_v29, %v5508_v16 }
0x119f   :  { %v2319_v42 = vmul.f32 %v4597_v40, %v2314_v41 }
0x11a1   :  { %v5524_v1 = vadd.f32 %v4598_v18, %v2319_v42 }
0x11a3   :  { %4467 = vmatmul.msk.f32.vlgmr.msra.gmra.mxu2 %vm206_vm0, %v5524_v1  ;;  %4469 = vmatmul.msk.f32.vlgmr.msra.gmra.mxu3 %vm206_vm0, %v5524_v1 }
0x11a4   :  { %4471 = vmatmul.msk.f32.vlgmr.msrb.gmra.mxu0 %vm206_vm0, %v5524_v1 }
0x11f7   :  { %v2267_v53 = vpop.f32.mrf.mxu1 }
0x11f8   :  { %v2268_v45 = vadd.f32 %v5490_v59, %v2267_v53  ;;  %v4788_v59 = vld [vmem:[%s4927_s3] ss:$0 sm:$0xff]  ;;  %s4862_s3 = smov 30  }
0x11fa   :  { %v2271_v16 = vadd.f32 %v2268_v45, %v5498_v17 }
0x11fc   :  { %v2275_v43 = vsel %vm206_vm0, %v2271_v16, 0.0 }
0x11fd   :  { %2276 = vadd.xlane.f32.xlu2 %v2275_v43 }
0x1221   :  { %v2395_v37 = vpop.f32.mrf.mxu0 }
0x1222   :  { %v5539_v50 = vadd.f32 %v5536_v62, %v2395_v37 }
0x1224   :  { %2470 = vmatpush.msrb.mxu3 %v5539_v50 }
0x1226   :  { %v2349_v32 = vpop.f32.mrf.mxu2  ;;  %v2372_v51 = vpop.f32.mrf.mxu3 }
0x1227   :  { %v5546_v46 = vadd.f32 %v5543_v56, %v2349_v32  ;;  %v5549_v17 = vadd.f32 %v4788_v59, %v2372_v51 }
0x1229   :  { %2477 = vrot.lane.b32.xlu1 %v5549_v17, %s4841_s19  ;;  %4473 = vmatpush.xpose.msk.msrb.mxu2 %vm346_vm1, %v5549_v17 }
0x122a   :  { %2475 = vrot.lane.b32.xlu2 %v5546_v46, %s4841_s19 }
0x1231   :  { %2529 = vrot.lane.b32.xlu1 %v5539_v50, %s4841_s19 }
0x1239   :  { %2601 = vrot.lane.b32.xlu1 %v5546_v46, %s4840_s17 }
0x1270   :  { %v2277_v47 = vpop.xlane.xlu2 %2276 }
0x1271   :  { %v2279_v25 = vmul.f32 %v2277_v47, %v5142_v60 }
0x1273   :  { %v2281_v61 = vsub.f32 %v2271_v16, %v2279_v25 }
0x1275   :  { %v2283_v24 = vmul.f32 %v2281_v61, %v2281_v61 }
0x1277   :  { %v2287_v12 = vsel %vm206_vm0, %v2283_v24, 0.0 }
0x1278   :  { %2288 = vadd.xlane.f32.xlu0 %v2287_v12 }
0x1284   :  { %v2476_v63 = vpop.permute.xlu2 %2475 }
0x129b   :  { %v2478_v39 = vpop.permute.xlu1 %2477 }
0x129c   :  { %4476 = vmatpush.xpose.msk.msra.mxu2 %vm346_vm1, %v2478_v39 }
0x12a3   :  { %v2530_v0 = vpop.permute.xlu1 %2529 }
0x12a4   :  { %2550 = vmatpush.msra.mxu3 %v2530_v0 }
0x12eb   :  { %v2289_v2 = vpop.xlane.xlu0 %2288 }
0x12ec   :  { %v2291_v36 = vmul.f32 %v2289_v2, %v5142_v60 }
0x12ee   :  { %v2293_v48 = vadd.f32 1e-05, %v2291_v36 }
0x12f0   :  { %4684 = vrsqrt.f32 %v2293_v48  ;;  %vm2310_vm9 = vweird.f32 %v2293_v48 }
0x12f6   :  { %v4685_v38 = vpop.eup %4684 }
0x12f7   :  { %v2305_v23 = vmul.f32 %v4685_v38, %v2293_v48  ;;  %vm2311_vm8 = vweird.f32 %v4685_v38 }
0x12f8   :  { %vm2312_vm10 = vmor %vm2310_vm9, %vm2311_vm8 }
0x12f9   :  { %v2306_v27 = vmul.f32 %v4685_v38, %v2305_v23 }
0x12fb   :  { %v2307_v7 = vmul.f32 0.5, %v2306_v27 }
0x12fd   :  { %v2308_v9 = vsub.f32 1.5, %v2307_v7 }
0x12ff   :  { %v2309_v15 = vmul.f32 %v4685_v38, %v2308_v9 }
0x1301   :  { %v2313_v10 = vsel %vm2312_vm10, %v4685_v38, %v2309_v15 }
0x1302   :  { %v2315_v19 = vmul.f32 %v2313_v10, %v2281_v61 }
0x1304   :  { %v2320_v21 = vmul.f32 %v4597_v40, %v2315_v19 }
0x1306   :  { %v5565_v4 = vadd.f32 %v4598_v18, %v2320_v21 }
0x1308   :  { %4468 = vmatmul.msk.f32.gmra.mxu2 %vm206_vm0, %v5565_v4  ;;  %4470 = vmatmul.msk.f32.gmra.mxu3 %vm206_vm0, %v5565_v4 }
0x1309   :  { %4472 = vmatmul.msk.f32.gmra.mxu0 %vm206_vm0, %v5565_v4 }
0x1310   :  { %4474 = vmatmul.msk.f32.vlgmr.msrb.gmra.mxu2 %vm346_vm1, %v5546_v46 }
0x1311   :  { %2596 = vmatpush.msrb.mxu2 %v5576_v8 }
0x1318   :  { %4477 = vmatmul.msk.f32.vlgmr.msra.gmra.mxu2 %vm346_vm1, %v2476_v63 }
0x138b   :  { %v5580_v55 = vpop.f32.mrf.mxu2  ;;  %v2375_v20 = vpop.f32.mrf.mxu3 }
0x138c   :  { %v5582_v22 = vadd.f32 %v4788_v59, %v2375_v20 }
0x138e   :  { %4489 = vmatpush.xpose.msk.msrb.mxu1 %vm346_vm1, %v5582_v22 }
0x1393   :  { %v2424_v40 = vpop.f32.mrf.mxu2 }
0x1394   :  { %v2427_v29 = vmul.f32 0.35355338, %v2424_v40 }
0x1396   :  { %v2428_v41 = vsel %vm346_vm1, %v2427_v29, -inf }
0x1397   :  { %2429 = vmax.xlane.f32.xlu0 %v2428_v41 }
0x139b   :  { %v2500_v18 = vpop.f32.mrf.mxu2 }
0x139c   :  { %v2503_v42 = vmul.f32 0.35355338, %v2500_v18 }
0x139e   :  { %v2504_v53 = vsel %vm346_vm1, %v2503_v42, -inf }
0x139f   :  { %2505 = vmax.xlane.f32.xlu0 %v2504_v53 }
0x140a   :  { %v2430_v45 = vpop.xlane.xlu0 %2429 }
0x140b   :  { %v2431_v16 = vsub.f32 %v2427_v29, %v2430_v45 }
0x140d   :  { %v2432_v43 = vmul.f32 1.442695, %v2431_v16  ;;  %v2602_v16 = vpop.permute.xlu1 %2601 }
0x140f   :  { %4686 = vpow2.f32 %v2432_v43 }
0x1412   :  { %v2506_v37 = vpop.xlane.xlu0 %2505 }
0x1413   :  { %v2507_v32 = vsub.f32 %v2503_v42, %v2506_v37 }
0x1415   :  { %v4687_v51 = vpop.eup %4686  ;;  %v2508_v59 = vmul.f32 1.442695, %v2507_v32  ;;  %v5603_v32 = vld [vmem:[%s5031_s28 + $0x18] sm:$0xff] }
0x1416   :  { %v2434_v47 = vsel %vm346_vm1, %v4687_v51, 0.0 }
0x1417   :  { %4688 = vpow2.f32 %v2508_v59  ;;  %2435 = vadd.xlane.f32.xlu0 %v2434_v47 }
0x141d   :  { %v4689_v25 = vpop.eup %4688 }
0x141e   :  { %v2510_v61 = vsel %vm346_vm1, %v4689_v25, 0.0 }
0x141f   :  { %2511 = vadd.xlane.f32.xlu2 %v2510_v61 }
0x142b   :  { %2603 = vrot.lane.b32.xlu0 %v5549_v17, %s4840_s17 }
0x1437   :  { %2654 = vrot.lane.b32.xlu2 %v5539_v50, %s4840_s17 }
0x143f   :  { %2704 = vrot.lane.b32.xlu2 %v5546_v46, %s4843_s24 }
0x148a   :  { %v2436_v24 = vpop.xlane.xlu0 %2435 }
0x148b   :  { %4690 = vrcp.f32 %v2436_v24  ;;  %v2448_v36 = vand.u32 2147483648, %v2436_v24  ;;  %v2446_v38 = vand.u32 2147483647, %v2436_v24  ;;  %vm2442_vm12 = vweird.f32 %v2436_v24 }
0x148d   :  { %v2449_v7 = vor.u32 1.1754944e-38, %v2448_v36  ;;  %vm2447_vm14 = vcmp.eq.f32.partialorder %v2446_v38, 8.507059e+37 }
0x1491   :  { %v4691_v12 = vpop.eup %4690 }
0x1492   :  { %v2438_v39 = vmul.f32 %v4691_v12, %v2436_v24  ;;  %v2512_v0 = vpop.xlane.xlu2 %2511  ;;  %vm2443_vm11 = vweird.f32 %v4691_v12 }
0x1493   :  { %4692 = vrcp.f32 %v2512_v0  ;;  %vm2444_vm13 = vmor %vm2442_vm12, %vm2443_vm11  ;;  %v2524_v63 = vand.u32 2147483648, %v2512_v0  ;;  %v2522_v29 = vand.u32 2147483647, %v2512_v0  ;;  %vm2518_vm2 = vweird.f32 %v2512_v0 }
0x1494   :  { %v2439_v2 = vsub.f32 1.0, %v2438_v39  ;;  %v2398_v39 = vpop.f32.mrf.mxu0 }
0x1495   :  { %v2525_v18 = vor.u32 1.1754944e-38, %v2524_v63  ;;  %vm2523_vm4 = vcmp.eq.f32.partialorder %v2522_v29, 8.507059e+37 }
0x1496   :  { %v2440_v48 = vmul.f32 %v4691_v12, %v2439_v2 }
0x1498   :  { %v2441_v23 = vadd.f32 %v4691_v12, %v2440_v48 }
0x1499   :  { %v4693_v27 = vpop.eup %4692 }
0x149a   :  { %v2445_v9 = vsel %vm2444_vm13, %v4691_v12, %v2441_v23  ;;  %v2514_v15 = vmul.f32 %v4693_v27, %v2512_v0  ;;  %v2655_v46 = vpop.permute.xlu2 %2654  ;;  %vm2519_vm15 = vweird.f32 %v4693_v27 }
0x149b   :  { %v2450_v10 = vsel %vm2447_vm14, %v2449_v7, %v2445_v9  ;;  %2675 = vmatpush.msrb.mxu0 %v2655_v46  ;;  %vm2520_vm3 = vmor %vm2518_vm2, %vm2519_vm15 }
0x149c   :  { %v2515_v19 = vsub.f32 1.0, %v2514_v15  ;;  %v2451_v21 = vmul.f32 %v4687_v51, %v2450_v10 }
0x149d   :  { %v2604_v20 = vpop.permute.xlu0 %2603 }
0x149e   :  { %v2516_v40 = vmul.f32 %v4693_v27, %v2515_v19  ;;  %4475 = vmatmul.msk.f32.vlgmr.msrb.gmra.mxu3 %vm346_vm1, %v2451_v21 }
0x149f   :  { %4481 = vmatpush.xpose.msk.msrb.mxu3 %vm346_vm1, %v2604_v20 }
0x14a0   :  { %v2517_v41 = vadd.f32 %v4693_v27, %v2516_v40 }
0x14a2   :  { %v2521_v42 = vsel %vm2520_vm3, %v4693_v27, %v2517_v41  ;;  %v2705_v0 = vpop.permute.xlu2 %2704 }
0x14a3   :  { %v2526_v53 = vsel %vm2523_vm4, %v2525_v18, %v2521_v42 }
0x14a4   :  { %v2527_v45 = vmul.f32 %v4689_v25, %v2526_v53  ;;  %v5613_v25 = vadd.f32 %v5543_v56, %v5580_v55  ;;  %v5623_v56 = vadd.f32 %v5536_v62, %v2398_v39 }
0x14a6   :  { %4478 = vmatmul.msk.f32.vlgmr.msra.gmra.mxu3 %vm346_vm1, %v2527_v45 }
0x14ae   :  { %4482 = vmatmul.msk.f32.vlgmr.msrb.gmra.mxu3 %vm346_vm1, %v2602_v16 }
0x1521   :  { %v2472_v43 = vpop.f32.mrf.mxu3 }
0x1522   :  { %4480 = vmatmul.msk.f32.vlgmr.msrb.gmra.mxu2 %vm346_vm1, %v2472_v43 }
0x1529   :  { %v2552_v37 = vpop.f32.mrf.mxu3 }
0x152a   :  { %4479 = vmatmul.msk.f32.vlgmr.msra.gmra.mxu0 %vm346_vm1, %v2552_v37 }
0x152b   :  { %2801 = vmatpush.msra.mxu0 %v5603_v32 }
0x1531   :  { %v2626_v51 = vpop.f32.mrf.mxu3 }
0x1532   :  { %v2629_v59 = vmul.f32 0.35355338, %v2626_v51 }
0x1534   :  { %v2630_v47 = vsel %vm346_vm1, %v2629_v59, -inf }
0x1535   :  { %2631 = vmax.xlane.f32.xlu1 %v2630_v47 }
0x154e   :  { %2706 = vrot.lane.b32.xlu1 %v5549_v17, %s4843_s24 }
0x1556   :  { %2757 = vrot.lane.b32.xlu1 %v5539_v50, %s4843_s24 }
0x155e   :  { %2881 = vrot.lane.b32.xlu1 %v5613_v25, %s4841_s19 }
0x1566   :  { %3112 = vrot.lane.b32.xlu1 %v5582_v22, %s4843_s24 }
0x156e   :  { %3110 = vrot.lane.b32.xlu1 %v5613_v25, %s4843_s24 }
0x15a5   :  { %v5639_v20 = vpop.f32.mrf.mxu2 }
0x15a8   :  { %v2632_v61 = vpop.xlane.xlu1 %2631 }
0x15a9   :  { %v2633_v24 = vsub.f32 %v2629_v59, %v2632_v61 }
0x15ab   :  { %v2634_v12 = vmul.f32 1.442695, %v2633_v24 }
0x15ad   :  { %4694 = vpow2.f32 %v2634_v12 }
0x15b3   :  { %v4695_v17 = vpop.eup %4694 }
0x15b4   :  { %v2636_v50 = vsel %vm346_vm1, %v4695_v17, 0.0 }
0x15b5   :  { %2637 = vadd.xlane.f32.xlu0 %v2636_v50 }
0x15c0   :  { %v2707_v55 = vpop.permute.xlu1 %2706 }
0x15c1   :  { %4485 = vmatpush.xpose.msk.msra.mxu2 %vm346_vm1, %v2707_v55 }
0x15c4   :  { %4486 = vmatmul.msk.f32.vlgmr.msra.gmra.mxu2 %vm346_vm1, %v2705_v0 }
0x15c5   :  { %2876 = vmatpush.msrb.mxu2 %v5623_v56 }
0x15c7   :  { %3002 = vmatpush.msra.mxu2 %v5576_v8  ;;  %v5630_v8 = vpop.f32.mrf.mxu0 }
0x15c8   :  { %v2758_v2 = vpop.permute.xlu1 %2757 }
0x15c9   :  { %2778 = vmatpush.msra.mxu3 %v2758_v2 }
0x15d0   :  { %v2882_v39 = vpop.permute.xlu1 %2881 }
0x1628   :  { %v2638_v36 = vpop.xlane.xlu0 %2637 }
0x1629   :  { %4696 = vrcp.f32 %v2638_v36  ;;  %v2650_v27 = vand.u32 2147483648, %v2638_v36  ;;  %v2648_v7 = vand.u32 2147483647, %v2638_v36  ;;  %vm2644_vm6 = vweird.f32 %v2638_v36 }
0x162b   :  { %v2651_v15 = vor.u32 1.1754944e-38, %v2650_v27  ;;  %vm2649_vm8 = vcmp.eq.f32.partialorder %v2648_v7, 8.507059e+37 }
0x162f   :  { %v4697_v48 = vpop.eup %4696 }
0x1630   :  { %v2640_v38 = vmul.f32 %v4697_v48, %v2638_v36  ;;  %vm2645_vm5 = vweird.f32 %v4697_v48 }
0x1631   :  { %vm2646_vm7 = vmor %vm2644_vm6, %vm2645_vm5 }
0x1632   :  { %v2641_v23 = vsub.f32 1.0, %v2640_v38 }
0x1634   :  { %v2642_v62 = vmul.f32 %v4697_v48, %v2641_v23 }
0x1636   :  { %v2643_v9 = vadd.f32 %v4697_v48, %v2642_v62 }
0x1638   :  { %v2647_v46 = vsel %vm2646_vm7, %v4697_v48, %v2643_v9 }
0x1639   :  { %v2652_v10 = vsel %vm2649_vm8, %v2651_v15, %v2647_v46  ;;  %v3113_v15 = vpop.permute.xlu1 %3112 }
0x163a   :  { %v2653_v19 = vmul.f32 %v4695_v17, %v2652_v10 }
0x163c   :  { %4483 = vmatmul.msk.f32.vlgmr.msrb.gmra.mxu0 %vm346_vm1, %v2653_v19 }
0x1647   :  { %v2729_v18 = vpop.f32.mrf.mxu2 }
0x1648   :  { %v2732_v42 = vmul.f32 0.35355338, %v2729_v18 }
0x164a   :  { %v2733_v53 = vsel %vm346_vm1, %v2732_v42, -inf }
0x16b9   :  { %v2677_v21 = vpop.f32.mrf.mxu0 }
0x16ba   :  { %4484 = vmatmul.msk.f32.vlgmr.msra.gmra.mxu1 %vm346_vm1, %v2677_v21 }
0x16bb   :  { %2979 = vmatpush.msra.mxu1 %v5437_v11 }
0x16c2   :  { %4490 = vmatmul.msk.f32.vlgmr.msrb.gmra.mxu1 %vm346_vm1, %v5613_v25 }
0x16c3   :  { %3104 = vmatpush.msrb.mxu1 %v5481_v6 }
0x1737   :  { %v5637_v63 = vpop.f32.mrf.mxu1 }
0x173f   :  { %v2830_v40 = vpop.f32.mrf.mxu1 }
0x1740   :  { %v2833_v29 = vmul.f32 0.35355338, %v2830_v40 }
0x1742   :  { %v2834_v41 = vsel %vm346_vm1, %v2833_v29, -inf }
0x1743   :  { %2835 = vmax.xlane.f32.xlu0 %v2834_v41 }
0x174b   :  { %2734 = vmax.xlane.f32.xlu0 %v2733_v53 }
0x17b6   :  { %v2836_v11 = vpop.xlane.xlu0 %2835 }
0x17b7   :  { %v2837_v45 = vsub.f32 %v2833_v29, %v2836_v11 }
0x17b9   :  { %v2838_v16 = vmul.f32 1.442695, %v2837_v45  ;;  %v3111_v45 = vpop.permute.xlu1 %3110 }
0x17bb   :  { %4698 = vpow2.f32 %v2838_v16 }
0x17be   :  { %v2735_v43 = vpop.xlane.xlu0 %2734 }
0x17bf   :  { %v2736_v6 = vsub.f32 %v2732_v42, %v2735_v43 }
0x17c1   :  { %v4699_v37 = vpop.eup %4698  ;;  %v2737_v51 = vmul.f32 1.442695, %v2736_v6 }
0x17c2   :  { %v2840_v59 = vsel %vm346_vm1, %v4699_v37, 0.0 }
0x17c3   :  { %4700 = vpow2.f32 %v2737_v51  ;;  %2841 = vadd.xlane.f32.xlu2 %v2840_v59 }
0x17c9   :  { %v4701_v47 = vpop.eup %4700 }
0x17ca   :  { %v2739_v61 = vsel %vm346_vm1, %v4701_v47, 0.0 }
0x17cb   :  { %2740 = vadd.xlane.f32.xlu0 %v2739_v61 }
0x17db   :  { %3007 = vrot.lane.b32.xlu2 %v5613_v25, %s4840_s17 }
0x17df   :  { %2883 = vrot.lane.b32.xlu0 %v5582_v22, %s4841_s19 }
0x17e7   :  { %3009 = vrot.lane.b32.xlu0 %v5582_v22, %s4840_s17 }
0x1836   :  { %v2842_v24 = vpop.xlane.xlu2 %2841 }
0x1837   :  { %4702 = vrcp.f32 %v2842_v24  ;;  %v2854_v0 = vand.u32 2147483648, %v2842_v24  ;;  %v2852_v36 = vand.u32 2147483647, %v2842_v24  ;;  %vm2848_vm10 = vweird.f32 %v2842_v24 }
0x1839   :  { %v2855_v38 = vor.u32 1.1754944e-38, %v2854_v0  ;;  %vm2853_vm12 = vcmp.eq.f32.partialorder %v2852_v36, 8.507059e+37 }
0x183d   :  { %v4703_v12 = vpop.eup %4702 }
0x183e   :  { %v2844_v17 = vmul.f32 %v4703_v12, %v2842_v24  ;;  %v2741_v50 = vpop.xlane.xlu0 %2740  ;;  %vm2849_vm9 = vweird.f32 %v4703_v12  ;;  %v3008_v53 = vpop.permute.xlu2 %3007 }
0x183f   :  { %4704 = vrcp.f32 %v2741_v50  ;;  %vm2850_vm11 = vmor %vm2848_vm10, %vm2849_vm9  ;;  %v2753_v9 = vand.u32 2147483648, %v2741_v50  ;;  %v2751_v10 = vand.u32 2147483647, %v2741_v50  ;;  %vm2747_vm14 = vweird.f32 %v2741_v50 }
0x1840   :  { %v2845_v55 = vsub.f32 1.0, %v2844_v17 }
0x1841   :  { %v2754_v21 = vor.u32 1.1754944e-38, %v2753_v9  ;;  %vm2752_vm2 = vcmp.eq.f32.partialorder %v2751_v10, 8.507059e+37 }
0x1842   :  { %v2846_v2 = vmul.f32 %v4703_v12, %v2845_v55 }
0x1844   :  { %v2847_v48 = vadd.f32 %v4703_v12, %v2846_v2 }
0x1845   :  { %v4705_v25 = vpop.eup %4704 }
0x1846   :  { %v2851_v23 = vsel %vm2850_vm11, %v4703_v12, %v2847_v48  ;;  %v2743_v22 = vmul.f32 %v4705_v25, %v2741_v50  ;;  %vm2748_vm13 = vweird.f32 %v4705_v25 }
0x1847   :  { %v2856_v27 = vsel %vm2853_vm12, %v2855_v38, %v2851_v23  ;;  %vm2749_vm15 = vmor %vm2747_vm14, %vm2748_vm13 }
0x1848   :  { %v2744_v62 = vsub.f32 1.0, %v2743_v22  ;;  %v2857_v7 = vmul.f32 %v4699_v37, %v2856_v27 }
0x184a   :  { %v2745_v46 = vmul.f32 %v4705_v25, %v2744_v62  ;;  %4491 = vmatmul.msk.f32.vlgmr.msrb.gmra.mxu2 %vm346_vm1, %v2857_v7 }
0x184b   :  { %4501 = vmatpush.xpose.msk.msrb.mxu2 %vm346_vm1, %v3113_v15 }
0x184c   :  { %v2746_v19 = vadd.f32 %v4705_v25, %v2745_v46  ;;  %v2599_v46 = vadd.f32 %v5639_v20, %v5630_v8 }
0x184e   :  { %v2750_v40 = vsel %vm2749_vm15, %v4705_v25, %v2746_v19  ;;  %v2703_v19 = vadd.f32 %v5637_v63, %v2599_v46 }
0x184f   :  { %v2755_v29 = vsel %vm2752_vm2, %v2754_v21, %v2750_v40  ;;  %v5691_v40 = vld [vmem:[%s5098_s4] ss:$0 sm:$0xff]  ;;  %s4385_s4 = sld [smem:[%s5947_s0 + %s4863_s23]]  }
0x1850   :  { %v2756_v41 = vmul.f32 %v4701_v47, %v2755_v29 }
0x1851   :  { %v2884_v18 = vpop.permute.xlu0 %2883 }
0x1852   :  { %4487 = vmatmul.msk.f32.vlgmr.msra.gmra.mxu3 %vm346_vm1, %v2756_v41 }
0x1853   :  { %4492 = vmatpush.xpose.msk.msrb.mxu3 %vm346_vm1, %v2884_v18 }
0x1859   :  { %v3010_v42 = vpop.permute.xlu0 %3009 }
0x185a   :  { %4493 = vmatmul.msk.f32.vlgmr.msrb.gmra.mxu3 %vm346_vm1, %v2882_v39 }
0x185b   :  { %4497 = vmatpush.xpose.msk.msra.mxu3 %vm346_vm1, %v3010_v42 }
0x1862   :  { %4498 = vmatmul.msk.f32.vlgmr.msra.gmra.mxu3 %vm346_vm1, %v3008_v53 }
0x18cd   :  { %v2878_v11 = vpop.f32.mrf.mxu2 }
0x18ce   :  { %4496 = vmatmul.msk.f32.vlgmr.msra.gmra.mxu2 %vm346_vm1, %v2878_v11 }
0x18cf   :  { %4507 = vmatpush.xpose.msk.msra.mxu2 %vm346_vm1, %v5089_v57 }
0x18d5   :  { %v2780_v16 = vpop.f32.mrf.mxu3 }
0x18d6   :  { %4488 = vmatmul.msk.f32.vlgmr.msra.gmra.mxu0 %vm346_vm1, %v2780_v16  ;;  %4502 = vmatmul.msk.f32.vlgmr.msrb.gmra.mxu2 %vm346_vm1, %v3111_v45 }
0x18d7   :  { %3432 = vmatpush.msrb.mxu2 %v5243_v52 }
0x18dd   :  { %v2906_v43 = vpop.f32.mrf.mxu3 }
0x18de   :  { %v2909_v6 = vmul.f32 0.35355338, %v2906_v43 }
0x18e0   :  { %v2910_v37 = vsel %vm346_vm1, %v2909_v6, -inf }
0x18e1   :  { %2911 = vmax.xlane.f32.xlu1 %v2910_v37 }
0x18e5   :  { %v3032_v51 = vpop.f32.mrf.mxu3 }
0x18e6   :  { %v3035_v59 = vmul.f32 0.35355338, %v3032_v51 }
0x18e8   :  { %v3036_v47 = vsel %vm346_vm1, %v3035_v59, -inf }
0x18e9   :  { %3037 = vmax.xlane.f32.xlu2 %v3036_v47 }
0x1901   :  { %3060 = vrot.lane.b32.xlu2 %v5623_v56, %s4840_s17 }
0x1951   :  { %v5668_v57 = vpop.f32.mrf.mxu2 }
0x1953   :  { %v2803_v10 = vpop.f32.mrf.mxu0 }
0x1954   :  { %v2912_v61 = vpop.xlane.xlu1 %2911  ;;  %v2806_v21 = vadd.f32 %v2803_v10, %v2703_v19 }
0x1955   :  { %v2913_v24 = vsub.f32 %v2909_v6, %v2912_v61 }
0x1956   :  { %v3213_v29 = vadd.f32 %v5691_v40, %v2806_v21 }
0x1957   :  { %v2914_v12 = vmul.f32 1.442695, %v2913_v24 }
0x1958   :  { %v5695_v41 = vadd.f32 %v3213_v29, %v5524_v1 }
0x1959   :  { %4706 = vpow2.f32 %v2914_v12  ;;  %v3135_v52 = vpop.f32.mrf.mxu2 }
0x195a   :  { %v3138_v17 = vmul.f32 0.35355338, %v3135_v52 }
0x195c   :  { %v3038_v50 = vpop.xlane.xlu2 %3037  ;;  %v3139_v39 = vsel %vm346_vm1, %v3138_v17, -inf }
0x195d   :  { %v3039_v55 = vsub.f32 %v3035_v59, %v3038_v50  ;;  %3140 = vmax.xlane.f32.xlu0 %v3139_v39 }
0x195f   :  { %v5671_v0 = vpop.eup %4706  ;;  %v3040_v2 = vmul.f32 1.442695, %v3039_v55 }
0x1960   :  { %v2916_v36 = vsel %vm346_vm1, %v5671_v0, 0.0 }
0x1961   :  { %4708 = vpow2.f32 %v3040_v2  ;;  %2917 = vadd.xlane.f32.xlu1 %v2916_v36 }
0x1967   :  { %v5675_v48 = vpop.eup %4708 }
0x1968   :  { %v3042_v25 = vsel %vm346_vm1, %v5675_v48, 0.0 }
0x1969   :  { %3043 = vadd.xlane.f32.xlu1 %v3042_v25 }
0x1982   :  { %3163 = vrot.lane.b32.xlu1 %v5623_v56, %s4843_s24 }
0x19d0   :  { %v3141_v38 = vpop.xlane.xlu0 %3140 }
0x19d1   :  { %v3142_v23 = vsub.f32 %v3138_v17, %v3141_v38 }
0x19d3   :  { %v3143_v22 = vmul.f32 1.442695, %v3142_v23 }
0x19d4   :  { %v2918_v7 = vpop.xlane.xlu1 %2917 }
0x19d5   :  { %4710 = vpow2.f32 %v3143_v22  ;;  %v2930_v43 = vand.u32 2147483648, %v2918_v7  ;;  %vm2924_vm4 = vweird.f32 %v2918_v7  ;;  %v2928_v37 = vand.u32 2147483647, %v2918_v7 }
0x19d6   :  { %4712 = vrcp.f32 %v2918_v7 }
0x19d7   :  { %v2931_v12 = vor.u32 1.1754944e-38, %v2930_v43  ;;  %vm2929_vm8 = vcmp.eq.f32.partialorder %v2928_v37, 8.507059e+37 }
0x19db   :  { %v4711_v27 = vpop.eup %4710 }
0x19dc   :  { %v3145_v62 = vsel %vm346_vm1, %v4711_v27, 0.0  ;;  %v5682_v9 = vpop.xlane.xlu1 %3043 }
0x19dd   :  { %3146 = vadd.xlane.f32.xlu0 %v3145_v62  ;;  %4714 = vrcp.f32 %v5682_v9  ;;  %v3056_v36 = vand.u32 2147483648, %v5682_v9  ;;  %vm3050_vm12 = vweird.f32 %v5682_v9  ;;  %v3054_v38 = vand.u32 2147483647, %v5682_v9  ;;  %v3061_v62 = vpop.permute.xlu2 %3060 }
0x19df   :  { %vm3055_vm14 = vcmp.eq.f32.partialorder %v3054_v38, 8.507059e+37 }
0x19f1   :  { %2935 = vrot.lane.b32.xlu0 %v5623_v56, %s4841_s19  ;;  %v3217_v56 = vsel %vm206_vm0, %v5695_v41, 0.0 }
0x19f4   :  { %v3164_v15 = vpop.permute.xlu1 %3163 }
0x19f5   :  { %3184 = vmatpush.msrb.mxu3 %v3164_v15  ;;  %v5708_v15 = vld [vmem:[%s5234_s29 + $0x8] sm:$0xff] }
0x19f7   :  { %3360 = vmatpush.msra.mxu3 %v5153_v31  ;;  %v4713_v31 = vpop.eup %4712 }
0x19f8   :  { %v2920_v8 = vmul.f32 %v4713_v31, %v2918_v7  ;;  %v4715_v63 = vpop.eup %4714  ;;  %vm2925_vm3 = vweird.f32 %v4713_v31 }
0x19f9   :  { %v3046_v53 = vmul.f32 %v4715_v63, %v5682_v9  ;;  %vm2926_vm5 = vmor %vm2924_vm4, %vm2925_vm3  ;;  %vm3051_vm11 = vweird.f32 %v4715_v63 }
0x19fa   :  { %v2921_v18 = vsub.f32 1.0, %v2920_v8  ;;  %vm3052_vm13 = vmor %vm3050_vm12, %vm3051_vm11  ;;  %v5725_v8 = vld [vmem:[%s5234_s29] sm:$0xff] }
0x19fb   :  { %v3047_v16 = vsub.f32 1.0, %v3046_v53 }
0x19fc   :  { %v2922_v42 = vmul.f32 %v4713_v31, %v2921_v18 }
0x19fd   :  { %v3048_v24 = vmul.f32 %v4715_v63, %v3047_v16 }
0x19fe   :  { %v2923_v1 = vadd.f32 %v4713_v31, %v2922_v42 }
0x19ff   :  { %v3049_v55 = vadd.f32 %v4715_v63, %v3048_v24 }
0x1a00   :  { %v2927_v61 = vsel %vm2926_vm5, %v4713_v31, %v2923_v1 }
0x1a01   :  { %v2932_v50 = vsel %vm2929_vm8, %v2931_v12, %v2927_v61  ;;  %v3053_v7 = vsel %vm3052_vm13, %v4715_v63, %v3049_v55 }
0x1a02   :  { %v2933_v22 = vmul.f32 %v5671_v0, %v2932_v50 }
0x1a1b   :  { %3218 = vadd.xlane.f32.xlu0 %v3217_v56  ;;  %v4794_v56 = vld [vmem:[%s5169_s21 + $0x10] sm:$0xff] }
0x1a50   :  { %v3147_v20 = vpop.xlane.xlu0 %3146 }
0x1a51   :  { %4716 = vrcp.f32 %v3147_v20  ;;  %v3159_v51 = vand.u32 2147483648, %v3147_v20  ;;  %v3157_v47 = vand.u32 2147483647, %v3147_v20  ;;  %vm3153_vm7 = vweird.f32 %v3147_v20 }
0x1a53   :  { %v3160_v17 = vor.u32 1.1754944e-38, %v3159_v51  ;;  %vm3158_vm10 = vcmp.eq.f32.partialorder %v3157_v47, 8.507059e+37  ;;  %v4798_v51 = vld [vmem:[%s5139_s8] ss:$0 sm:$0xff]  ;;  %s4864_s8 = smov 29  }
0x1a57   :  { %v4717_v11 = vpop.eup %4716 }
0x1a58   :  { %v3149_v45 = vmul.f32 %v4717_v11, %v3147_v20  ;;  %vm3154_vm6 = vweird.f32 %v4717_v11  ;;  %v4797_v20 = vld [vmem:[%s5169_s21] sm:$0xff] }
0x1a59   :  { %vm3155_vm9 = vmor %vm3153_vm7, %vm3154_vm6 }
0x1a5a   :  { %v3150_v6 = vsub.f32 1.0, %v3149_v45 }
0x1a5c   :  { %v3151_v59 = vmul.f32 %v4717_v11, %v3150_v6 }
0x1a5e   :  { %v3152_v52 = vadd.f32 %v4717_v11, %v3151_v59  ;;  %v4799_v59 = vld [vmem:[%s5160_s12] ss:$0 sm:$0xff] }
0x1a60   :  { %v3156_v39 = vsel %vm3155_vm9, %v4717_v11, %v3152_v52 }
0x1a61   :  { %v3161_v2 = vsel %vm3158_vm10, %v3160_v17, %v3156_v39 }
0x1a62   :  { %v3162_v25 = vmul.f32 %v4711_v27, %v3161_v2  ;;  %v3057_v27 = vor.u32 1.1754944e-38, %v3056_v36 }
0x1a63   :  { %v2936_v23 = vpop.permute.xlu0 %2935 }
0x1a64   :  { %2956 = vmatpush.msrb.mxu0 %v2936_v23  ;;  %4503 = vmatmul.msk.f32.vlgmr.msrb.gmra.mxu3 %vm346_vm1, %v3162_v25  ;;  %v3058_v0 = vsel %vm3055_vm14, %v3057_v27, %v3053_v7  ;;  %v5745_v25 = vld [vmem:[%s5185_s27] ss:$0 sm:$0xff]  ;;  %s4386_s27 = sld [smem:[%s5947_s0 + %s4864_s8]]  }
0x1a65   :  { %4494 = vmatmul.msk.f32.vlgmr.msrb.gmra.mxu0 %vm346_vm1, %v2933_v22  ;;  %3455 = vmatpush.msrb.mxu3 %v5708_v15  ;;  %v3059_v9 = vmul.f32 %v5675_v48, %v3058_v0  ;;  %v4793_v48 = vld [vmem:[%s5169_s21 + $0x18] sm:$0xff] }
0x1a66   :  { %3081 = vmatpush.msra.mxu0 %v3061_v62 }
0x1a68   :  { %3207 = vmatpush.msrb.mxu0 %v5603_v32 }
0x1a6d   :  { %4499 = vmatmul.msk.f32.vlgmr.msra.gmra.mxu0 %vm346_vm1, %v3059_v9 }
0x1a6e   :  { %4510 = vmatpush.xpose.msk.msra.mxu0 %vm346_vm1, %v5210_v5  ;;  %v4795_v5 = vld [vmem:[%s5169_s21 + $0x8] sm:$0xff] }
0x1a8e   :  { %v3219_v46 = vpop.xlane.xlu0 %3218 }
0x1a8f   :  { %v3223_v10 = vmul.f32 %v3219_v46, %v5142_v60 }
0x1a91   :  { %v3225_v19 = vsub.f32 %v5695_v41, %v3223_v10 }
0x1a93   :  { %v3227_v21 = vmul.f32 %v3225_v19, %v3225_v19 }
0x1a95   :  { %v3229_v29 = vsel %vm206_vm0, %v3227_v21, 0.0 }
0x1a96   :  { %3230 = vadd.xlane.f32.xlu1 %v3229_v29 }
0x1ae2   :  { %v2958_v32 = vpop.f32.mrf.mxu0 }
0x1ae3   :  { %4495 = vmatmul.msk.f32.vlgmr.msra.gmra.mxu1 %vm346_vm1, %v2958_v32 }
0x1ae4   :  { %3283 = vmatpush.msra.mxu1 %v4793_v48 }
0x1ae6   :  { %3284 = vmatpush.msra.mxu1 %v4794_v56 }
0x1ae7   :  { %v3186_v31 = vpop.f32.mrf.mxu3 }
0x1ae8   :  { %4504 = vmatmul.msk.f32.vlgmr.msrb.gmra.mxu0 %vm346_vm1, %v3186_v31  ;;  %3285 = vmatpush.msra.mxu1 %v4795_v5 }
0x1ae9   :  { %3478 = vmatpush.msrb.mxu0 %v5725_v8 }
0x1aea   :  { %v3083_v41 = vpop.f32.mrf.mxu0  ;;  %3286 = vmatpush.msra.mxu1 %v4797_v20 }
0x1aeb   :  { %4500 = vmatmul.msk.f32.vlgmr.msrb.gmra.mxu1 %vm346_vm1, %v3083_v41 }
0x1aec   :  { %4515 = vmatpush.xpose.msk.msrb.mxu1 %vm346_vm1, %v5177_v44 }
0x1b09   :  { %v3231_v18 = vpop.xlane.xlu1 %3230 }
0x1b0a   :  { %v3235_v63 = vmul.f32 %v3231_v18, %v5142_v60 }
0x1b0c   :  { %v3237_v42 = vadd.f32 1e-05, %v3235_v63 }
0x1b0e   :  { %4718 = vrsqrt.f32 %v3237_v42  ;;  %vm3245_vm2 = vweird.f32 %v3237_v42 }
0x1b14   :  { %v4719_v53 = vpop.eup %4718 }
0x1b15   :  { %v3240_v11 = vmul.f32 %v4719_v53, %v3237_v42  ;;  %vm3246_vm15 = vweird.f32 %v4719_v53 }
0x1b16   :  { %vm3247_vm3 = vmor %vm3245_vm2, %vm3246_vm15 }
0x1b17   :  { %v3241_v45 = vmul.f32 %v4719_v53, %v3240_v11 }
0x1b19   :  { %v3242_v1 = vmul.f32 0.5, %v3241_v45 }
0x1b1b   :  { %v3243_v16 = vsub.f32 1.5, %v3242_v1 }
0x1b1d   :  { %v3244_v43 = vmul.f32 %v4719_v53, %v3243_v16 }
0x1b1f   :  { %v3248_v6 = vsel %vm3247_vm3, %v4719_v53, %v3244_v43 }
0x1b20   :  { %v3259_v37 = vmul.f32 %v3248_v6, %v3225_v19 }
0x1b22   :  { %v3261_v44 = vmul.f32 %v4798_v51, %v3259_v37 }
0x1b24   :  { %v5735_v47 = vadd.f32 %v4799_v59, %v3261_v44 }
0x1b26   :  { %4505 = vmatmul.msk.f32.vlgmr.msra.gmra.mxu1 %vm206_vm0, %v5735_v47 }
0x1b27   :  { %3646 = vmatpush.msra.mxu1 %v5302_v30 }
0x1b60   :  { %v2981_v61 = vpop.f32.mrf.mxu1 }
0x1b61   :  { %v3005_v24 = vadd.f32 %v5668_v57, %v2981_v61 }
0x1b65   :  { %v3209_v17 = vpop.f32.mrf.mxu0 }
0x1b68   :  { %v3106_v12 = vpop.f32.mrf.mxu1 }
0x1b69   :  { %v3109_v52 = vadd.f32 %v3106_v12, %v3005_v24 }
0x1b6b   :  { %v3212_v50 = vadd.f32 %v3209_v17, %v3109_v52 }
0x1b6d   :  { %v3214_v39 = vadd.f32 %v5691_v40, %v3212_v50 }
0x1b6f   :  { %v3216_v55 = vadd.f32 %v3214_v39, %v5565_v4 }
0x1b71   :  { %v3220_v2 = vsel %vm206_vm0, %v3216_v55, 0.0 }
0x1b72   :  { %3221 = vadd.xlane.f32.xlu2 %v3220_v2 }
0x1ba3   :  { %v3288_v36 = vpop.f32.mrf.mxu1 }
0x1ba4   :  { %v5748_v38 = vadd.f32 %v5745_v25, %v3288_v36 }
0x1ba6   :  { %3483 = vrot.lane.b32.xlu1 %v5748_v38, %s4840_s17  ;;  %4508 = vmatmul.msk.f32.vlgmr.msra.gmra.mxu2 %vm346_vm1, %v5748_v38 }
0x1ba7   :  { %3550 = vmatpush.msra.mxu2 %v5254_v14 }
0x1be5   :  { %v3222_v30 = vpop.xlane.xlu2 %3221 }
0x1be6   :  { %v3224_v4 = vmul.f32 %v3222_v30, %v5142_v60 }
0x1be8   :  { %v3226_v57 = vsub.f32 %v3216_v55, %v3224_v4 }
0x1bea   :  { %v3228_v40 = vmul.f32 %v3226_v57, %v3226_v57 }
0x1bec   :  { %v3232_v23 = vsel %vm206_vm0, %v3228_v40, 0.0 }
0x1bed   :  { %3233 = vadd.xlane.f32.xlu0 %v3232_v23 }
0x1c01   :  { %3365 = vrot.lane.b32.xlu0 %v5748_v38, %s4841_s19 }
0x1c18   :  { %v3484_v41 = vpop.permute.xlu1 %3483 }
0x1c29   :  { %v3314_v22 = vpop.f32.mrf.mxu2 }
0x1c2a   :  { %v3317_v62 = vmul.f32 0.35355338, %v3314_v22 }
0x1c2c   :  { %v3318_v7 = vsel %vm346_vm1, %v3317_v62, -inf }
0x1c2d   :  { %3319 = vmax.xlane.f32.xlu1 %v3318_v7 }
0x1c60   :  { %v3234_v27 = vpop.xlane.xlu0 %3233 }
0x1c61   :  { %v3236_v0 = vmul.f32 %v3234_v27, %v5142_v60 }
0x1c63   :  { %v3238_v14 = vadd.f32 1e-05, %v3236_v0 }
0x1c65   :  { %4720 = vrsqrt.f32 %v3238_v14  ;;  %vm3255_vm5 = vweird.f32 %v3238_v14 }
0x1c6b   :  { %v4721_v9 = vpop.eup %4720 }
0x1c6c   :  { %v3250_v46 = vmul.f32 %v4721_v9, %v3238_v14  ;;  %vm3256_vm4 = vweird.f32 %v4721_v9 }
0x1c6d   :  { %vm3257_vm6 = vmor %vm3255_vm5, %vm3256_vm4 }
0x1c6e   :  { %v3251_v10 = vmul.f32 %v4721_v9, %v3250_v46 }
0x1c70   :  { %v3252_v19 = vmul.f32 0.5, %v3251_v10 }
0x1c72   :  { %v3253_v21 = vsub.f32 1.5, %v3252_v19 }
0x1c73   :  { %v3366_v29 = vpop.permute.xlu0 %3365 }
0x1c74   :  { %v3254_v32 = vmul.f32 %v4721_v9, %v3253_v21  ;;  %4511 = vmatmul.msk.f32.vlgmr.msra.gmra.mxu0 %vm346_vm1, %v3366_v29 }
0x1c75   :  { %4519 = vmatpush.xpose.msk.msra.mxu0 %vm346_vm1, %v5246_v54 }
0x1c76   :  { %v3258_v48 = vsel %vm3257_vm6, %v4721_v9, %v3254_v32 }
0x1c77   :  { %v3260_v56 = vmul.f32 %v3258_v48, %v3226_v57 }
0x1c79   :  { %v3262_v31 = vmul.f32 %v4798_v51, %v3260_v56 }
0x1c7b   :  { %v5764_v5 = vadd.f32 %v4799_v59, %v3262_v31 }
0x1c7d   :  { %4506 = vmatmul.msk.f32.gmra.mxu1 %vm206_vm0, %v5764_v5 }
0x1c85   :  { %4516 = vmatmul.msk.f32.vlgmr.msrb.gmra.mxu1 %vm346_vm1, %v3484_v41 }
0x1c86   :  { %4526 = vmatpush.xpose.msk.msrb.mxu1 %vm346_vm1, %v5313_v35 }
0x1ca0   :  { %v3320_v35 = vpop.xlane.xlu1 %3319 }
0x1ca1   :  { %v3321_v44 = vsub.f32 %v3317_v62, %v3320_v35 }
0x1ca3   :  { %v3322_v61 = vmul.f32 1.442695, %v3321_v44 }
0x1cf1   :  { %v3386_v20 = vpop.f32.mrf.mxu0 }
0x1cf2   :  { %v3389_v18 = vmul.f32 0.35355338, %v3386_v20 }
0x1cf4   :  { %v3390_v63 = vsel %vm346_vm1, %v3389_v18, -inf }
0x1cf5   :  { %3391 = vmax.xlane.f32.xlu2 %v3390_v63 }
0x1cfa   :  { %v5772_v54 = vpop.f32.mrf.mxu1 }
0x1d02   :  { %v3504_v42 = vpop.f32.mrf.mxu1 }
0x1d03   :  { %v3507_v53 = vmul.f32 0.35355338, %v3504_v42 }
0x1d05   :  { %v3508_v11 = vsel %vm346_vm1, %v3507_v53, -inf }
0x1d06   :  { %3509 = vmax.xlane.f32.xlu2 %v3508_v11 }
0x1d68   :  { %v3392_v45 = vpop.xlane.xlu2 %3391 }
0x1d69   :  { %v3393_v1 = vsub.f32 %v3389_v18, %v3392_v45 }
0x1d6b   :  { %v3394_v16 = vmul.f32 1.442695, %v3393_v1 }
0x1d6d   :  { %4722 = vpow2.f32 %v3394_v16 }
0x1d73   :  { %v4723_v43 = vpop.eup %4722 }
0x1d74   :  { %v3396_v6 = vsel %vm346_vm1, %v4723_v43, 0.0 }
0x1d75   :  { %3397 = vadd.xlane.f32.xlu0 %v3396_v6 }
0x1d79   :  { %v3510_v37 = vpop.xlane.xlu2 %3509 }
0x1d7a   :  { %v3511_v51 = vsub.f32 %v3507_v53, %v3510_v37 }
0x1d7c   :  { %v3512_v59 = vmul.f32 1.442695, %v3511_v51 }
0x1d7e   :  { %4724 = vpow2.f32 %v3512_v59 }
0x1d7f   :  { %4726 = vpow2.f32 %v3322_v61 }
0x1d84   :  { %v4725_v24 = vpop.eup %4724 }
0x1d85   :  { %v3514_v12 = vsel %vm346_vm1, %v4725_v24, 0.0  ;;  %v4727_v52 = vpop.eup %4726 }
0x1d86   :  { %3515 = vadd.xlane.f32.xlu2 %v3514_v12  ;;  %v3324_v17 = vsel %vm346_vm1, %v4727_v52, 0.0 }
0x1d8e   :  { %3325 = vadd.xlane.f32.xlu2 %v3324_v17 }
0x1da6   :  { %3579 = vrot.lane.b32.xlu2 %v5748_v38, %s4843_s24  ;;  %v5782_v38 = vld [vmem:[%s5234_s29 + $0x18] sm:$0xff] }
0x1de8   :  { %v3398_v50 = vpop.xlane.xlu0 %3397 }
0x1de9   :  { %4728 = vrcp.f32 %v3398_v50  ;;  %v3410_v36 = vand.u32 2147483648, %v3398_v50  ;;  %v3408_v4 = vand.u32 2147483647, %v3398_v50  ;;  %vm3404_vm8 = vweird.f32 %v3398_v50 }
0x1deb   :  { %v3411_v40 = vor.u32 1.1754944e-38, %v3410_v36  ;;  %vm3409_vm10 = vcmp.eq.f32.partialorder %v3408_v4, 8.507059e+37 }
0x1def   :  { %v4729_v39 = vpop.eup %4728 }
0x1df0   :  { %v3400_v55 = vmul.f32 %v4729_v39, %v3398_v50  ;;  %vm3405_vm7 = vweird.f32 %v4729_v39 }
0x1df1   :  { %vm3406_vm9 = vmor %vm3404_vm8, %vm3405_vm7 }
0x1df2   :  { %v3401_v2 = vsub.f32 1.0, %v3400_v55 }
0x1df4   :  { %v3402_v30 = vmul.f32 %v4729_v39, %v3401_v2 }
0x1df6   :  { %v3403_v57 = vadd.f32 %v4729_v39, %v3402_v30 }
0x1df8   :  { %v3407_v23 = vsel %vm3406_vm9, %v4729_v39, %v3403_v57 }
0x1df9   :  { %v3412_v22 = vsel %vm3409_vm10, %v3411_v40, %v3407_v23  ;;  %v3516_v62 = vpop.xlane.xlu2 %3515 }
0x1dfa   :  { %v3413_v7 = vmul.f32 %v4723_v43, %v3412_v22  ;;  %4730 = vrcp.f32 %v3516_v62  ;;  %v3528_v46 = vand.u32 2147483648, %v3516_v62  ;;  %v3526_v19 = vand.u32 2147483647, %v3516_v62  ;;  %v4802_v43 = vld [vmem:[%s5234_s29 + $0x10] sm:$0xff]  ;;  %s4866_s29 = smov 31  }
0x1dfb   :  { %vm3522_vm12 = vweird.f32 %v3516_v62 }
0x1dfc   :  { %4512 = vmatmul.msk.f32.vlgmr.msrb.gmra.mxu2 %vm346_vm1, %v3413_v7  ;;  %v3529_v32 = vor.u32 1.1754944e-38, %v3528_v46  ;;  %vm3527_vm14 = vcmp.eq.f32.partialorder %v3526_v19, 8.507059e+37 }
0x1dfd   :  { %3669 = vmatpush.msrb.mxu2 %v5782_v38 }
0x1e00   :  { %v4731_v27 = vpop.eup %4730 }
0x1e01   :  { %v3518_v0 = vmul.f32 %v4731_v27, %v3516_v62  ;;  %v3326_v14 = vpop.xlane.xlu2 %3325  ;;  %vm3523_vm11 = vweird.f32 %v4731_v27 }
0x1e02   :  { %4732 = vrcp.f32 %v3326_v14  ;;  %vm3524_vm13 = vmor %vm3522_vm12, %vm3523_vm11  ;;  %v3338_v18 = vand.u32 2147483648, %v3326_v14  ;;  %v3336_v42 = vand.u32 2147483647, %v3326_v14  ;;  %vm3332_vm2 = vweird.f32 %v3326_v14 }
0x1e03   :  { %v3519_v9 = vsub.f32 1.0, %v3518_v0 }
0x1e04   :  { %v3339_v11 = vor.u32 1.1754944e-38, %v3338_v18  ;;  %vm3337_vm4 = vcmp.eq.f32.partialorder %v3336_v42, 8.507059e+37 }
0x1e05   :  { %v3520_v10 = vmul.f32 %v4731_v27, %v3519_v9 }
0x1e07   :  { %v3521_v21 = vadd.f32 %v4731_v27, %v3520_v10 }
0x1e08   :  { %v4733_v29 = vpop.eup %4732 }
0x1e09   :  { %v3525_v48 = vsel %vm3524_vm13, %v4731_v27, %v3521_v21  ;;  %v3328_v56 = vmul.f32 %v4733_v29, %v3326_v14  ;;  %vm3333_vm15 = vweird.f32 %v4733_v29  ;;  %v3580_v51 = vpop.permute.xlu2 %3579 }
0x1e0a   :  { %v3530_v31 = vsel %vm3527_vm14, %v3529_v32, %v3525_v48  ;;  %vm3334_vm3 = vmor %vm3332_vm2, %vm3333_vm15 }
0x1e0b   :  { %v3531_v41 = vmul.f32 %v4725_v24, %v3530_v31  ;;  %v3329_v20 = vsub.f32 1.0, %v3328_v56 }
0x1e0d   :  { %v3330_v63 = vmul.f32 %v4733_v29, %v3329_v20  ;;  %4517 = vmatmul.msk.f32.vlgmr.msra.gmra.mxu2 %vm346_vm1, %v3531_v41 }
0x1e0e   :  { %3813 = vmatpush.msra.mxu2 %v5366_v58  ;;  %v3292_v58 = vadd.f32 %v5745_v25, %v5772_v54 }
0x1e0f   :  { %v3331_v53 = vadd.f32 %v4733_v29, %v3330_v63 }
0x1e11   :  { %v3335_v45 = vsel %vm3334_vm3, %v4733_v29, %v3331_v53 }
0x1e12   :  { %v3340_v1 = vsel %vm3337_vm4, %v3339_v11, %v3335_v45 }
0x1e13   :  { %v3341_v16 = vmul.f32 %v4727_v52, %v3340_v1  ;;  %v4803_v1 = vld [vmem:[%s5455_s30 + $0x78] sm:$0xff] }
0x1e15   :  { %4509 = vmatmul.msk.f32.vlgmr.msra.gmra.mxu3 %vm346_vm1, %v3341_v16  ;;  %v4804_v16 = vld [vmem:[%s5455_s30 + $0x70] sm:$0xff] }
0x1e16   :  { %3573 = vmatpush.msra.mxu3 %v4802_v43 }
0x1e7f   :  { %v3434_v6 = vpop.f32.mrf.mxu2 }
0x1e80   :  { %4513 = vmatmul.msk.f32.vlgmr.msrb.gmra.mxu3 %vm346_vm1, %v3434_v6 }
0x1e81   :  { %4523 = vmatpush.xpose.msk.msrb.mxu3 %vm346_vm1, %v5265_v49 }
0x1e90   :  { %v3552_v35 = vpop.f32.mrf.mxu2 }
0x1e91   :  { %4518 = vmatmul.msk.f32.vlgmr.msra.gmra.mxu3 %vm346_vm1, %v3552_v35  ;;  %v4807_v35 = vld [vmem:[%s5455_s30 + $0x58] sm:$0xff] }
0x1e92   :  { %3836 = vmatpush.msra.mxu3 %v5708_v15 }
0x1e98   :  { %v3362_v37 = vpop.f32.mrf.mxu3 }
0x1e99   :  { %4514 = vmatmul.msk.f32.vlgmr.msrb.gmra.mxu0 %vm346_vm1, %v3362_v37  ;;  %4524 = vmatmul.msk.f32.vlgmr.msrb.gmra.mxu3 %vm346_vm1, %v3292_v58  ;;  %v4809_v37 = vld [vmem:[%s5455_s30 + $0x48] sm:$0xff] }
0x1e9a   :  { %3741 = vmatpush.msrb.mxu0 %v5276_v28  ;;  %3954 = vmatpush.msrb.mxu3 %v4802_v43 }
0x1ea1   :  { %4520 = vmatmul.msk.f32.vlgmr.msra.gmra.mxu0 %vm346_vm1, %v3580_v51 }
0x1ea2   :  { %3859 = vmatpush.msra.mxu0 %v5725_v8 }
0x1f03   :  { %v3457_v49 = vpop.f32.mrf.mxu3 }
0x1f14   :  { %v3575_v44 = vpop.f32.mrf.mxu3 }
0x1f16   :  { %v3480_v59 = vpop.f32.mrf.mxu0 }
0x1f17   :  { %v3481_v15 = vadd.f32 %v3480_v59, %v3457_v49  ;;  %v4810_v49 = vld [vmem:[%s5455_s30 + $0x40] sm:$0xff]  ;;  %v4811_v59 = vld [vmem:[%s5455_s30 + $0x38] sm:$0xff] }
0x1f19   :  { %v5801_v61 = vadd.f32 %v3575_v44, %v3481_v15 }
0x1f1c   :  { %v3695_v25 = vpop.f32.mrf.mxu3 }
0x1f1d   :  { %v3698_v54 = vmul.f32 0.35355338, %v3695_v25  ;;  %v4813_v25 = vld [vmem:[%s5455_s30 + $0x28] sm:$0xff] }
0x1f1e   :  { %v3600_v24 = vpop.f32.mrf.mxu0 }
0x1f1f   :  { %v3603_v12 = vmul.f32 0.35355338, %v3600_v24  ;;  %v3699_v52 = vsel %vm346_vm1, %v3698_v54, -inf  ;;  %v4814_v24 = vld [vmem:[%s5455_s30 + $0x20] sm:$0xff] }
0x1f20   :  { %3700 = vmax.xlane.f32.xlu2 %v3699_v52  ;;  %v4815_v52 = vld [vmem:[%s5455_s30 + $0x18] sm:$0xff] }
0x1f21   :  { %v3604_v28 = vsel %vm346_vm1, %v3603_v12, -inf }
0x1f22   :  { %3605 = vmax.xlane.f32.xlu1 %v3604_v28 }
0x1f3b   :  { %3746 = vrot.lane.b32.xlu1 %v3292_v58, %s4841_s19  ;;  %s5920_s19 = sld [smem:[%s5947_s0 + %s4862_s3]]  }
0x1f93   :  { %v3701_v17 = vpop.xlane.xlu2 %3700 }
0x1f94   :  { %v3702_v8 = vsub.f32 %v3698_v54, %v3701_v17  ;;  %v4816_v17 = vld [vmem:[%s5455_s30 + $0x10] sm:$0xff] }
0x1f95   :  { %v3606_v50 = vpop.xlane.xlu1 %3605 }
0x1f96   :  { %v3703_v39 = vmul.f32 1.442695, %v3702_v8  ;;  %v3607_v55 = vsub.f32 %v3603_v12, %v3606_v50  ;;  %v4817_v8 = vld [vmem:[%s5455_s30 + $0x8] sm:$0xff]  ;;  %v4818_v50 = vld [vmem:[%s5455_s30] sm:$0xff] }
0x1f98   :  { %4734 = vpow2.f32 %v3703_v39  ;;  %v3608_v2 = vmul.f32 1.442695, %v3607_v55 }
0x1f9a   :  { %4736 = vpow2.f32 %v3608_v2 }
0x1f9e   :  { %v4735_v36 = vpop.eup %4734 }
0x1f9f   :  { %v3705_v30 = vsel %vm346_vm1, %v4735_v36, 0.0 }
0x1fa0   :  { %3706 = vadd.xlane.f32.xlu0 %v3705_v30  ;;  %v4737_v4 = vpop.eup %4736 }
0x1fa1   :  { %v3610_v57 = vsel %vm346_vm1, %v4737_v4, 0.0 }
0x1fa8   :  { %3611 = vadd.xlane.f32.xlu0 %v3610_v57 }
0x1fad   :  { %v3747_v11 = vpop.permute.xlu1 %3746 }
0x1fbc   :  { %3864 = vrot.lane.b32.xlu0 %v3292_v58, %s4840_s17 }
0x1fc4   :  { %3960 = vrot.lane.b32.xlu0 %v3292_v58, %s4843_s24  ;;  %v4808_v58 = vld [vmem:[%s5455_s30 + $0x50] sm:$0xff] }
0x2013   :  { %v3707_v40 = vpop.xlane.xlu0 %3706 }
0x2014   :  { %4738 = vrcp.f32 %v3707_v40  ;;  %v3719_v27 = vand.u32 2147483648, %v3707_v40  ;;  %v3717_v14 = vand.u32 2147483647, %v3707_v40  ;;  %vm3713_vm6 = vweird.f32 %v3707_v40 }
0x2016   :  { %v3720_v10 = vor.u32 1.1754944e-38, %v3719_v27  ;;  %vm3718_vm8 = vcmp.eq.f32.partialorder %v3717_v14, 8.507059e+37 }
0x201a   :  { %v4739_v23 = vpop.eup %4738 }
0x201b   :  { %v3709_v22 = vmul.f32 %v4739_v23, %v3707_v40  ;;  %v3612_v62 = vpop.xlane.xlu0 %3611  ;;  %vm3714_vm5 = vweird.f32 %v4739_v23 }
0x201c   :  { %4740 = vrcp.f32 %v3612_v62  ;;  %vm3715_vm7 = vmor %vm3713_vm6, %vm3714_vm5  ;;  %v3624_v56 = vand.u32 2147483648, %v3612_v62  ;;  %v3622_v41 = vand.u32 2147483647, %v3612_v62  ;;  %vm3618_vm10 = vweird.f32 %v3612_v62 }
0x201d   :  { %v3710_v7 = vsub.f32 1.0, %v3709_v22 }
0x201e   :  { %v3625_v18 = vor.u32 1.1754944e-38, %v3624_v56  ;;  %vm3623_vm12 = vcmp.eq.f32.partialorder %v3622_v41, 8.507059e+37 }
0x201f   :  { %v3711_v0 = vmul.f32 %v4739_v23, %v3710_v7 }
0x2021   :  { %v3712_v9 = vadd.f32 %v4739_v23, %v3711_v0 }
0x2022   :  { %v4741_v46 = vpop.eup %4740 }
0x2023   :  { %v3716_v19 = vsel %vm3715_vm7, %v4739_v23, %v3712_v9  ;;  %v3614_v21 = vmul.f32 %v4741_v46, %v3612_v62  ;;  %vm3619_vm9 = vweird.f32 %v4741_v46 }
0x2024   :  { %v3721_v29 = vsel %vm3718_vm8, %v3720_v10, %v3716_v19  ;;  %vm3620_vm11 = vmor %vm3618_vm10, %vm3619_vm9 }
0x2025   :  { %v3722_v32 = vmul.f32 %v4735_v36, %v3721_v29  ;;  %v3615_v48 = vsub.f32 1.0, %v3614_v21 }
0x2027   :  { %v3616_v31 = vmul.f32 %v4741_v46, %v3615_v48  ;;  %4525 = vmatmul.msk.f32.vlgmr.msrb.gmra.mxu0 %vm346_vm1, %v3722_v32  ;;  %v5850_v32 = vld [vmem:[%s5331_s10] ss:$0 sm:$0xff] }
0x2028   :  { %4535 = vmatpush.xpose.msk.msrb.mxu0 %vm346_vm1, %v5309_v33 }
0x2029   :  { %v3617_v20 = vadd.f32 %v4741_v46, %v3616_v31 }
0x202b   :  { %v3621_v63 = vsel %vm3620_vm11, %v4741_v46, %v3617_v20 }
0x202c   :  { %v3626_v42 = vsel %vm3623_vm12, %v3625_v18, %v3621_v63 }
0x202d   :  { %v3627_v53 = vmul.f32 %v4737_v4, %v3626_v42 }
0x202e   :  { %v3865_v33 = vpop.permute.xlu0 %3864 }
0x202f   :  { %4521 = vmatmul.msk.f32.vlgmr.msra.gmra.mxu1 %vm346_vm1, %v3627_v53 }
0x2030   :  { %4531 = vmatpush.xpose.msk.msra.mxu1 %vm346_vm1, %v5307_v34  ;;  %v4805_v34 = vld [vmem:[%s5455_s30 + $0x68] sm:$0xff] }
0x2036   :  { %v3961_v43 = vpop.permute.xlu0 %3960 }
0x2037   :  { %4527 = vmatmul.msk.f32.vlgmr.msrb.gmra.mxu1 %vm346_vm1, %v3747_v11 }
0x2038   :  { %4027 = vmatpush.msrb.mxu1 %v5378_v26  ;;  %v4806_v26 = vld [vmem:[%s5455_s30 + $0x60] sm:$0xff] }
0x203f   :  { %4532 = vmatmul.msk.f32.vlgmr.msra.gmra.mxu1 %vm346_vm1, %v3865_v33 }
0x20a4   :  { %v3743_v45 = vpop.f32.mrf.mxu0 }
0x20a5   :  { %4530 = vmatmul.msk.f32.vlgmr.msra.gmra.mxu0 %vm346_vm1, %v3743_v45 }
0x20a6   :  { %4217 = vmatpush.msra.mxu0 %v4803_v1 }
0x20a8   :  { %4218 = vmatpush.msra.mxu0 %v4804_v16 }
0x20aa   :  { %4219 = vmatpush.msra.mxu0 %v4805_v34 }
0x20ac   :  { %v3648_v6 = vpop.f32.mrf.mxu1  ;;  %4220 = vmatpush.msra.mxu0 %v4806_v26 }
0x20ad   :  { %4522 = vmatmul.msk.f32.vlgmr.msrb.gmra.mxu2 %vm346_vm1, %v3648_v6  ;;  %4536 = vmatmul.msk.f32.vlgmr.msrb.gmra.mxu0 %vm346_vm1, %v3961_v43 }
0x20ae   :  { %3931 = vmatpush.msrb.mxu2 %v5371_v13  ;;  %4221 = vmatpush.msra.mxu0 %v4807_v35  ;;  %v4812_v13 = vld [vmem:[%s5455_s30 + $0x30] sm:$0xff] }
0x20b0   :  { %4222 = vmatpush.msra.mxu0 %v4808_v58 }
0x20b2   :  { %4223 = vmatpush.msra.mxu0 %v4809_v37 }
0x20b4   :  { %v3767_v51 = vpop.f32.mrf.mxu1  ;;  %4224 = vmatpush.msra.mxu0 %v4810_v49 }
0x20b5   :  { %v3770_v44 = vmul.f32 0.35355338, %v3767_v51 }
0x20b6   :  { %4225 = vmatpush.msra.mxu0 %v4811_v59 }
0x20b7   :  { %v3771_v15 = vsel %vm346_vm1, %v3770_v44, -inf }
0x20b8   :  { %3772 = vmax.xlane.f32.xlu1 %v3771_v15  ;;  %4226 = vmatpush.msra.mxu0 %v4812_v13 }
0x20ba   :  { %4227 = vmatpush.msra.mxu0 %v4813_v25 }
0x20bc   :  { %v3885_v54 = vpop.f32.mrf.mxu1  ;;  %4228 = vmatpush.msra.mxu0 %v4814_v24 }
0x20bd   :  { %v3888_v12 = vmul.f32 0.35355338, %v3885_v54 }
0x20be   :  { %4229 = vmatpush.msra.mxu0 %v4815_v52 }
0x20bf   :  { %v3889_v28 = vsel %vm346_vm1, %v3888_v12, -inf }
0x20c0   :  { %3890 = vmax.xlane.f32.xlu2 %v3889_v28  ;;  %4230 = vmatpush.msra.mxu0 %v4816_v17 }
0x20c2   :  { %4231 = vmatpush.msra.mxu0 %v4817_v8 }
0x20c4   :  { %4232 = vmatpush.msra.mxu0 %v4818_v50 }
0x2122   :  { %v5841_v39 = vpop.f32.mrf.mxu0 }
0x212a   :  { %v3981_v55 = vpop.f32.mrf.mxu0 }
0x212b   :  { %v3984_v2 = vmul.f32 0.35355338, %v3981_v55  ;;  %v3773_v36 = vpop.xlane.xlu1 %3772 }
0x212c   :  { %v3774_v30 = vsub.f32 %v3770_v44, %v3773_v36 }
0x212d   :  { %v3985_v4 = vsel %vm346_vm1, %v3984_v2, -inf }
0x212e   :  { %v3775_v57 = vmul.f32 1.442695, %v3774_v30  ;;  %3986 = vmax.xlane.f32.xlu0 %v3985_v4 }
0x2130   :  { %4742 = vpow2.f32 %v3775_v57  ;;  %v3671_v10 = vpop.f32.mrf.mxu2 }
0x2131   :  { %v3674_v19 = vadd.f32 %v3671_v10, %v5801_v61 }
0x2133   :  { %v3891_v40 = vpop.xlane.xlu2 %3890  ;;  %v4056_v48 = vadd.f32 %v5850_v32, %v3674_v19 }
0x2134   :  { %v3892_v23 = vsub.f32 %v3888_v12, %v3891_v40  ;;  %v4820_v40 = vld [vmem:[%s5408_s2 + $0x18] sm:$0xff] }
0x2135   :  { %v4058_v31 = vadd.f32 %v4056_v48, %v5735_v47 }
0x2136   :  { %v4743_v22 = vpop.eup %4742  ;;  %v3893_v62 = vmul.f32 1.442695, %v3892_v23  ;;  %v4821_v23 = vld [vmem:[%s5408_s2 + $0x10] sm:$0xff] }
0x2137   :  { %v3777_v7 = vsel %vm346_vm1, %v4743_v22, 0.0  ;;  %v4060_v61 = vsel %vm206_vm0, %v4058_v31, 0.0 }
0x2138   :  { %4744 = vpow2.f32 %v3893_v62  ;;  %3778 = vadd.xlane.f32.xlu2 %v3777_v7  ;;  %v4823_v7 = vld [vmem:[%s5408_s2] sm:$0xff] }
0x213e   :  { %v4745_v27 = vpop.eup %4744 }
0x213f   :  { %v3895_v0 = vsel %vm346_vm1, %v4745_v27, 0.0 }
0x2140   :  { %3896 = vadd.xlane.f32.xlu2 %v3895_v0 }
0x21a1   :  { %v3987_v14 = vpop.xlane.xlu0 %3986 }
0x21a2   :  { %v3988_v9 = vsub.f32 %v3984_v2, %v3987_v14 }
0x21a4   :  { %v3989_v46 = vmul.f32 1.442695, %v3988_v9 }
0x21a6   :  { %4746 = vpow2.f32 %v3989_v46 }
0x21ab   :  { %v3779_v21 = vpop.xlane.xlu2 %3778 }
0x21ac   :  { %v5847_v29 = vpop.eup %4746  ;;  %4748 = vrcp.f32 %v3779_v21  ;;  %v3791_v42 = vand.u32 2147483648, %v3779_v21  ;;  %v3789_v11 = vand.u32 2147483647, %v3779_v21  ;;  %vm3785_vm14 = vweird.f32 %v3779_v21 }
0x21ad   :  { %v3991_v56 = vsel %vm346_vm1, %v5847_v29, 0.0 }
0x21ae   :  { %3992 = vadd.xlane.f32.xlu2 %v3991_v56  ;;  %v3792_v1 = vor.u32 1.1754944e-38, %v3791_v42  ;;  %vm3790_vm2 = vcmp.eq.f32.partialorder %v3789_v11, 8.507059e+37 }
0x21b2   :  { %v4749_v41 = vpop.eup %4748 }
0x21b3   :  { %v3781_v20 = vmul.f32 %v4749_v41, %v3779_v21  ;;  %v3897_v18 = vpop.xlane.xlu2 %3896  ;;  %vm3786_vm13 = vweird.f32 %v4749_v41 }
0x21b4   :  { %4750 = vrcp.f32 %v3897_v18  ;;  %vm3787_vm15 = vmor %vm3785_vm14, %vm3786_vm13  ;;  %v3909_v26 = vand.u32 2147483648, %v3897_v18  ;;  %v3907_v58 = vand.u32 2147483647, %v3897_v18  ;;  %vm3903_vm4 = vweird.f32 %v3897_v18 }
0x21b5   :  { %v3782_v63 = vsub.f32 1.0, %v3781_v20 }
0x21b6   :  { %4061 = vadd.xlane.f32.xlu2 %v4060_v61  ;;  %v3910_v51 = vor.u32 1.1754944e-38, %v3909_v26  ;;  %vm3908_vm6 = vcmp.eq.f32.partialorder %v3907_v58, 8.507059e+37 }
0x21b7   :  { %v3783_v53 = vmul.f32 %v4749_v41, %v3782_v63 }
0x21b9   :  { %v3784_v33 = vadd.f32 %v4749_v41, %v3783_v53 }
0x21ba   :  { %v4751_v45 = vpop.eup %4750 }
0x21bb   :  { %v3788_v16 = vsel %vm3787_vm15, %v4749_v41, %v3784_v33  ;;  %v3899_v47 = vmul.f32 %v4751_v45, %v3897_v18  ;;  %vm3904_vm3 = vweird.f32 %v4751_v45  ;;  %v5873_v41 = vld [vmem:[%s5390_s20] ss:$0 sm:$0xff] }
0x21bc   :  { %v3793_v34 = vsel %vm3790_vm2, %v3792_v1, %v3788_v16  ;;  %vm3905_vm5 = vmor %vm3903_vm4, %vm3904_vm3  ;;  %v5877_v18 = vld [vmem:[%s5400_s26] ss:$0 sm:$0xff]  ;;  %s4388_s26 = sld [smem:[%s5947_s0 + %s4866_s29]]  }
0x21bd   :  { %v3794_v43 = vmul.f32 %v4743_v22, %v3793_v34  ;;  %v3900_v6 = vsub.f32 1.0, %v3899_v47  ;;  %v4822_v22 = vld [vmem:[%s5408_s2 + $0x8] sm:$0xff] }
0x21bf   :  { %v3901_v35 = vmul.f32 %v4751_v45, %v3900_v6  ;;  %4528 = vmatmul.msk.f32.vlgmr.msra.gmra.mxu2 %vm346_vm1, %v3794_v43  ;;  %v5889_v43 = vld [vmem:[%s5415_s11] ss:$0 sm:$0xff] }
0x21c0   :  { %4050 = vmatpush.msra.mxu2 %v5782_v38 }
0x21c1   :  { %v3902_v37 = vadd.f32 %v4751_v45, %v3901_v35 }
0x21c3   :  { %v3906_v49 = vsel %vm3905_vm5, %v4751_v45, %v3902_v37 }
0x21c4   :  { %v3911_v44 = vsel %vm3908_vm6, %v3910_v51, %v3906_v49 }
0x21c5   :  { %v3912_v59 = vmul.f32 %v4745_v27, %v3911_v44 }
0x21c7   :  { %4533 = vmatmul.msk.f32.vlgmr.msrb.gmra.mxu2 %vm346_vm1, %v3912_v59 }
0x2221   :  { %v3993_v15 = vpop.xlane.xlu2 %3992 }
0x2222   :  { %4752 = vrcp.f32 %v3993_v15  ;;  %v4005_v52 = vand.u32 2147483648, %v3993_v15  ;;  %v4003_v17 = vand.u32 2147483647, %v3993_v15  ;;  %vm3999_vm8 = vweird.f32 %v3993_v15 }
0x2224   :  { %v4006_v55 = vor.u32 1.1754944e-38, %v4005_v52  ;;  %vm4004_vm10 = vcmp.eq.f32.partialorder %v4003_v17, 8.507059e+37 }
0x2228   :  { %v4753_v13 = vpop.eup %4752 }
0x2229   :  { %v3995_v25 = vmul.f32 %v4753_v13, %v3993_v15  ;;  %v4062_v54 = vpop.xlane.xlu2 %4061  ;;  %vm4000_vm7 = vweird.f32 %v4753_v13 }
0x222a   :  { %v4066_v24 = vmul.f32 %v4062_v54, %v5142_v60  ;;  %vm4001_vm9 = vmor %vm3999_vm8, %vm4000_vm7 }
0x222b   :  { %v3996_v12 = vsub.f32 1.0, %v3995_v25 }
0x222c   :  { %v4068_v38 = vsub.f32 %v4058_v31, %v4066_v24 }
0x222d   :  { %v3997_v28 = vmul.f32 %v4753_v13, %v3996_v12 }
0x222e   :  { %v4070_v8 = vmul.f32 %v4068_v38, %v4068_v38 }
0x222f   :  { %v3998_v50 = vadd.f32 %v4753_v13, %v3997_v28 }
0x2230   :  { %v4072_v2 = vsel %vm206_vm0, %v4070_v8, 0.0 }
0x2231   :  { %v4002_v36 = vsel %vm4001_vm9, %v4753_v13, %v3998_v50  ;;  %4073 = vadd.xlane.f32.xlu1 %v4072_v2 }
0x2232   :  { %v4007_v30 = vsel %vm4004_vm10, %v4006_v55, %v4002_v36 }
0x2233   :  { %v4008_v4 = vmul.f32 %v5847_v29, %v4007_v30 }
0x2235   :  { %4537 = vmatmul.msk.f32.vlgmr.msrb.gmra.mxu1 %vm346_vm1, %v4008_v4 }
0x2242   :  { %v3815_v57 = vpop.f32.mrf.mxu2 }
0x2243   :  { %4529 = vmatmul.msk.f32.vlgmr.msra.gmra.mxu3 %vm346_vm1, %v3815_v57 }
0x2244   :  { %4126 = vmatpush.msra.mxu3 %v4820_v40 }
0x2246   :  { %4127 = vmatpush.msra.mxu3 %v4821_v23 }
0x2248   :  { %4128 = vmatpush.msra.mxu3 %v4822_v22 }
0x224a   :  { %v3933_v62 = vpop.f32.mrf.mxu2  ;;  %4129 = vmatpush.msra.mxu3 %v4823_v7 }
0x224b   :  { %4534 = vmatmul.msk.f32.vlgmr.msrb.gmra.mxu3 %vm346_vm1, %v3933_v62 }
0x22a4   :  { %v4074_v27 = vpop.xlane.xlu1 %4073 }
0x22a5   :  { %v4078_v0 = vmul.f32 %v4074_v27, %v5142_v60 }
0x22a7   :  { %v4080_v14 = vadd.f32 1e-05, %v4078_v0 }
0x22a9   :  { %4754 = vrsqrt.f32 %v4080_v14  ;;  %vm4088_vm12 = vweird.f32 %v4080_v14 }
0x22af   :  { %v4755_v9 = vpop.eup %4754 }
0x22b0   :  { %v4083_v46 = vmul.f32 %v4755_v9, %v4080_v14  ;;  %vm4089_vm11 = vweird.f32 %v4755_v9 }
0x22b1   :  { %vm4090_vm13 = vmor %vm4088_vm12, %vm4089_vm11 }
0x22b2   :  { %v4084_v10 = vmul.f32 %v4755_v9, %v4083_v46  ;;  %v4029_v19 = vpop.f32.mrf.mxu1 }
0x22b3   :  { %4538 = vmatmul.msk.f32.vlgmr.msra.gmra.mxu2 %vm346_vm1, %v4029_v19  ;;  %v5896_v19 = vld [vmem:[%s5445_s14] ss:$0 sm:$0xff] }
0x22b4   :  { %v4085_v21 = vmul.f32 0.5, %v4084_v10 }
0x22b6   :  { %v4086_v29 = vsub.f32 1.5, %v4085_v21 }
0x22b8   :  { %v4087_v48 = vmul.f32 %v4755_v9, %v4086_v29 }
0x22ba   :  { %v4091_v56 = vsel %vm4090_vm13, %v4755_v9, %v4087_v48 }
0x22bb   :  { %v4102_v31 = vmul.f32 %v4091_v56, %v4068_v38 }
0x22bd   :  { %v4104_v20 = vmul.f32 %v5873_v41, %v4102_v31 }
0x22bf   :  { %v5880_v63 = vadd.f32 %v5877_v18, %v4104_v20 }
0x22c1   :  { %4539 = vmatmul.msk.f32.vlgmr.msra.gmra.mxu3 %vm206_vm0, %v5880_v63 }
0x22c6   :  { %v3838_v61 = vpop.f32.mrf.mxu3 }
0x22c7   :  { %v3862_v53 = vadd.f32 %v5841_v39, %v3838_v61 }
0x22ce   :  { %v3956_v42 = vpop.f32.mrf.mxu3 }
0x22cf   :  { %v3959_v11 = vadd.f32 %v3956_v42, %v3862_v53 }
0x2336   :  { %v4052_v33 = vpop.f32.mrf.mxu2 }
0x2337   :  { %v4055_v45 = vadd.f32 %v4052_v33, %v3959_v11 }
0x2339   :  { %v4057_v1 = vadd.f32 %v5850_v32, %v4055_v45 }
0x233b   :  { %v4059_v16 = vadd.f32 %v4057_v1, %v5764_v5 }
0x233d   :  { %v4063_v47 = vsel %vm206_vm0, %v4059_v16, 0.0 }
0x233e   :  { %4064 = vadd.xlane.f32.xlu2 %v4063_v47 }
0x2344   :  { %v4131_v34 = vpop.f32.mrf.mxu3 }
0x2345   :  { %v4132_v6 = vadd.f32 %v5889_v43, %v4131_v34 }
0x2347   :  { %v4139_v26 = vmul.f32 0.70710677, %v4132_v6  ;;  %v4137_v22 = vmul.f32 0.5, %v4132_v6 }
0x2349   :  { %v4145_v35 = vand.u32 2147483647, %v4139_v26  ;;  %vm4141_vm3 = vcmp.ge.f32.partialorder %v4139_v26, 0.0 }
0x234a   :  { %v4143_v40 = vsel %vm4141_vm3, 1.0, %v4859_v3 }
0x234b   :  { %v4147_v58 = vmul.f32 0.3275911, %v4145_v35  ;;  %v4199_v54 = vsub.f32 0.0, %v4145_v35 }
0x234d   :  { %v4149_v37 = vadd.f32 1.0, %v4147_v58  ;;  %v4201_v52 = vmul.f32 %v4199_v54, %v4145_v35 }
0x234f   :  { %4756 = vrcp.f32 %v4149_v37  ;;  %v4162_v44 = vand.u32 2147483648, %v4149_v37  ;;  %v4160_v5 = vand.u32 2147483647, %v4149_v37  ;;  %vm4156_vm14 = vweird.f32 %v4149_v37 }
0x2350   :  { %v4203_v17 = vmul.f32 1.442695, %v4201_v52 }
0x2351   :  { %v4163_v15 = vor.u32 1.1754944e-38, %v4162_v44  ;;  %vm4161_vm2 = vcmp.eq.f32.partialorder %v4160_v5, 8.507059e+37 }
0x2352   :  { %4758 = vpow2.f32 %v4203_v17 }
0x2355   :  { %v4757_v39 = vpop.eup %4756 }
0x2356   :  { %v4152_v51 = vmul.f32 %v4757_v39, %v4149_v37  ;;  %vm4157_vm1 = vweird.f32 %v4757_v39 }
0x2357   :  { %vm4158_vm15 = vmor %vm4156_vm14, %vm4157_vm1 }
0x2358   :  { %v4153_v49 = vsub.f32 1.0, %v4152_v51  ;;  %v4759_v30 = vpop.eup %4758 }
0x235a   :  { %v4154_v32 = vmul.f32 %v4757_v39, %v4153_v49 }
0x235c   :  { %v4155_v59 = vadd.f32 %v4757_v39, %v4154_v32 }
0x235e   :  { %v4159_v13 = vsel %vm4158_vm15, %v4757_v39, %v4155_v59 }
0x235f   :  { %v4164_v25 = vsel %vm4161_vm2, %v4163_v15, %v4159_v13 }
0x2360   :  { %v4181_v24 = vmul.f32 1.0614054, %v4164_v25 }
0x2362   :  { %v4183_v12 = vadd.f32 -1.4531521, %v4181_v24 }
0x2364   :  { %v4185_v38 = vmul.f32 %v4183_v12, %v4164_v25 }
0x2366   :  { %v4187_v28 = vadd.f32 1.4214138, %v4185_v38 }
0x2368   :  { %v4189_v8 = vmul.f32 %v4187_v28, %v4164_v25 }
0x236a   :  { %v4191_v50 = vadd.f32 -0.28449672, %v4189_v8 }
0x236c   :  { %v4193_v55 = vmul.f32 %v4191_v50, %v4164_v25 }
0x236e   :  { %v4195_v2 = vadd.f32 0.2548296, %v4193_v55 }
0x2370   :  { %v4197_v36 = vmul.f32 %v4195_v2, %v4164_v25 }
0x2372   :  { %v4207_v4 = vmul.f32 %v4759_v30, %v4197_v36 }
0x2374   :  { %v4209_v57 = vsub.f32 1.0, %v4207_v4 }
0x2376   :  { %v4211_v23 = vmul.f32 %v4209_v57, %v4143_v40 }
0x2378   :  { %v4213_v62 = vadd.f32 1.0, %v4211_v23 }
0x237a   :  { %v4215_v7 = vmul.f32 %v4213_v62, %v4137_v22 }
0x237c   :  { %4233 = vmatmul.f32.vlgmr.msra.gmra.mxu0 %v4215_v7 }
0x23b1   :  { %v4065_v27 = vpop.xlane.xlu2 %4064 }
0x23b2   :  { %v4067_v0 = vmul.f32 %v4065_v27, %v5142_v60 }
0x23b4   :  { %v4069_v14 = vsub.f32 %v4059_v16, %v4067_v0 }
0x23b6   :  { %v4071_v9 = vmul.f32 %v4069_v14, %v4069_v14 }
0x23b8   :  { %v4075_v46 = vsel %vm206_vm0, %v4071_v9, 0.0 }
0x23b9   :  { %4076 = vadd.xlane.f32.xlu0 %v4075_v46 }
0x23f9   :  { %v4234_v10 = vpop.f32.mrf.mxu0 }
0x23fa   :  { %v4235_v21 = vadd.f32 %v5896_v19, %v4234_v10 }
0x23fc   :  { %v4240_v29 = vadd.f32 %v4235_v21, %v5880_v63 }
0x23fe   :  { %v4242_v48 = vsel %vm206_vm0, %v4240_v29, 0.0 }
0x23ff   :  { %4243 = vadd.xlane.f32.xlu2 %v4242_v48 }
0x242c   :  { %v4077_v56 = vpop.xlane.xlu0 %4076 }
0x242d   :  { %v4079_v31 = vmul.f32 %v4077_v56, %v5142_v60 }
0x242f   :  { %v4081_v20 = vadd.f32 1e-05, %v4079_v31 }
0x2431   :  { %4760 = vrsqrt.f32 %v4081_v20  ;;  %vm4098_vm5 = vweird.f32 %v4081_v20 }
0x2437   :  { %v4761_v61 = vpop.eup %4760 }
0x2438   :  { %v4093_v42 = vmul.f32 %v4761_v61, %v4081_v20  ;;  %vm4099_vm4 = vweird.f32 %v4761_v61 }
0x2439   :  { %vm4100_vm6 = vmor %vm4098_vm5, %vm4099_vm4  ;;  %vm4315_vm4 = vcmask 1040384   ;;  %vm4348_vm5 = vcmask 1024  }
0x243a   :  { %v4094_v53 = vmul.f32 %v4761_v61, %v4093_v42 }
0x243c   :  { %v4095_v11 = vmul.f32 0.5, %v4094_v53  ;;  %v4829_v53 = vld [vmem:[%s5516_s22] ss:$0 sm:$0xff] }
0x243e   :  { %v4096_v33 = vsub.f32 1.5, %v4095_v11 }
0x2440   :  { %v4097_v45 = vmul.f32 %v4761_v61, %v4096_v33 }
0x2442   :  { %v4101_v1 = vsel %vm4100_vm6, %v4761_v61, %v4097_v45  ;;  %v4828_v61 = vld [vmem:[%s5505_s9] ss:$0 sm:$0xff] }
0x2443   :  { %v4103_v16 = vmul.f32 %v4101_v1, %v4069_v14 }
0x2445   :  { %v4105_v63 = vmul.f32 %v5873_v41, %v4103_v16 }
0x2447   :  { %v5904_v47 = vadd.f32 %v5877_v18, %v4105_v63 }
0x2449   :  { %4540 = vmatmul.msk.f32.gmra.mxu3 %vm206_vm0, %v5904_v47 }
0x2472   :  { %v4244_v34 = vpop.xlane.xlu2 %4243 }
0x2473   :  { %v4248_v6 = vmul.f32 %v4244_v34, %v5142_v60 }
0x2475   :  { %v5909_v26 = vsub.f32 %v4240_v29, %v4248_v6 }
0x2477   :  { %v4252_v35 = vmul.f32 %v5909_v26, %v5909_v26 }
0x2479   :  { %v4254_v58 = vsel %vm206_vm0, %v4252_v35, 0.0 }
0x247a   :  { %4255 = vadd.xlane.f32.xlu0 %v4254_v58 }
0x24cc   :  { %v4134_v37 = vpop.f32.mrf.mxu3 }
0x24cd   :  { %v4135_v41 = vadd.f32 %v5889_v43, %v4134_v37  ;;  %v4319_v37 = vld [vmem:[%s4385_s4 + $0x10] sm:$0xff] }
0x24cf   :  { %v4140_v39 = vmul.f32 0.70710677, %v4135_v41  ;;  %v4138_v29 = vmul.f32 0.5, %v4135_v41 }
0x24d1   :  { %v4146_v18 = vand.u32 2147483647, %v4140_v39  ;;  %vm4142_vm11 = vcmp.ge.f32.partialorder %v4140_v39, 0.0  ;;  %v4318_v39 = vld [vmem:[%s4385_s4 + $0x8] sm:$0xff] }
0x24d2   :  { %v4144_v9 = vsel %vm4142_vm11, 1.0, %v4859_v3 }
0x24d3   :  { %v4148_v51 = vmul.f32 0.3275911, %v4146_v18  ;;  %v4200_v12 = vsub.f32 0.0, %v4146_v18 }
0x24d5   :  { %v4150_v49 = vadd.f32 1.0, %v4148_v51  ;;  %v4202_v28 = vmul.f32 %v4200_v12, %v4146_v18  ;;  %v4317_v18 = vld [vmem:[%s4385_s4] sm:$0xff] }
0x24d7   :  { %4762 = vrcp.f32 %v4150_v49  ;;  %v4177_v59 = vand.u32 2147483648, %v4150_v49  ;;  %v4175_v13 = vand.u32 2147483647, %v4150_v49  ;;  %vm4171_vm8 = vweird.f32 %v4150_v49 }
0x24d8   :  { %v4205_v2 = vmul.f32 1.442695, %v4202_v28 }
0x24d9   :  { %v4178_v54 = vor.u32 1.1754944e-38, %v4177_v59  ;;  %vm4176_vm10 = vcmp.eq.f32.partialorder %v4175_v13, 8.507059e+37 }
0x24dd   :  { %v4763_v44 = vpop.eup %4762 }
0x24de   :  { %v4167_v32 = vmul.f32 %v4763_v44, %v4150_v49  ;;  %vm4172_vm7 = vweird.f32 %v4763_v44 }
0x24df   :  { %vm4173_vm9 = vmor %vm4171_vm8, %vm4172_vm7 }
0x24e0   :  { %v4168_v5 = vsub.f32 1.0, %v4167_v32 }
0x24e2   :  { %v4169_v15 = vmul.f32 %v4763_v44, %v4168_v5 }
0x24e4   :  { %v4170_v25 = vadd.f32 %v4763_v44, %v4169_v15 }
0x24e6   :  { %v4174_v24 = vsel %vm4173_vm9, %v4763_v44, %v4170_v25  ;;  %v69_v44 = vstv %s4386_s27 }
0x24e7   :  { %v4179_v43 = vsel %vm4176_vm10, %v4178_v54, %v4174_v24  ;;  %70 = vst [vmem:[#allocation2] sm:$0x1] %v69_v44 }
0x24e8   :  { %v4182_v52 = vmul.f32 1.0614054, %v4179_v43 }
0x24ea   :  { %v4184_v38 = vadd.f32 -1.4531521, %v4182_v52 }
0x24ec   :  { %v4186_v17 = vmul.f32 %v4184_v38, %v4179_v43 }
0x24ed   :  { %v4256_v8 = vpop.xlane.xlu0 %4255 }
0x24ee   :  { %v4260_v50 = vmul.f32 %v4256_v8, %v5142_v60  ;;  %v4188_v55 = vadd.f32 1.4214138, %v4186_v17 }
0x24f0   :  { %v4262_v36 = vadd.f32 1e-05, %v4260_v50  ;;  %v4190_v30 = vmul.f32 %v4188_v55, %v4179_v43 }
0x24f2   :  { %4764 = vrsqrt.f32 %v4262_v36  ;;  %v4192_v4 = vadd.f32 -0.28449672, %v4190_v30  ;;  %vm4270_vm13 = vweird.f32 %v4262_v36 }
0x24f3   :  { %4766 = vpow2.f32 %v4205_v2 }
0x24f4   :  { %v4194_v57 = vmul.f32 %v4192_v4, %v4179_v43 }
0x24f6   :  { %v4196_v40 = vadd.f32 0.2548296, %v4194_v57 }
0x24f8   :  { %v4765_v23 = vpop.eup %4764  ;;  %v4198_v22 = vmul.f32 %v4196_v40, %v4179_v43 }
0x24f9   :  { %v4767_v62 = vpop.eup %4766  ;;  %v4265_v7 = vmul.f32 %v4765_v23, %v4262_v36  ;;  %vm4271_vm12 = vweird.f32 %v4765_v23 }
0x24fa   :  { %v4208_v27 = vmul.f32 %v4767_v62, %v4198_v22  ;;  %vm4272_vm1 = vmor %vm4270_vm13, %vm4271_vm12 }
0x24fb   :  { %v4266_v0 = vmul.f32 %v4765_v23, %v4265_v7 }
0x24fc   :  { %v4210_v14 = vsub.f32 1.0, %v4208_v27 }
0x24fd   :  { %v4267_v46 = vmul.f32 0.5, %v4266_v0 }
0x24fe   :  { %v4212_v10 = vmul.f32 %v4210_v14, %v4144_v9 }
0x24ff   :  { %v4268_v21 = vsub.f32 1.5, %v4267_v46  ;;  %v4599_v46 = vld [vmem:[#allocation2] ss:$0 sm:$0xff] }
0x2500   :  { %v4214_v48 = vadd.f32 1.0, %v4212_v10 }
0x2501   :  { %v4269_v56 = vmul.f32 %v4765_v23, %v4268_v21 }
0x2502   :  { %v4216_v31 = vmul.f32 %v4214_v48, %v4138_v29 }
0x2503   :  { %v4273_v3 = vsel %vm4272_vm1, %v4765_v23, %v4269_v56 }
0x2504   :  { %v4284_v20 = vmul.f32 %v4273_v3, %v5909_v26  ;;  %4236 = vmatmul.f32.gmra.mxu0 %v4216_v31 }
0x2506   :  { %v4286_v42 = vmul.f32 %v4828_v61, %v4284_v20 }
0x2508   :  { %v4288_v11 = vadd.f32 %v4829_v53, %v4286_v42 }
0x250a   :  { %4290 = vst.msk [vmem:[%s5920_s19] sm:$0xff] %vm206_vm0, %v4288_v11  ;;  %v4292_v5 = vsel %vm206_vm0, %v4288_v11, 0.0 }
0x250b   :  { %v4293_v15 = vrot.slane %v4292_v5, 4 }
0x250d   :  { %v4294_v24 = vadd.f32 %v4293_v15, %v4292_v5 }
0x250f   :  { %v4295_v28 = vrot.slane %v4294_v24, 2 }
0x2511   :  { %v4296_v2 = vadd.f32 %v4295_v28, %v4294_v24 }
0x2513   :  { %v4297_v57 = vrot.slane %v4296_v2, 1 }
0x2515   :  { %v4298_v22 = vadd.f32 %v4297_v57, %v4296_v2 }
0x2581   :  { %v4237_v33 = vpop.f32.mrf.mxu0 }
0x2582   :  { %v4238_v45 = vadd.f32 %v5896_v19, %v4237_v33 }
0x2584   :  { %v4241_v1 = vadd.f32 %v4238_v45, %v5904_v47  ;;  %v4320_v47 = vld [vmem:[%s4385_s4 + $0x18] sm:$0xff] }
0x2585   :  { %4340 = vmatpush.msra.mxu1 %v4320_v47 }
0x2586   :  { %v4245_v16 = vsel %vm206_vm0, %v4241_v1, 0.0 }
0x2587   :  { %4246 = vadd.xlane.f32.xlu1 %v4245_v16  ;;  %4341 = vmatpush.msra.mxu1 %v4319_v37 }
0x2589   :  { %4342 = vmatpush.msra.mxu1 %v4318_v39 }
0x258b   :  { %4343 = vmatpush.msra.mxu1 %v4317_v18 }
0x25fa   :  { %v4247_v63 = vpop.xlane.xlu1 %4246 }
0x25fb   :  { %v4249_v34 = vmul.f32 %v4247_v63, %v5142_v60 }
0x25fd   :  { %v4251_v6 = vsub.f32 %v4241_v1, %v4249_v34 }
0x25ff   :  { %v4253_v26 = vmul.f32 %v4251_v6, %v4251_v6 }
0x2601   :  { %v4257_v35 = vsel %vm206_vm0, %v4253_v26, 0.0 }
0x2602   :  { %4258 = vadd.xlane.f32.xlu2 %v4257_v35 }
0x2675   :  { %v4259_v58 = vpop.xlane.xlu2 %4258 }
0x2676   :  { %v4261_v19 = vmul.f32 %v4259_v58, %v5142_v60  ;;  %v4865_v60 = vmov 8.0  }
0x2678   :  { %v4263_v41 = vadd.f32 1e-05, %v4261_v19 }
0x267a   :  { %4768 = vrsqrt.f32 %v4263_v41  ;;  %vm4280_vm15 = vweird.f32 %v4263_v41 }
0x267b   :  { %4770 = vrcp.f32 %v4865_v60 }
0x2680   :  { %v4769_v51 = vpop.eup %4768 }
0x2681   :  { %v4275_v49 = vmul.f32 %v4769_v51, %v4263_v41  ;;  %vm4281_vm14 = vweird.f32 %v4769_v51  ;;  %v4771_v25 = vpop.eup %4770 }
0x2682   :  { %vm4282_vm2 = vmor %vm4280_vm15, %vm4281_vm14  ;;  %v4300_v52 = vmul.f32 8.0, %v4771_v25  ;;  %vm4304_vm3 = vweird.f32 %v4771_v25 }
0x2683   :  { %v4276_v32 = vmul.f32 %v4769_v51, %v4275_v49 }
0x2684   :  { %v4301_v8 = vsub.f32 1.0, %v4300_v52 }
0x2685   :  { %v4277_v59 = vmul.f32 0.5, %v4276_v32 }
0x2686   :  { %v4302_v36 = vmul.f32 %v4771_v25, %v4301_v8 }
0x2687   :  { %v4278_v13 = vsub.f32 1.5, %v4277_v59 }
0x2688   :  { %v4303_v40 = vadd.f32 %v4771_v25, %v4302_v36 }
0x2689   :  { %v4279_v54 = vmul.f32 %v4769_v51, %v4278_v13 }
0x268a   :  { %v4305_v7 = vsel %vm4304_vm3, %v4771_v25, %v4303_v40 }
0x268b   :  { %v4283_v12 = vsel %vm4282_vm2, %v4769_v51, %v4279_v54  ;;  %v4306_v0 = vmul.f32 %v4305_v7, %v4298_v22 }
0x268c   :  { %v4285_v43 = vmul.f32 %v4283_v12, %v4251_v6 }
0x268e   :  { %v4287_v38 = vmul.f32 %v4828_v61, %v4285_v43 }
0x2690   :  { %v4289_v17 = vadd.f32 %v4829_v53, %v4287_v38 }
0x2692   :  { %4291 = vst.msk [vmem:[%s5920_s19 + $0x8] sm:$0xff] %vm206_vm0, %v4289_v17  ;;  %v4307_v50 = vsel %vm206_vm0, %v4289_v17, 0.0 }
0x2693   :  { %v4308_v55 = vrot.slane %v4307_v50, 4 }
0x2695   :  { %v4309_v30 = vadd.f32 %v4308_v55, %v4307_v50 }
0x2697   :  { %v4310_v4 = vrot.slane %v4309_v30, 2 }
0x2699   :  { %v4311_v23 = vadd.f32 %v4310_v4, %v4309_v30 }
0x269b   :  { %v4312_v62 = vrot.slane %v4311_v23, 1 }
0x269d   :  { %v4313_v27 = vadd.f32 %v4312_v62, %v4311_v23 }
0x269f   :  { %v4314_v14 = vmul.f32 %v4313_v27, %v4305_v7 }
0x26a1   :  { %v4316_v9 = vsel %vm4315_vm4, %v4306_v0, %v4314_v14 }
0x26a2   :  { %4541 = vmatmul.msk.f32.vlgmr.msra.gmra.mxu1 %vm206_vm0, %v4316_v9 }
0x271f   :  { %v4345_v10 = vpop.f32.mrf.mxu1 }
0x2720   :  { %v4346_v21 = vadd.f32 %v4599_v46, %v4345_v10 }
0x2722   :  { %4349 = vst.msk [vmem:[%s4388_s26] sm:$0x3] %vm4348_vm5, %v4346_v21 }

</bundles_post_ra>
